<compile_context>
chip_gen: v7x
topology: tpu7x:2x2x1
jax: 0.10.0
libtpu: 0.0.40
codegen_flags: <defaults>
</compile_context>

<pallas_src>
import functools

import jax
import jax.numpy as jnp
from jax.experimental import pallas as pl
from jax.experimental.pallas import tpu as pltpu


# ---------------------------------------------------------------------------
# In-kernel helpers
# ---------------------------------------------------------------------------

def _pad_into(pad_ref, val):
    """Write `val` (H, W, C) into `pad_ref` ((H+2, W+2, C) VMEM scratch) with a
    1-pixel zero halo.  Replaces the wrapper-side jnp.pad (no HBM round-trip)."""
    H, W = val.shape[0], val.shape[1]
    pad_ref[...] = jnp.zeros_like(pad_ref)          # cheap: halo-sized scratch
    pad_ref[pl.ds(1, H), pl.ds(1, W), :] = val


def _patch3x3(pad_ref, H, W):
    """im2col: build the (H*W, 9*Cin) bf16 patch matrix from a padded
    (H+2, W+2, Cin) scratch so the 3x3 conv is a single MXU contraction with
    K = 9*Cin instead of nine K=Cin matmuls."""
    Cin = pad_ref.shape[-1]
    cols = []
    for dy in range(3):
        for dx in range(3):
            tap = pad_ref[pl.ds(dy, H), pl.ds(dx, W), :]          # (H, W, Cin)
            cols.append(tap.reshape(H * W, Cin).astype(jnp.bfloat16))
    return jnp.concatenate(cols, axis=-1)                          # (H*W, 9*Cin)


def _mm_bias(x_bf16, w_ref, b_ref):
    """bf16 MXU matmul with f32 accumulation, plus f32 bias (broadcast)."""
    return jnp.dot(x_bf16, w_ref[...],
                   preferred_element_type=jnp.float32) + b_ref[...]


# ---------------------------------------------------------------------------
# Kernel A: encoder first conv  (3x3 Cin->C, ReLU)  -> skip tensor e1
# ---------------------------------------------------------------------------

def _enc_kernel(x_ref, w1_ref, b1_ref, e1_ref, xpad_ref):
    # x_ref: (1, H, W, Cin) f32   w1_ref: (9*Cin, C) bf16   b1_ref: (1, C) f32
    # e1_ref: (1, H, W, C) f32    xpad_ref: (H+2, W+2, Cin) f32 scratch
    _, H, W, _ = x_ref.shape
    C = e1_ref.shape[-1]
    _pad_into(xpad_ref, x_ref[0])
    acc = _mm_bias(_patch3x3(xpad_ref, H, W), w1_ref, b1_ref)      # (H*W, C) f32
    acc = jnp.maximum(acc, 0.0)
    e1_ref[0] = acc.reshape(H, W, C).astype(e1_ref.dtype)


# ---------------------------------------------------------------------------
# Kernel B: down 1x1 (s2d already applied) + bottleneck 3x3 + up 1x1
#            -> u4, to be depth_to_space'd by the wrapper.
# Intermediates d and b stay in VMEM (never hit HBM).
# ---------------------------------------------------------------------------

def _mid_kernel(e1s_ref, w2_ref, b2_ref, wb_ref, bb_ref, wu_ref, bu_ref,
                u4_ref, dpad_ref):
    # e1s_ref: (1, H2, W2, 4C) f32  (space_to_depth of the skip e1)
    # w2: (4C, 2C) bf16, b2: (1, 2C) f32      -- 2x2/s2 down conv == s2d + 1x1
    # wb: (9*2C, 2C) bf16, bb: (1, 2C) f32    -- bottleneck 3x3
    # wu: (2C, 4C) bf16, bu: (1, 4C) f32      -- 2x2/s2 up conv == 1x1 + d2s
    # u4_ref: (1, H2, W2, 4C) f32             dpad_ref: (H2+2, W2+2, 2C) f32
    _, H2, W2, _ = e1s_ref.shape
    C2 = w2_ref.shape[-1]
    C4o = u4_ref.shape[-1]

    x = e1s_ref[0].reshape(H2 * W2, e1s_ref.shape[-1]).astype(jnp.bfloat16)
    d = jnp.maximum(_mm_bias(x, w2_ref, b2_ref), 0.0)              # (H2*W2, 2C)

    _pad_into(dpad_ref, d.reshape(H2, W2, C2).astype(dpad_ref.dtype))
    b = jnp.maximum(_mm_bias(_patch3x3(dpad_ref, H2, W2), wb_ref, bb_ref), 0.0)

    u4 = jnp.maximum(_mm_bias(b.astype(jnp.bfloat16), wu_ref, bu_ref), 0.0)
    u4_ref[0] = u4.reshape(H2, W2, C4o).astype(u4_ref.dtype)


# ---------------------------------------------------------------------------
# Kernel C: decoder 3x3 over concat([u, e1]) (as two split-weight matmuls)
#           + output 1x1 + tanh
# ---------------------------------------------------------------------------

def _dec_kernel(u_ref, e1_ref, wdu_ref, wde_ref, bd_ref, wo_ref, bo_ref,
                y_ref, upad_ref, epad_ref):
    # u_ref, e1_ref: (1, H, W, C) f32
    # wdu, wde: (9*C, C) bf16 (split halves of the concat-conv weight)
    # bd: (1, C) f32   wo: (C, Cin) bf16   bo: (1, Cin) f32
    # y_ref: (1, H, W, Cin) f32   upad/epad: (H+2, W+2, C) f32 scratch
    _, H, W, _ = u_ref.shape
    Cin = y_ref.shape[-1]

    _pad_into(upad_ref, u_ref[0])
    _pad_into(epad_ref, e1_ref[0])

    # skip concat folded into two matmuls against split weight halves
    d1 = (_mm_bias(_patch3x3(upad_ref, H, W), wdu_ref, bd_ref)
          + jnp.dot(_patch3x3(epad_ref, H, W), wde_ref[...],
                    preferred_element_type=jnp.float32))
    d1 = jnp.maximum(d1, 0.0)                                      # (H*W, C) f32

    y = jnp.tanh(_mm_bias(d1.astype(jnp.bfloat16), wo_ref, bo_ref))
    y_ref[0] = y.reshape(H, W, Cin).astype(y_ref.dtype)


# ---------------------------------------------------------------------------
# pallas_call wrappers
# ---------------------------------------------------------------------------

def _full_spec(shape):
    """BlockSpec for an array passed whole (weights / biases)."""
    return pl.BlockSpec(shape, lambda n: (0,) * len(shape))


_PARALLEL = pltpu.CompilerParams(dimension_semantics=("parallel",))


def encoder_conv(x, w1, b1):
    N, H, W, Cin = x.shape
    C = w1.shape[-1]
    return pl.pallas_call(
        _enc_kernel,
        out_shape=jax.ShapeDtypeStruct((N, H, W, C), jnp.float32),
        grid_spec=pltpu.PrefetchScalarGridSpec(
            num_scalar_prefetch=0,
            grid=(N,),
            in_specs=[
                pl.BlockSpec((1, H, W, Cin), lambda n: (n, 0, 0, 0)),
                _full_spec(w1.shape),
                _full_spec(b1.shape),
            ],
            out_specs=pl.BlockSpec((1, H, W, C), lambda n: (n, 0, 0, 0)),
            scratch_shapes=[pltpu.VMEM((H + 2, W + 2, Cin), jnp.float32)],
        ),
        compiler_params=_PARALLEL,
    )(x, w1, b1)


def middle_block(e1s, w2, b2, wb, bb, wu, bu):
    N, H2, W2, C4 = e1s.shape
    C2 = w2.shape[-1]
    C4o = wu.shape[-1]
    return pl.pallas_call(
        _mid_kernel,
        out_shape=jax.ShapeDtypeStruct((N, H2, W2, C4o), jnp.float32),
        grid_spec=pltpu.PrefetchScalarGridSpec(
            num_scalar_prefetch=0,
            grid=(N,),
            in_specs=[
                pl.BlockSpec((1, H2, W2, C4), lambda n: (n, 0, 0, 0)),
                _full_spec(w2.shape), _full_spec(b2.shape),
                _full_spec(wb.shape), _full_spec(bb.shape),
                _full_spec(wu.shape), _full_spec(bu.shape),
            ],
            out_specs=pl.BlockSpec((1, H2, W2, C4o), lambda n: (n, 0, 0, 0)),
            scratch_shapes=[pltpu.VMEM((H2 + 2, W2 + 2, C2), jnp.float32)],
        ),
        compiler_params=_PARALLEL,
    )(e1s, w2, b2, wb, bb, wu, bu)


def decoder_block(u, e1, wdu, wde, bd, wo, bo):
    N, H, W, C = u.shape
    Cin = wo.shape[-1]
    return pl.pallas_call(
        _dec_kernel,
        out_shape=jax.ShapeDtypeStruct((N, H, W, Cin), jnp.float32),
        grid_spec=pltpu.PrefetchScalarGridSpec(
            num_scalar_prefetch=0,
            grid=(N,),
            in_specs=[
                pl.BlockSpec((1, H, W, C), lambda n: (n, 0, 0, 0)),
                pl.BlockSpec((1, H, W, C), lambda n: (n, 0, 0, 0)),
                _full_spec(wdu.shape), _full_spec(wde.shape), _full_spec(bd.shape),
                _full_spec(wo.shape), _full_spec(bo.shape),
            ],
            out_specs=pl.BlockSpec((1, H, W, Cin), lambda n: (n, 0, 0, 0)),
            scratch_shapes=[pltpu.VMEM((H + 2, W + 2, C), jnp.float32),
                            pltpu.VMEM((H + 2, W + 2, C), jnp.float32)],
        ),
        compiler_params=_PARALLEL,
    )(u, e1, wdu, wde, bd, wo, bo)


# ---------------- layout glue (no compute, left to XLA) ----------------

def space_to_depth(x):   # (N,H,W,C) -> (N,H/2,W/2,4C)  == 2x2 stride-2 patching
    N, H, W, C = x.shape
    x = x.reshape(N, H // 2, 2, W // 2, 2, C).transpose(0, 1, 3, 2, 4, 5)
    return x.reshape(N, H // 2, W // 2, 4 * C)


def depth_to_space(x):   # (N,H,W,4C) -> (N,2H,2W,C)    == 2x2 stride-2 upsample
    N, H, W, C4 = x.shape
    C = C4 // 4
    x = x.reshape(N, H, W, 2, 2, C).transpose(0, 1, 3, 2, 4, 5)
    return x.reshape(N, 2 * H, 2 * W, C)


# ---------------- parameters ----------------

def _init_conv(key, k_in, cout):
    """Weight packed as (K, Cout) = (kh*kw*Cin, Cout) in bf16 (MXU operand),
    bias kept in f32 (accumulation / activation stay f32)."""
    scale = jnp.float32(jnp.sqrt(2.0 / k_in))
    w = (jax.random.normal(key, (k_in, cout), jnp.float32) * scale).astype(jnp.bfloat16)
    b = (0.01 * jnp.arange(cout, dtype=jnp.float32)).reshape(1, cout)
    return w, b


def init_generator_params(key, in_channels, out_channels):
    ks = jax.random.split(key, 7)
    C = out_channels
    return {
        "enc1": _init_conv(ks[0], 9 * in_channels, C),    # encoder 3x3 conv
        "enc2": _init_conv(ks[1], 4 * C, 2 * C),          # 2x2/s2 down (s2d + 1x1)
        "bott": _init_conv(ks[2], 9 * 2 * C, 2 * C),      # bottleneck 3x3
        "up":   _init_conv(ks[3], 2 * C, 4 * C),          # 2x2/s2 up (1x1 + d2s)
        "dec_u": _init_conv(ks[4], 9 * C, C),             # decoder 3x3, upsample half
        "dec_e": _init_conv(ks[5], 9 * C, C)[0],          # decoder 3x3, skip half
        "out":  _init_conv(ks[6], C, in_channels),        # output 1x1 + tanh
    }


# ---------------- Generator.forward ----------------

def generator_forward(params, x_nchw):
    # NCHW (PyTorch) -> NHWC (kernel layout: channels on lanes, W on sublanes)
    x = jnp.transpose(x_nchw, (0, 2, 3, 1)).astype(jnp.float32)

    # encoder: x, layers = self.encoder(x)
    e1 = encoder_conv(x, *params["enc1"])                 # (N,H,W,C), skip
    e1s = space_to_depth(e1)                              # (N,H/2,W/2,4C)

    # down-conv + bottleneck + up-conv, fused (d, b never touch HBM)
    u4 = middle_block(e1s, *params["enc2"], *params["bott"], *params["up"])
    u = depth_to_space(u4)                                # (N,H,W,C)

    # decoder: x = self.decoder(x, layers)   (skip concat folded into kernel C)
    wdu, bd = params["dec_u"]
    wde = params["dec_e"]
    y = decoder_block(u, e1, wdu, wde, bd, *params["out"])  # (N,H,W,Cin)

    # NHWC -> NCHW
    return jnp.transpose(y, (0, 3, 1, 2))


if __name__ == "__main__":
    key = jax.random.PRNGKey(0)
    pkey, xkey = jax.random.split(key)

    in_channels, out_channels = 3, 8
    N, H, W = 2, 16, 16

    params = init_generator_params(pkey, in_channels, out_channels)
    x = jax.random.normal(xkey, (N, in_channels, H, W), jnp.float32)  # NCHW

    fwd = jax.jit(generator_forward)
    y = jax.block_until_ready(fwd(params, x))

    assert y.shape == (N, in_channels, H, W), y.shape
    assert bool(jnp.all(jnp.isfinite(y)))
    print("KERNEL_OK")
</pallas_src>

<mosaic_0001>
module attributes {stable_mosaic.version = 11 : i64} {
  func.func @_enc_kernel(%arg0: i32, %arg1: memref<1x16x16x3xf32, #tpu.memory_space<vmem>>, %arg2: memref<27x8xbf16, #tpu.memory_space<vmem>>, %arg3: memref<1x8xf32, #tpu.memory_space<vmem>>, %arg4: memref<1x16x16x8xf32, #tpu.memory_space<vmem>>, %arg5: memref<18x18x3xf32, #tpu.memory_space<vmem>>) attributes {dimension_semantics = [#tpu.dimension_semantics<parallel>], iteration_bounds = array<i64: 2>, scalar_prefetch = 0 : i64, scratch_operands = 1 : i64, tpu.core_type = #tpu.core_type<tc>, window_params = [{transform_indices = @transform_0, window_bounds = array<i64: 1, 16, 16, 3>}, {pipeline_mode = #tpu.pipeline_mode<synchronous>, transform_indices = @transform_1, window_bounds = array<i64: 27, 8>}, {pipeline_mode = #tpu.pipeline_mode<synchronous>, transform_indices = @transform_2, window_bounds = array<i64: 1, 8>}, {transform_indices = @transform_3, window_bounds = array<i64: 1, 16, 16, 8>}]} {
    %c0 = arith.constant 0 : index
    %c0_0 = arith.constant 0 : index
    %c0_1 = arith.constant 0 : index
    %c0_2 = arith.constant 0 : index
    %0 = vector.load %arg1[%c0, %c0_0, %c0_1, %c0_2] : memref<1x16x16x3xf32, #tpu.memory_space<vmem>>, vector<1x16x16x3xf32>
    %1 = vector.shape_cast %0 : vector<1x16x16x3xf32> to vector<16x16x3xf32>
    %cst = arith.constant 0.000000e+00 : f32
    %2 = vector.broadcast %cst : f32 to vector<18x18x3xf32>
    %c0_3 = arith.constant 0 : index
    %c0_4 = arith.constant 0 : index
    %c0_5 = arith.constant 0 : index
    %3 = vector.load %arg5[%c0_3, %c0_4, %c0_5] : memref<18x18x3xf32, #tpu.memory_space<vmem>>, vector<18x18x3xf32>
    tpu.vector_store %arg5[%c0_3, %c0_4, %c0_5], %2 {strides = array<i32>} : memref<18x18x3xf32, #tpu.memory_space<vmem>>, vector<18x18x3xf32>,
    %c1 = arith.constant 1 : index
    %c1_6 = arith.constant 1 : index
    %c0_7 = arith.constant 0 : index
    %4 = vector.load %arg5[%c1, %c1_6, %c0_7] : memref<18x18x3xf32, #tpu.memory_space<vmem>>, vector<16x16x3xf32>
    tpu.vector_store %arg5[%c1, %c1_6, %c0_7], %1 {strides = array<i32>} : memref<18x18x3xf32, #tpu.memory_space<vmem>>, vector<16x16x3xf32>,
    %c0_8 = arith.constant 0 : index
    %c0_9 = arith.constant 0 : index
    %c0_10 = arith.constant 0 : index
    %5 = vector.load %arg5[%c0_8, %c0_9, %c0_10] : memref<18x18x3xf32, #tpu.memory_space<vmem>>, vector<16x16x3xf32>
    %6 = vector.shape_cast %5 : vector<16x16x3xf32> to vector<256x3xf32>
    %7 = arith.truncf %6 : vector<256x3xf32> to vector<256x3xbf16>
    %c0_11 = arith.constant 0 : index
    %c1_12 = arith.constant 1 : index
    %c0_13 = arith.constant 0 : index
    %8 = vector.load %arg5[%c0_11, %c1_12, %c0_13] : memref<18x18x3xf32, #tpu.memory_space<vmem>>, vector<16x16x3xf32>
    %9 = vector.shape_cast %8 : vector<16x16x3xf32> to vector<256x3xf32>
    %10 = arith.truncf %9 : vector<256x3xf32> to vector<256x3xbf16>
    %c0_14 = arith.constant 0 : index
    %c2 = arith.constant 2 : index
    %c0_15 = arith.constant 0 : index
    %11 = vector.load %arg5[%c0_14, %c2, %c0_15] : memref<18x18x3xf32, #tpu.memory_space<vmem>>, vector<16x16x3xf32>
    %12 = vector.shape_cast %11 : vector<16x16x3xf32> to vector<256x3xf32>
    %13 = arith.truncf %12 : vector<256x3xf32> to vector<256x3xbf16>
    %c1_16 = arith.constant 1 : index
    %c0_17 = arith.constant 0 : index
    %c0_18 = arith.constant 0 : index
    %14 = vector.load %arg5[%c1_16, %c0_17, %c0_18] : memref<18x18x3xf32, #tpu.memory_space<vmem>>, vector<16x16x3xf32>
    %15 = vector.shape_cast %14 : vector<16x16x3xf32> to vector<256x3xf32>
    %16 = arith.truncf %15 : vector<256x3xf32> to vector<256x3xbf16>
    %c1_19 = arith.constant 1 : index
    %c1_20 = arith.constant 1 : index
    %c0_21 = arith.constant 0 : index
    %17 = vector.load %arg5[%c1_19, %c1_20, %c0_21] : memref<18x18x3xf32, #tpu.memory_space<vmem>>, vector<16x16x3xf32>
    %18 = vector.shape_cast %17 : vector<16x16x3xf32> to vector<256x3xf32>
    %19 = arith.truncf %18 : vector<256x3xf32> to vector<256x3xbf16>
    %c1_22 = arith.constant 1 : index
    %c2_23 = arith.constant 2 : index
    %c0_24 = arith.constant 0 : index
    %20 = vector.load %arg5[%c1_22, %c2_23, %c0_24] : memref<18x18x3xf32, #tpu.memory_space<vmem>>, vector<16x16x3xf32>
    %21 = vector.shape_cast %20 : vector<16x16x3xf32> to vector<256x3xf32>
    %22 = arith.truncf %21 : vector<256x3xf32> to vector<256x3xbf16>
    %c2_25 = arith.constant 2 : index
    %c0_26 = arith.constant 0 : index
    %c0_27 = arith.constant 0 : index
    %23 = vector.load %arg5[%c2_25, %c0_26, %c0_27] : memref<18x18x3xf32, #tpu.memory_space<vmem>>, vector<16x16x3xf32>
    %24 = vector.shape_cast %23 : vector<16x16x3xf32> to vector<256x3xf32>
    %25 = arith.truncf %24 : vector<256x3xf32> to vector<256x3xbf16>
    %c2_28 = arith.constant 2 : index
    %c1_29 = arith.constant 1 : index
    %c0_30 = arith.constant 0 : index
    %26 = vector.load %arg5[%c2_28, %c1_29, %c0_30] : memref<18x18x3xf32, #tpu.memory_space<vmem>>, vector<16x16x3xf32>
    %27 = vector.shape_cast %26 : vector<16x16x3xf32> to vector<256x3xf32>
    %28 = arith.truncf %27 : vector<256x3xf32> to vector<256x3xbf16>
    %c2_31 = arith.constant 2 : index
    %c2_32 = arith.constant 2 : index
    %c0_33 = arith.constant 0 : index
    %29 = vector.load %arg5[%c2_31, %c2_32, %c0_33] : memref<18x18x3xf32, #tpu.memory_space<vmem>>, vector<16x16x3xf32>
    %30 = vector.shape_cast %29 : vector<16x16x3xf32> to vector<256x3xf32>
    %31 = arith.truncf %30 : vector<256x3xf32> to vector<256x3xbf16>
    %32 = tpu.concatenate %7, %10, %13, %16, %19, %22, %25, %28, %31 in 1 : vector<256x3xbf16>, vector<256x3xbf16>, vector<256x3xbf16>, vector<256x3xbf16>, vector<256x3xbf16>, vector<256x3xbf16>, vector<256x3xbf16>, vector<256x3xbf16>, vector<256x3xbf16> -> vector<256x27xbf16>
    %c0_34 = arith.constant 0 : index
    %c0_35 = arith.constant 0 : index
    %33 = vector.load %arg2[%c0_34, %c0_35] : memref<27x8xbf16, #tpu.memory_space<vmem>>, vector<27x8xbf16>
    %cst_36 = arith.constant dense<0.000000e+00> : vector<256x8xf32>
    %34 = tpu.matmul %32, %33, %cst_36 {dimension_numbers = #tpu.dot_dimension_numbers<[1], [0], [0], [1], [0, 0, 1, 1], [], []>} : vector<256x27xbf16>, vector<27x8xbf16>, vector<256x8xf32> -> vector<256x8xf32>
    %c0_37 = arith.constant 0 : index
    %c0_38 = arith.constant 0 : index
    %35 = vector.load %arg3[%c0_37, %c0_38] : memref<1x8xf32, #tpu.memory_space<vmem>>, vector<1x8xf32>
    %36 = vector.broadcast %35 : vector<1x8xf32> to vector<256x8xf32>
    %37 = arith.addf %34, %36 : vector<256x8xf32>
    %cst_39 = arith.constant 0.000000e+00 : f32
    %38 = vector.broadcast %cst_39 : f32 to vector<256x8xf32>
    %39 = arith.maximumf %37, %38 : vector<256x8xf32>
    %40 = vector.shape_cast %39 : vector<256x8xf32> to vector<16x16x8xf32>
    %c0_40 = arith.constant 0 : index
    %c0_41 = arith.constant 0 : index
    %c0_42 = arith.constant 0 : index
    %c0_43 = arith.constant 0 : index
    %41 = vector.load %arg4[%c0_40, %c0_41, %c0_42, %c0_43] : memref<1x16x16x8xf32, #tpu.memory_space<vmem>>, vector<1x16x16x8xf32>
    %42 = vector.shape_cast %41 : vector<1x16x16x8xf32> to vector<16x16x8xf32>
    %43 = vector.shape_cast %40 : vector<16x16x8xf32> to vector<1x16x16x8xf32>
    tpu.vector_store %arg4[%c0_40, %c0_41, %c0_42, %c0_43], %43 {strides = array<i32>} : memref<1x16x16x8xf32, #tpu.memory_space<vmem>>, vector<1x16x16x8xf32>,
    return
  }
  func.func @transform_0(%arg0: i32) -> (i32, i32, i32, i32) {
    %c0_i32 = arith.constant 0 : i32
    %c0_i32_0 = arith.constant 0 : i32
    %c0_i32_1 = arith.constant 0 : i32
    %c0_i32_2 = arith.constant 0 : i32
    return %arg0, %c0_i32, %c0_i32_0, %c0_i32_1 : i32, i32, i32, i32
  }
  func.func @transform_1(%arg0: i32) -> (i32, i32) {
    %c0_i32 = arith.constant 0 : i32
    %c0_i32_0 = arith.constant 0 : i32
    %c0_i32_1 = arith.constant 0 : i32
    return %c0_i32, %c0_i32_0 : i32, i32
  }
  func.func @transform_2(%arg0: i32) -> (i32, i32) {
    %c0_i32 = arith.constant 0 : i32
    %c0_i32_0 = arith.constant 0 : i32
    %c0_i32_1 = arith.constant 0 : i32
    return %c0_i32, %c0_i32_0 : i32, i32
  }
  func.func @transform_3(%arg0: i32) -> (i32, i32, i32, i32) {
    %c0_i32 = arith.constant 0 : i32
    %c0_i32_0 = arith.constant 0 : i32
    %c0_i32_1 = arith.constant 0 : i32
    %c0_i32_2 = arith.constant 0 : i32
    return %arg0, %c0_i32, %c0_i32_0, %c0_i32_1 : i32, i32, i32, i32
  }
}

module attributes {stable_mosaic.version = 11 : i64} {
  func.func @_mid_kernel(%arg0: i32, %arg1: memref<1x8x8x32xf32, #tpu.memory_space<vmem>>, %arg2: memref<32x16xbf16, #tpu.memory_space<vmem>>, %arg3: memref<1x16xf32, #tpu.memory_space<vmem>>, %arg4: memref<144x16xbf16, #tpu.memory_space<vmem>>, %arg5: memref<1x16xf32, #tpu.memory_space<vmem>>, %arg6: memref<16x32xbf16, #tpu.memory_space<vmem>>, %arg7: memref<1x32xf32, #tpu.memory_space<vmem>>, %arg8: memref<1x8x8x32xf32, #tpu.memory_space<vmem>>, %arg9: memref<10x10x16xf32, #tpu.memory_space<vmem>>) attributes {dimension_semantics = [#tpu.dimension_semantics<parallel>], iteration_bounds = array<i64: 2>, scalar_prefetch = 0 : i64, scratch_operands = 1 : i64, tpu.core_type = #tpu.core_type<tc>, window_params = [{transform_indices = @transform_0, window_bounds = array<i64: 1, 8, 8, 32>}, {pipeline_mode = #tpu.pipeline_mode<synchronous>, transform_indices = @transform_1, window_bounds = array<i64: 32, 16>}, {pipeline_mode = #tpu.pipeline_mode<synchronous>, transform_indices = @transform_2, window_bounds = array<i64: 1, 16>}, {pipeline_mode = #tpu.pipeline_mode<synchronous>, transform_indices = @transform_3, window_bounds = array<i64: 144, 16>}, {pipeline_mode = #tpu.pipeline_mode<synchronous>, transform_indices = @transform_4, window_bounds = array<i64: 1, 16>}, {pipeline_mode = #tpu.pipeline_mode<synchronous>, transform_indices = @transform_5, window_bounds = array<i64: 16, 32>}, {pipeline_mode = #tpu.pipeline_mode<synchronous>, transform_indices = @transform_6, window_bounds = array<i64: 1, 32>}, {transform_indices = @transform_7, window_bounds = array<i64: 1, 8, 8, 32>}]} {
    %c0 = arith.constant 0 : index
    %c0_0 = arith.constant 0 : index
    %c0_1 = arith.constant 0 : index
    %c0_2 = arith.constant 0 : index
    %0 = vector.load %arg1[%c0, %c0_0, %c0_1, %c0_2] : memref<1x8x8x32xf32, #tpu.memory_space<vmem>>, vector<1x8x8x32xf32>
    %1 = vector.shape_cast %0 : vector<1x8x8x32xf32> to vector<8x8x32xf32>
    %2 = vector.shape_cast %1 : vector<8x8x32xf32> to vector<64x32xf32>
    %3 = arith.truncf %2 : vector<64x32xf32> to vector<64x32xbf16>
    %c0_3 = arith.constant 0 : index
    %c0_4 = arith.constant 0 : index
    %4 = vector.load %arg2[%c0_3, %c0_4] : memref<32x16xbf16, #tpu.memory_space<vmem>>, vector<32x16xbf16>
    %cst = arith.constant dense<0.000000e+00> : vector<64x16xf32>
    %5 = tpu.matmul %3, %4, %cst {dimension_numbers = #tpu.dot_dimension_numbers<[1], [0], [0], [1], [0, 0, 1, 1], [], []>} : vector<64x32xbf16>, vector<32x16xbf16>, vector<64x16xf32> -> vector<64x16xf32>
    %c0_5 = arith.constant 0 : index
    %c0_6 = arith.constant 0 : index
    %6 = vector.load %arg3[%c0_5, %c0_6] : memref<1x16xf32, #tpu.memory_space<vmem>>, vector<1x16xf32>
    %7 = vector.broadcast %6 : vector<1x16xf32> to vector<64x16xf32>
    %8 = arith.addf %5, %7 : vector<64x16xf32>
    %cst_7 = arith.constant 0.000000e+00 : f32
    %9 = vector.broadcast %cst_7 : f32 to vector<64x16xf32>
    %10 = arith.maximumf %8, %9 : vector<64x16xf32>
    %11 = vector.shape_cast %10 : vector<64x16xf32> to vector<8x8x16xf32>
    %cst_8 = arith.constant 0.000000e+00 : f32
    %12 = vector.broadcast %cst_8 : f32 to vector<10x10x16xf32>
    %c0_9 = arith.constant 0 : index
    %c0_10 = arith.constant 0 : index
    %c0_11 = arith.constant 0 : index
    %13 = vector.load %arg9[%c0_9, %c0_10, %c0_11] : memref<10x10x16xf32, #tpu.memory_space<vmem>>, vector<10x10x16xf32>
    tpu.vector_store %arg9[%c0_9, %c0_10, %c0_11], %12 {strides = array<i32>} : memref<10x10x16xf32, #tpu.memory_space<vmem>>, vector<10x10x16xf32>,
    %c1 = arith.constant 1 : index
    %c1_12 = arith.constant 1 : index
    %c0_13 = arith.constant 0 : index
    %14 = vector.load %arg9[%c1, %c1_12, %c0_13] : memref<10x10x16xf32, #tpu.memory_space<vmem>>, vector<8x8x16xf32>
    tpu.vector_store %arg9[%c1, %c1_12, %c0_13], %11 {strides = array<i32>} : memref<10x10x16xf32, #tpu.memory_space<vmem>>, vector<8x8x16xf32>,
    %c0_14 = arith.constant 0 : index
    %c0_15 = arith.constant 0 : index
    %c0_16 = arith.constant 0 : index
    %15 = vector.load %arg9[%c0_14, %c0_15, %c0_16] : memref<10x10x16xf32, #tpu.memory_space<vmem>>, vector<8x8x16xf32>
    %16 = vector.shape_cast %15 : vector<8x8x16xf32> to vector<64x16xf32>
    %17 = arith.truncf %16 : vector<64x16xf32> to vector<64x16xbf16>
    %c0_17 = arith.constant 0 : index
    %c1_18 = arith.constant 1 : index
    %c0_19 = arith.constant 0 : index
    %18 = vector.load %arg9[%c0_17, %c1_18, %c0_19] : memref<10x10x16xf32, #tpu.memory_space<vmem>>, vector<8x8x16xf32>
    %19 = vector.shape_cast %18 : vector<8x8x16xf32> to vector<64x16xf32>
    %20 = arith.truncf %19 : vector<64x16xf32> to vector<64x16xbf16>
    %c0_20 = arith.constant 0 : index
    %c2 = arith.constant 2 : index
    %c0_21 = arith.constant 0 : index
    %21 = vector.load %arg9[%c0_20, %c2, %c0_21] : memref<10x10x16xf32, #tpu.memory_space<vmem>>, vector<8x8x16xf32>
    %22 = vector.shape_cast %21 : vector<8x8x16xf32> to vector<64x16xf32>
    %23 = arith.truncf %22 : vector<64x16xf32> to vector<64x16xbf16>
    %c1_22 = arith.constant 1 : index
    %c0_23 = arith.constant 0 : index
    %c0_24 = arith.constant 0 : index
    %24 = vector.load %arg9[%c1_22, %c0_23, %c0_24] : memref<10x10x16xf32, #tpu.memory_space<vmem>>, vector<8x8x16xf32>
    %25 = vector.shape_cast %24 : vector<8x8x16xf32> to vector<64x16xf32>
    %26 = arith.truncf %25 : vector<64x16xf32> to vector<64x16xbf16>
    %c1_25 = arith.constant 1 : index
    %c1_26 = arith.constant 1 : index
    %c0_27 = arith.constant 0 : index
    %27 = vector.load %arg9[%c1_25, %c1_26, %c0_27] : memref<10x10x16xf32, #tpu.memory_space<vmem>>, vector<8x8x16xf32>
    %28 = vector.shape_cast %27 : vector<8x8x16xf32> to vector<64x16xf32>
    %29 = arith.truncf %28 : vector<64x16xf32> to vector<64x16xbf16>
    %c1_28 = arith.constant 1 : index
    %c2_29 = arith.constant 2 : index
    %c0_30 = arith.constant 0 : index
    %30 = vector.load %arg9[%c1_28, %c2_29, %c0_30] : memref<10x10x16xf32, #tpu.memory_space<vmem>>, vector<8x8x16xf32>
    %31 = vector.shape_cast %30 : vector<8x8x16xf32> to vector<64x16xf32>
    %32 = arith.truncf %31 : vector<64x16xf32> to vector<64x16xbf16>
    %c2_31 = arith.constant 2 : index
    %c0_32 = arith.constant 0 : index
    %c0_33 = arith.constant 0 : index
    %33 = vector.load %arg9[%c2_31, %c0_32, %c0_33] : memref<10x10x16xf32, #tpu.memory_space<vmem>>, vector<8x8x16xf32>
    %34 = vector.shape_cast %33 : vector<8x8x16xf32> to vector<64x16xf32>
    %35 = arith.truncf %34 : vector<64x16xf32> to vector<64x16xbf16>
    %c2_34 = arith.constant 2 : index
    %c1_35 = arith.constant 1 : index
    %c0_36 = arith.constant 0 : index
    %36 = vector.load %arg9[%c2_34, %c1_35, %c0_36] : memref<10x10x16xf32, #tpu.memory_space<vmem>>, vector<8x8x16xf32>
    %37 = vector.shape_cast %36 : vector<8x8x16xf32> to vector<64x16xf32>
    %38 = arith.truncf %37 : vector<64x16xf32> to vector<64x16xbf16>
    %c2_37 = arith.constant 2 : index
    %c2_38 = arith.constant 2 : index
    %c0_39 = arith.constant 0 : index
    %39 = vector.load %arg9[%c2_37, %c2_38, %c0_39] : memref<10x10x16xf32, #tpu.memory_space<vmem>>, vector<8x8x16xf32>
    %40 = vector.shape_cast %39 : vector<8x8x16xf32> to vector<64x16xf32>
    %41 = arith.truncf %40 : vector<64x16xf32> to vector<64x16xbf16>
    %42 = tpu.concatenate %17, %20, %23, %26, %29, %32, %35, %38, %41 in 1 : vector<64x16xbf16>, vector<64x16xbf16>, vector<64x16xbf16>, vector<64x16xbf16>, vector<64x16xbf16>, vector<64x16xbf16>, vector<64x16xbf16>, vector<64x16xbf16>, vector<64x16xbf16> -> vector<64x144xbf16>
    %c0_40 = arith.constant 0 : index
    %c0_41 = arith.constant 0 : index
    %43 = vector.load %arg4[%c0_40, %c0_41] : memref<144x16xbf16, #tpu.memory_space<vmem>>, vector<144x16xbf16>
    %cst_42 = arith.constant dense<0.000000e+00> : vector<64x16xf32>
    %44 = tpu.matmul %42, %43, %cst_42 {dimension_numbers = #tpu.dot_dimension_numbers<[1], [0], [0], [1], [0, 0, 1, 1], [], []>} : vector<64x144xbf16>, vector<144x16xbf16>, vector<64x16xf32> -> vector<64x16xf32>
    %c0_43 = arith.constant 0 : index
    %c0_44 = arith.constant 0 : index
    %45 = vector.load %arg5[%c0_43, %c0_44] : memref<1x16xf32, #tpu.memory_space<vmem>>, vector<1x16xf32>
    %46 = vector.broadcast %45 : vector<1x16xf32> to vector<64x16xf32>
    %47 = arith.addf %44, %46 : vector<64x16xf32>
    %cst_45 = arith.constant 0.000000e+00 : f32
    %48 = vector.broadcast %cst_45 : f32 to vector<64x16xf32>
    %49 = arith.maximumf %47, %48 : vector<64x16xf32>
    %50 = arith.truncf %49 : vector<64x16xf32> to vector<64x16xbf16>
    %c0_46 = arith.constant 0 : index
    %c0_47 = arith.constant 0 : index
    %51 = vector.load %arg6[%c0_46, %c0_47] : memref<16x32xbf16, #tpu.memory_space<vmem>>, vector<16x32xbf16>
    %cst_48 = arith.constant dense<0.000000e+00> : vector<64x32xf32>
    %52 = tpu.matmul %50, %51, %cst_48 {dimension_numbers = #tpu.dot_dimension_numbers<[1], [0], [0], [1], [0, 0, 1, 1], [], []>} : vector<64x16xbf16>, vector<16x32xbf16>, vector<64x32xf32> -> vector<64x32xf32>
    %c0_49 = arith.constant 0 : index
    %c0_50 = arith.constant 0 : index
    %53 = vector.load %arg7[%c0_49, %c0_50] : memref<1x32xf32, #tpu.memory_space<vmem>>, vector<1x32xf32>
    %54 = vector.broadcast %53 : vector<1x32xf32> to vector<64x32xf32>
    %55 = arith.addf %52, %54 : vector<64x32xf32>
    %cst_51 = arith.constant 0.000000e+00 : f32
    %56 = vector.broadcast %cst_51 : f32 to vector<64x32xf32>
    %57 = arith.maximumf %55, %56 : vector<64x32xf32>
    %58 = vector.shape_cast %57 : vector<64x32xf32> to vector<8x8x32xf32>
    %c0_52 = arith.constant 0 : index
    %c0_53 = arith.constant 0 : index
    %c0_54 = arith.constant 0 : index
    %c0_55 = arith.constant 0 : index
    %59 = vector.load %arg8[%c0_52, %c0_53, %c0_54, %c0_55] : memref<1x8x8x32xf32, #tpu.memory_space<vmem>>, vector<1x8x8x32xf32>
    %60 = vector.shape_cast %59 : vector<1x8x8x32xf32> to vector<8x8x32xf32>
    %61 = vector.shape_cast %58 : vector<8x8x32xf32> to vector<1x8x8x32xf32>
    tpu.vector_store %arg8[%c0_52, %c0_53, %c0_54, %c0_55], %61 {strides = array<i32>} : memref<1x8x8x32xf32, #tpu.memory_space<vmem>>, vector<1x8x8x32xf32>,
    return
  }
  func.func @transform_0(%arg0: i32) -> (i32, i32, i32, i32) {
    %c0_i32 = arith.constant 0 : i32
    %c0_i32_0 = arith.constant 0 : i32
    %c0_i32_1 = arith.constant 0 : i32
    %c0_i32_2 = arith.constant 0 : i32
    return %arg0, %c0_i32, %c0_i32_0, %c0_i32_1 : i32, i32, i32, i32
  }
  func.func @transform_1(%arg0: i32) -> (i32, i32) {
    %c0_i32 = arith.constant 0 : i32
    %c0_i32_0 = arith.constant 0 : i32
    %c0_i32_1 = arith.constant 0 : i32
    return %c0_i32, %c0_i32_0 : i32, i32
  }
  func.func @transform_2(%arg0: i32) -> (i32, i32) {
    %c0_i32 = arith.constant 0 : i32
    %c0_i32_0 = arith.constant 0 : i32
    %c0_i32_1 = arith.constant 0 : i32
    return %c0_i32, %c0_i32_0 : i32, i32
  }
  func.func @transform_3(%arg0: i32) -> (i32, i32) {
    %c0_i32 = arith.constant 0 : i32
    %c0_i32_0 = arith.constant 0 : i32
    %c0_i32_1 = arith.constant 0 : i32
    return %c0_i32, %c0_i32_0 : i32, i32
  }
  func.func @transform_4(%arg0: i32) -> (i32, i32) {
    %c0_i32 = arith.constant 0 : i32
    %c0_i32_0 = arith.constant 0 : i32
    %c0_i32_1 = arith.constant 0 : i32
    return %c0_i32, %c0_i32_0 : i32, i32
  }
  func.func @transform_5(%arg0: i32) -> (i32, i32) {
    %c0_i32 = arith.constant 0 : i32
    %c0_i32_0 = arith.constant 0 : i32
    %c0_i32_1 = arith.constant 0 : i32
    return %c0_i32, %c0_i32_0 : i32, i32
  }
  func.func @transform_6(%arg0: i32) -> (i32, i32) {
    %c0_i32 = arith.constant 0 : i32
    %c0_i32_0 = arith.constant 0 : i32
    %c0_i32_1 = arith.constant 0 : i32
    return %c0_i32, %c0_i32_0 : i32, i32
  }
  func.func @transform_7(%arg0: i32) -> (i32, i32, i32, i32) {
    %c0_i32 = arith.constant 0 : i32
    %c0_i32_0 = arith.constant 0 : i32
    %c0_i32_1 = arith.constant 0 : i32
    %c0_i32_2 = arith.constant 0 : i32
    return %arg0, %c0_i32, %c0_i32_0, %c0_i32_1 : i32, i32, i32, i32
  }
}

module attributes {stable_mosaic.version = 11 : i64} {
  func.func @_dec_kernel(%arg0: i32, %arg1: memref<1x16x16x8xf32, #tpu.memory_space<vmem>>, %arg2: memref<1x16x16x8xf32, #tpu.memory_space<vmem>>, %arg3: memref<72x8xbf16, #tpu.memory_space<vmem>>, %arg4: memref<72x8xbf16, #tpu.memory_space<vmem>>, %arg5: memref<1x8xf32, #tpu.memory_space<vmem>>, %arg6: memref<8x3xbf16, #tpu.memory_space<vmem>>, %arg7: memref<1x3xf32, #tpu.memory_space<vmem>>, %arg8: memref<1x16x16x3xf32, #tpu.memory_space<vmem>>, %arg9: memref<18x18x8xf32, #tpu.memory_space<vmem>>, %arg10: memref<18x18x8xf32, #tpu.memory_space<vmem>>) attributes {dimension_semantics = [#tpu.dimension_semantics<parallel>], iteration_bounds = array<i64: 2>, scalar_prefetch = 0 : i64, scratch_operands = 2 : i64, tpu.core_type = #tpu.core_type<tc>, window_params = [{transform_indices = @transform_0, window_bounds = array<i64: 1, 16, 16, 8>}, {transform_indices = @transform_1, window_bounds = array<i64: 1, 16, 16, 8>}, {pipeline_mode = #tpu.pipeline_mode<synchronous>, transform_indices = @transform_2, window_bounds = array<i64: 72, 8>}, {pipeline_mode = #tpu.pipeline_mode<synchronous>, transform_indices = @transform_3, window_bounds = array<i64: 72, 8>}, {pipeline_mode = #tpu.pipeline_mode<synchronous>, transform_indices = @transform_4, window_bounds = array<i64: 1, 8>}, {pipeline_mode = #tpu.pipeline_mode<synchronous>, transform_indices = @transform_5, window_bounds = array<i64: 8, 3>}, {pipeline_mode = #tpu.pipeline_mode<synchronous>, transform_indices = @transform_6, window_bounds = array<i64: 1, 3>}, {transform_indices = @transform_7, window_bounds = array<i64: 1, 16, 16, 3>}]} {
    %c0 = arith.constant 0 : index
    %c0_0 = arith.constant 0 : index
    %c0_1 = arith.constant 0 : index
    %c0_2 = arith.constant 0 : index
    %0 = vector.load %arg1[%c0, %c0_0, %c0_1, %c0_2] : memref<1x16x16x8xf32, #tpu.memory_space<vmem>>, vector<1x16x16x8xf32>
    %1 = vector.shape_cast %0 : vector<1x16x16x8xf32> to vector<16x16x8xf32>
    %cst = arith.constant 0.000000e+00 : f32
    %2 = vector.broadcast %cst : f32 to vector<18x18x8xf32>
    %c0_3 = arith.constant 0 : index
    %c0_4 = arith.constant 0 : index
    %c0_5 = arith.constant 0 : index
    %3 = vector.load %arg9[%c0_3, %c0_4, %c0_5] : memref<18x18x8xf32, #tpu.memory_space<vmem>>, vector<18x18x8xf32>
    tpu.vector_store %arg9[%c0_3, %c0_4, %c0_5], %2 {strides = array<i32>} : memref<18x18x8xf32, #tpu.memory_space<vmem>>, vector<18x18x8xf32>,
    %c1 = arith.constant 1 : index
    %c1_6 = arith.constant 1 : index
    %c0_7 = arith.constant 0 : index
    %4 = vector.load %arg9[%c1, %c1_6, %c0_7] : memref<18x18x8xf32, #tpu.memory_space<vmem>>, vector<16x16x8xf32>
    tpu.vector_store %arg9[%c1, %c1_6, %c0_7], %1 {strides = array<i32>} : memref<18x18x8xf32, #tpu.memory_space<vmem>>, vector<16x16x8xf32>,
    %c0_8 = arith.constant 0 : index
    %c0_9 = arith.constant 0 : index
    %c0_10 = arith.constant 0 : index
    %c0_11 = arith.constant 0 : index
    %5 = vector.load %arg2[%c0_8, %c0_9, %c0_10, %c0_11] : memref<1x16x16x8xf32, #tpu.memory_space<vmem>>, vector<1x16x16x8xf32>
    %6 = vector.shape_cast %5 : vector<1x16x16x8xf32> to vector<16x16x8xf32>
    %cst_12 = arith.constant 0.000000e+00 : f32
    %7 = vector.broadcast %cst_12 : f32 to vector<18x18x8xf32>
    %c0_13 = arith.constant 0 : index
    %c0_14 = arith.constant 0 : index
    %c0_15 = arith.constant 0 : index
    %8 = vector.load %arg10[%c0_13, %c0_14, %c0_15] : memref<18x18x8xf32, #tpu.memory_space<vmem>>, vector<18x18x8xf32>
    tpu.vector_store %arg10[%c0_13, %c0_14, %c0_15], %7 {strides = array<i32>} : memref<18x18x8xf32, #tpu.memory_space<vmem>>, vector<18x18x8xf32>,
    %c1_16 = arith.constant 1 : index
    %c1_17 = arith.constant 1 : index
    %c0_18 = arith.constant 0 : index
    %9 = vector.load %arg10[%c1_16, %c1_17, %c0_18] : memref<18x18x8xf32, #tpu.memory_space<vmem>>, vector<16x16x8xf32>
    tpu.vector_store %arg10[%c1_16, %c1_17, %c0_18], %6 {strides = array<i32>} : memref<18x18x8xf32, #tpu.memory_space<vmem>>, vector<16x16x8xf32>,
    %c0_19 = arith.constant 0 : index
    %c0_20 = arith.constant 0 : index
    %c0_21 = arith.constant 0 : index
    %10 = vector.load %arg9[%c0_19, %c0_20, %c0_21] : memref<18x18x8xf32, #tpu.memory_space<vmem>>, vector<16x16x8xf32>
    %11 = vector.shape_cast %10 : vector<16x16x8xf32> to vector<256x8xf32>
    %12 = arith.truncf %11 : vector<256x8xf32> to vector<256x8xbf16>
    %c0_22 = arith.constant 0 : index
    %c1_23 = arith.constant 1 : index
    %c0_24 = arith.constant 0 : index
    %13 = vector.load %arg9[%c0_22, %c1_23, %c0_24] : memref<18x18x8xf32, #tpu.memory_space<vmem>>, vector<16x16x8xf32>
    %14 = vector.shape_cast %13 : vector<16x16x8xf32> to vector<256x8xf32>
    %15 = arith.truncf %14 : vector<256x8xf32> to vector<256x8xbf16>
    %c0_25 = arith.constant 0 : index
    %c2 = arith.constant 2 : index
    %c0_26 = arith.constant 0 : index
    %16 = vector.load %arg9[%c0_25, %c2, %c0_26] : memref<18x18x8xf32, #tpu.memory_space<vmem>>, vector<16x16x8xf32>
    %17 = vector.shape_cast %16 : vector<16x16x8xf32> to vector<256x8xf32>
    %18 = arith.truncf %17 : vector<256x8xf32> to vector<256x8xbf16>
    %c1_27 = arith.constant 1 : index
    %c0_28 = arith.constant 0 : index
    %c0_29 = arith.constant 0 : index
    %19 = vector.load %arg9[%c1_27, %c0_28, %c0_29] : memref<18x18x8xf32, #tpu.memory_space<vmem>>, vector<16x16x8xf32>
    %20 = vector.shape_cast %19 : vector<16x16x8xf32> to vector<256x8xf32>
    %21 = arith.truncf %20 : vector<256x8xf32> to vector<256x8xbf16>
    %c1_30 = arith.constant 1 : index
    %c1_31 = arith.constant 1 : index
    %c0_32 = arith.constant 0 : index
    %22 = vector.load %arg9[%c1_30, %c1_31, %c0_32] : memref<18x18x8xf32, #tpu.memory_space<vmem>>, vector<16x16x8xf32>
    %23 = vector.shape_cast %22 : vector<16x16x8xf32> to vector<256x8xf32>
    %24 = arith.truncf %23 : vector<256x8xf32> to vector<256x8xbf16>
    %c1_33 = arith.constant 1 : index
    %c2_34 = arith.constant 2 : index
    %c0_35 = arith.constant 0 : index
    %25 = vector.load %arg9[%c1_33, %c2_34, %c0_35] : memref<18x18x8xf32, #tpu.memory_space<vmem>>, vector<16x16x8xf32>
    %26 = vector.shape_cast %25 : vector<16x16x8xf32> to vector<256x8xf32>
    %27 = arith.truncf %26 : vector<256x8xf32> to vector<256x8xbf16>
    %c2_36 = arith.constant 2 : index
    %c0_37 = arith.constant 0 : index
    %c0_38 = arith.constant 0 : index
    %28 = vector.load %arg9[%c2_36, %c0_37, %c0_38] : memref<18x18x8xf32, #tpu.memory_space<vmem>>, vector<16x16x8xf32>
    %29 = vector.shape_cast %28 : vector<16x16x8xf32> to vector<256x8xf32>
    %30 = arith.truncf %29 : vector<256x8xf32> to vector<256x8xbf16>
    %c2_39 = arith.constant 2 : index
    %c1_40 = arith.constant 1 : index
    %c0_41 = arith.constant 0 : index
    %31 = vector.load %arg9[%c2_39, %c1_40, %c0_41] : memref<18x18x8xf32, #tpu.memory_space<vmem>>, vector<16x16x8xf32>
    %32 = vector.shape_cast %31 : vector<16x16x8xf32> to vector<256x8xf32>
    %33 = arith.truncf %32 : vector<256x8xf32> to vector<256x8xbf16>
    %c2_42 = arith.constant 2 : index
    %c2_43 = arith.constant 2 : index
    %c0_44 = arith.constant 0 : index
    %34 = vector.load %arg9[%c2_42, %c2_43, %c0_44] : memref<18x18x8xf32, #tpu.memory_space<vmem>>, vector<16x16x8xf32>
    %35 = vector.shape_cast %34 : vector<16x16x8xf32> to vector<256x8xf32>
    %36 = arith.truncf %35 : vector<256x8xf32> to vector<256x8xbf16>
    %37 = tpu.concatenate %12, %15, %18, %21, %24, %27, %30, %33, %36 in 1 : vector<256x8xbf16>, vector<256x8xbf16>, vector<256x8xbf16>, vector<256x8xbf16>, vector<256x8xbf16>, vector<256x8xbf16>, vector<256x8xbf16>, vector<256x8xbf16>, vector<256x8xbf16> -> vector<256x72xbf16>
    %c0_45 = arith.constant 0 : index
    %c0_46 = arith.constant 0 : index
    %38 = vector.load %arg3[%c0_45, %c0_46] : memref<72x8xbf16, #tpu.memory_space<vmem>>, vector<72x8xbf16>
    %cst_47 = arith.constant dense<0.000000e+00> : vector<256x8xf32>
    %39 = tpu.matmul %37, %38, %cst_47 {dimension_numbers = #tpu.dot_dimension_numbers<[1], [0], [0], [1], [0, 0, 1, 1], [], []>} : vector<256x72xbf16>, vector<72x8xbf16>, vector<256x8xf32> -> vector<256x8xf32>
    %c0_48 = arith.constant 0 : index
    %c0_49 = arith.constant 0 : index
    %40 = vector.load %arg5[%c0_48, %c0_49] : memref<1x8xf32, #tpu.memory_space<vmem>>, vector<1x8xf32>
    %41 = vector.broadcast %40 : vector<1x8xf32> to vector<256x8xf32>
    %42 = arith.addf %39, %41 : vector<256x8xf32>
    %c0_50 = arith.constant 0 : index
    %c0_51 = arith.constant 0 : index
    %c0_52 = arith.constant 0 : index
    %43 = vector.load %arg10[%c0_50, %c0_51, %c0_52] : memref<18x18x8xf32, #tpu.memory_space<vmem>>, vector<16x16x8xf32>
    %44 = vector.shape_cast %43 : vector<16x16x8xf32> to vector<256x8xf32>
    %45 = arith.truncf %44 : vector<256x8xf32> to vector<256x8xbf16>
    %c0_53 = arith.constant 0 : index
    %c1_54 = arith.constant 1 : index
    %c0_55 = arith.constant 0 : index
    %46 = vector.load %arg10[%c0_53, %c1_54, %c0_55] : memref<18x18x8xf32, #tpu.memory_space<vmem>>, vector<16x16x8xf32>
    %47 = vector.shape_cast %46 : vector<16x16x8xf32> to vector<256x8xf32>
    %48 = arith.truncf %47 : vector<256x8xf32> to vector<256x8xbf16>
    %c0_56 = arith.constant 0 : index
    %c2_57 = arith.constant 2 : index
    %c0_58 = arith.constant 0 : index
    %49 = vector.load %arg10[%c0_56, %c2_57, %c0_58] : memref<18x18x8xf32, #tpu.memory_space<vmem>>, vector<16x16x8xf32>
    %50 = vector.shape_cast %49 : vector<16x16x8xf32> to vector<256x8xf32>
    %51 = arith.truncf %50 : vector<256x8xf32> to vector<256x8xbf16>
    %c1_59 = arith.constant 1 : index
    %c0_60 = arith.constant 0 : index
    %c0_61 = arith.constant 0 : index
    %52 = vector.load %arg10[%c1_59, %c0_60, %c0_61] : memref<18x18x8xf32, #tpu.memory_space<vmem>>, vector<16x16x8xf32>
    %53 = vector.shape_cast %52 : vector<16x16x8xf32> to vector<256x8xf32>
    %54 = arith.truncf %53 : vector<256x8xf32> to vector<256x8xbf16>
    %c1_62 = arith.constant 1 : index
    %c1_63 = arith.constant 1 : index
    %c0_64 = arith.constant 0 : index
    %55 = vector.load %arg10[%c1_62, %c1_63, %c0_64] : memref<18x18x8xf32, #tpu.memory_space<vmem>>, vector<16x16x8xf32>
    %56 = vector.shape_cast %55 : vector<16x16x8xf32> to vector<256x8xf32>
    %57 = arith.truncf %56 : vector<256x8xf32> to vector<256x8xbf16>
    %c1_65 = arith.constant 1 : index
    %c2_66 = arith.constant 2 : index
    %c0_67 = arith.constant 0 : index
    %58 = vector.load %arg10[%c1_65, %c2_66, %c0_67] : memref<18x18x8xf32, #tpu.memory_space<vmem>>, vector<16x16x8xf32>
    %59 = vector.shape_cast %58 : vector<16x16x8xf32> to vector<256x8xf32>
    %60 = arith.truncf %59 : vector<256x8xf32> to vector<256x8xbf16>
    %c2_68 = arith.constant 2 : index
    %c0_69 = arith.constant 0 : index
    %c0_70 = arith.constant 0 : index
    %61 = vector.load %arg10[%c2_68, %c0_69, %c0_70] : memref<18x18x8xf32, #tpu.memory_space<vmem>>, vector<16x16x8xf32>
    %62 = vector.shape_cast %61 : vector<16x16x8xf32> to vector<256x8xf32>
    %63 = arith.truncf %62 : vector<256x8xf32> to vector<256x8xbf16>
    %c2_71 = arith.constant 2 : index
    %c1_72 = arith.constant 1 : index
    %c0_73 = arith.constant 0 : index
    %64 = vector.load %arg10[%c2_71, %c1_72, %c0_73] : memref<18x18x8xf32, #tpu.memory_space<vmem>>, vector<16x16x8xf32>
    %65 = vector.shape_cast %64 : vector<16x16x8xf32> to vector<256x8xf32>
    %66 = arith.truncf %65 : vector<256x8xf32> to vector<256x8xbf16>
    %c2_74 = arith.constant 2 : index
    %c2_75 = arith.constant 2 : index
    %c0_76 = arith.constant 0 : index
    %67 = vector.load %arg10[%c2_74, %c2_75, %c0_76] : memref<18x18x8xf32, #tpu.memory_space<vmem>>, vector<16x16x8xf32>
    %68 = vector.shape_cast %67 : vector<16x16x8xf32> to vector<256x8xf32>
    %69 = arith.truncf %68 : vector<256x8xf32> to vector<256x8xbf16>
    %70 = tpu.concatenate %45, %48, %51, %54, %57, %60, %63, %66, %69 in 1 : vector<256x8xbf16>, vector<256x8xbf16>, vector<256x8xbf16>, vector<256x8xbf16>, vector<256x8xbf16>, vector<256x8xbf16>, vector<256x8xbf16>, vector<256x8xbf16>, vector<256x8xbf16> -> vector<256x72xbf16>
    %c0_77 = arith.constant 0 : index
    %c0_78 = arith.constant 0 : index
    %71 = vector.load %arg4[%c0_77, %c0_78] : memref<72x8xbf16, #tpu.memory_space<vmem>>, vector<72x8xbf16>
    %cst_79 = arith.constant dense<0.000000e+00> : vector<256x8xf32>
    %72 = tpu.matmul %70, %71, %cst_79 {dimension_numbers = #tpu.dot_dimension_numbers<[1], [0], [0], [1], [0, 0, 1, 1], [], []>} : vector<256x72xbf16>, vector<72x8xbf16>, vector<256x8xf32> -> vector<256x8xf32>
    %73 = arith.addf %42, %72 : vector<256x8xf32>
    %cst_80 = arith.constant 0.000000e+00 : f32
    %74 = vector.broadcast %cst_80 : f32 to vector<256x8xf32>
    %75 = arith.maximumf %73, %74 : vector<256x8xf32>
    %76 = arith.truncf %75 : vector<256x8xf32> to vector<256x8xbf16>
    %c0_81 = arith.constant 0 : index
    %c0_82 = arith.constant 0 : index
    %77 = vector.load %arg6[%c0_81, %c0_82] : memref<8x3xbf16, #tpu.memory_space<vmem>>, vector<8x3xbf16>
    %cst_83 = arith.constant dense<0.000000e+00> : vector<256x3xf32>
    %78 = tpu.matmul %76, %77, %cst_83 {dimension_numbers = #tpu.dot_dimension_numbers<[1], [0], [0], [1], [0, 0, 1, 1], [], []>} : vector<256x8xbf16>, vector<8x3xbf16>, vector<256x3xf32> -> vector<256x3xf32>
    %c0_84 = arith.constant 0 : index
    %c0_85 = arith.constant 0 : index
    %79 = vector.load %arg7[%c0_84, %c0_85] : memref<1x3xf32, #tpu.memory_space<vmem>>, vector<1x3xf32>
    %80 = vector.broadcast %79 : vector<1x3xf32> to vector<256x3xf32>
    %81 = arith.addf %78, %80 : vector<256x3xf32>
    %82 = math.tanh %81 : vector<256x3xf32>
    %83 = vector.shape_cast %82 : vector<256x3xf32> to vector<16x16x3xf32>
    %c0_86 = arith.constant 0 : index
    %c0_87 = arith.constant 0 : index
    %c0_88 = arith.constant 0 : index
    %c0_89 = arith.constant 0 : index
    %84 = vector.load %arg8[%c0_86, %c0_87, %c0_88, %c0_89] : memref<1x16x16x3xf32, #tpu.memory_space<vmem>>, vector<1x16x16x3xf32>
    %85 = vector.shape_cast %84 : vector<1x16x16x3xf32> to vector<16x16x3xf32>
    %86 = vector.shape_cast %83 : vector<16x16x3xf32> to vector<1x16x16x3xf32>
    tpu.vector_store %arg8[%c0_86, %c0_87, %c0_88, %c0_89], %86 {strides = array<i32>} : memref<1x16x16x3xf32, #tpu.memory_space<vmem>>, vector<1x16x16x3xf32>,
    return
  }
  func.func @transform_0(%arg0: i32) -> (i32, i32, i32, i32) {
    %c0_i32 = arith.constant 0 : i32
    %c0_i32_0 = arith.constant 0 : i32
    %c0_i32_1 = arith.constant 0 : i32
    %c0_i32_2 = arith.constant 0 : i32
    return %arg0, %c0_i32, %c0_i32_0, %c0_i32_1 : i32, i32, i32, i32
  }
  func.func @transform_1(%arg0: i32) -> (i32, i32, i32, i32) {
    %c0_i32 = arith.constant 0 : i32
    %c0_i32_0 = arith.constant 0 : i32
    %c0_i32_1 = arith.constant 0 : i32
    %c0_i32_2 = arith.constant 0 : i32
    return %arg0, %c0_i32, %c0_i32_0, %c0_i32_1 : i32, i32, i32, i32
  }
  func.func @transform_2(%arg0: i32) -> (i32, i32) {
    %c0_i32 = arith.constant 0 : i32
    %c0_i32_0 = arith.constant 0 : i32
    %c0_i32_1 = arith.constant 0 : i32
    return %c0_i32, %c0_i32_0 : i32, i32
  }
  func.func @transform_3(%arg0: i32) -> (i32, i32) {
    %c0_i32 = arith.constant 0 : i32
    %c0_i32_0 = arith.constant 0 : i32
    %c0_i32_1 = arith.constant 0 : i32
    return %c0_i32, %c0_i32_0 : i32, i32
  }
  func.func @transform_4(%arg0: i32) -> (i32, i32) {
    %c0_i32 = arith.constant 0 : i32
    %c0_i32_0 = arith.constant 0 : i32
    %c0_i32_1 = arith.constant 0 : i32
    return %c0_i32, %c0_i32_0 : i32, i32
  }
  func.func @transform_5(%arg0: i32) -> (i32, i32) {
    %c0_i32 = arith.constant 0 : i32
    %c0_i32_0 = arith.constant 0 : i32
    %c0_i32_1 = arith.constant 0 : i32
    return %c0_i32, %c0_i32_0 : i32, i32
  }
  func.func @transform_6(%arg0: i32) -> (i32, i32) {
    %c0_i32 = arith.constant 0 : i32
    %c0_i32_0 = arith.constant 0 : i32
    %c0_i32_1 = arith.constant 0 : i32
    return %c0_i32, %c0_i32_0 : i32, i32
  }
  func.func @transform_7(%arg0: i32) -> (i32, i32, i32, i32) {
    %c0_i32 = arith.constant 0 : i32
    %c0_i32_0 = arith.constant 0 : i32
    %c0_i32_1 = arith.constant 0 : i32
    %c0_i32_2 = arith.constant 0 : i32
    return %arg0, %c0_i32, %c0_i32_0, %c0_i32_1 : i32, i32, i32, i32
  }
}

</mosaic_0001>

<bundles_post_ra>
// kernel: generator_forward.4
= control target key start
LH: loop header
LB: loop body
LE: loop exit
PB: predicated region body
PF: predicated region fallthrough
CT: control target
= control target key end

     0   :  { %s1184_s24 = smov 0   ;;  %s1390_s0 = inlined_call_operand.vmem [shape: f32[2,8,8,32], index: 0, kind: input, shape index: {}]   ;;  %s1391_s1 = inlined_call_operand.vmem [shape: bf16[32,16], index: 1, kind: input, shape index: {}]   ;;  %s1392_s2 = inlined_call_operand.vmem [shape: f32[1,16], index: 2, kind: input, shape index: {}]   ;;  %s1393_s3 = inlined_call_operand.vmem [shape: bf16[144,16], index: 3, kind: input, shape index: {}]   ;;  %s1394_s4 = inlined_call_operand.vmem [shape: f32[1,16], index: 4, kind: input, shape index: {}]   ;;  %s1395_s5 = inlined_call_operand.vmem [shape: bf16[16,32], index: 5, kind: input, shape index: {}]   ;;  %s1396_s6 = inlined_call_operand.vmem [shape: f32[1,32], index: 6, kind: input, shape index: {}]   ;;  %s1397_s7 = inlined_call_operand.vmem [shape: f32[2,8,8,32], index: 7, kind: output, shape index: {}]  }
   0x1 LB: > { %s1025_s25 = sadd.s32 4294967295, %s1133_s24   ;;  %p1029_p0 = scmp.ge.s32.totalorder %s1133_s24, 1  ;;  %s1133_s24 = sphi %s1184_s24, %s17_s24  }
   0x2   : > { %p237_p1 = scmp.lt.s32.totalorder %s1133_s24, 3 }
   0x4   : > { %p238_p2 = pnand %p1029_p0, %p237_p1 }
   0x5   : > { %v1115_v0 = vld [vmem:[%s1391_s1] sm:$0xff] (!%p238_p2)   ;;  %p269_p3 = scmp.lt.s32.totalorder (!%p238_p2), %s1025_s25, 1  ;;  %v1116_v1 = vld [vmem:[%s1391_s1 + $0x8] sm:$0xff] (!%p238_p2)   ;;  %vm315_vm0 = vcmask (!%p238_p2), 261120   ;;  %vm401_vm1 = vcmask (!%p238_p2), 130048   ;;  %vm403_vm2 = vcmask (!%p238_p2), 123904  }
   0x6   : > { %241 = sbr.rel (%p238_p2) target bundleno = 856 (0x358), region = 48  ;;  %1076 = vmatprep.subr.bf16.mxu0 (!%p238_p2), %v1115_v0  ;;  %v1135_v14 = vmov (!%p238_p2), 0.0   ;;  %v1117_v15 = vld [vmem:[%s1393_s3] sm:$0xff] (!%p238_p2)   ;;  %v1136_v16 = vmov (!%p238_p2), 0   ;;  %v1118_v17 = vld [vmem:[%s1393_s3 + $0x8] sm:$0xff] (!%p238_p2)   ;;  %v1119_v18 = vld [vmem:[%s1393_s3 + $0x10] sm:$0xff] (!%p238_p2)  }
   0x7   : > { %1077 = vmatpush3.bf16.msra.mxu0 (!%p238_p2), %v1115_v0  ;;  %409 = vst.msk [vmem:[#allocation2 + $0x30] sm:$0xff] (!%p238_p2), %vm401_vm1, %v1135_v14  ;;  %402 = vst.msk [vmem:[#allocation2] sm:$0xff] (!%p238_p2), %vm401_vm1, %v1135_v14  ;;  %785 = vmatprep.subr.bf16.mxu1 (!%p238_p2), %v1136_v16  ;;  %v1120_v19 = vld [vmem:[%s1393_s3 + $0x18] sm:$0xff] (!%p238_p2)   ;;  %v1034_v20 = vld [vmem:[%s1392_s2] ss:$0 sm:$0xff] (!%p238_p2)  ;;  %s1137_s29 = smov (!%p238_p2), 16  }
   0x8   : > { %1078 = vmatprep.subr.bf16.mxu0 (!%p238_p2), %v1116_v1  ;;  %410 = vst.msk [vmem:[#allocation2 + $0x38] sm:$0x3] (!%p238_p2), %vm403_vm2, %v1135_v14  ;;  %404 = vst.msk [vmem:[#allocation2 + $0x8] sm:$0x3] (!%p238_p2), %vm403_vm2, %v1135_v14  ;;  %786 = vmatpush1.bf16.msra.mxu1 (!%p238_p2), %v1117_v15  ;;  %v1121_v26 = vld [vmem:[%s1393_s3 + $0x20] sm:$0xff] (!%p238_p2)   ;;  %v1122_v34 = vld [vmem:[%s1393_s3 + $0x28] sm:$0xff] (!%p238_p2)  }
   0x9   : > { %405 = vst.msk [vmem:[#allocation2 + $0x10] sm:$0xff] (!%p238_p2), %vm401_vm1, %v1135_v14  ;;  %407 = vst.msk [vmem:[#allocation2 + $0x20] sm:$0xff] (!%p238_p2), %vm401_vm1, %v1135_v14  ;;  %787 = vmatprep.subr.bf16.mxu1 (!%p238_p2), %v1136_v16  ;;  %v1123_v40 = vld [vmem:[%s1393_s3 + $0x30] sm:$0xff] (!%p238_p2)   ;;  %v1124_v60 = vld [vmem:[%s1393_s3 + $0x38] sm:$0xff] (!%p238_p2)   ;;  %s1139_s13 = smov (!%p238_p2), 32   ;;  %s1140_s14 = smov (!%p238_p2), 80  }
   0xa   : > { %406 = vst.msk [vmem:[#allocation2 + $0x18] sm:$0x3] (!%p238_p2), %vm403_vm2, %v1135_v14  ;;  %408 = vst.msk [vmem:[#allocation2 + $0x28] sm:$0x3] (!%p238_p2), %vm403_vm2, %v1135_v14  ;;  %v1125_v62 = vld [vmem:[%s1393_s3 + $0x40] sm:$0xff] (!%p238_p2)   ;;  %s1141_s15 = smov (!%p238_p2), 64  }
   0xb   : > { %1079 = vmatpush3.bf16.msra.mxu0 (!%p238_p2), %v1116_v1  ;;  %411 = vst.msk [vmem:[#allocation2 + $0x40] sm:$0xff] (!%p238_p2), %vm401_vm1, %v1135_v14  ;;  %413 = vst.msk [vmem:[#allocation2 + $0x50] sm:$0xff] (!%p238_p2), %vm401_vm1, %v1135_v14  ;;  %s1142_s16 = smov (!%p238_p2), 112   ;;  %s1143_s17 = smov (!%p238_p2), 96   ;;  %vm645_vm3 = vcmask (!%p238_p2), 392192   ;;  %vm654_vm4 = vcmask (!%p238_p2), 523264  }
   0xc   : > { %412 = vst.msk [vmem:[#allocation2 + $0x48] sm:$0x3] (!%p238_p2), %vm403_vm2, %v1135_v14  ;;  %414 = vst.msk [vmem:[#allocation2 + $0x58] sm:$0x3] (!%p238_p2), %vm403_vm2, %v1135_v14  ;;  %788 = vmatpush1.bf16.msra.mxu1 (!%p238_p2), %v1118_v17  ;;  %vm663_vm5 = vcmask (!%p238_p2), 654336   ;;  %vm672_vm6 = vcmask (!%p238_p2), 785408  }
   0xd   : > { %s1399_s25 = smov (!%p269_p3, %s1025_s25), 1  ;;  %415 = vst.msk [vmem:[#allocation2 + $0x60] sm:$0xff] %vm401_vm1, %v1135_v14  ;;  %417 = vst.msk [vmem:[#allocation2 + $0x70] sm:$0xff] %vm401_vm1, %v1135_v14  ;;  %789 = vmatprep.subr.bf16.mxu1 %v1136_v16  ;;  %vm681_vm7 = vcmask 916480  }
   0xe   : > { %s1063_s30 = sshll.u32 %s1399_s25, 6  ;;  %416 = vst.msk [vmem:[#allocation2 + $0x68] sm:$0x3] %vm403_vm2, %v1135_v14  ;;  %418 = vst.msk [vmem:[#allocation2 + $0x78] sm:$0x3] %vm403_vm2, %v1135_v14 }
   0xf   : > { %s273_s10 = scalar_lea.vmem %s1390_s0, %s1063_s30  ;;  %419 = vst.msk [vmem:[#allocation2 + $0x80] sm:$0xff] %vm401_vm1, %v1135_v14  ;;  %421 = vst.msk [vmem:[#allocation2 + $0x90] sm:$0xff] %vm401_vm1, %v1135_v14  ;;  %v444_v42 = vld [vmem:[#allocation2 + $0x1] sm:$0xff]  ;;  %s278_s28 = scalar_lea.vmem %s1397_s7, %s1063_s30 }
  0x10   : > { %v280_v2 = vld [vmem:[%s273_s10] sm:$0xff]  ;;  %v281_v3 = vld [vmem:[%s273_s10 + $0x8] sm:$0xff]  ;;  %v282_v4 = vld [vmem:[%s273_s10 + $0x10] sm:$0xff]  ;;  %420 = vst.msk [vmem:[#allocation2 + $0x88] sm:$0x3] %vm403_vm2, %v1135_v14  ;;  %790 = vmatpush1.bf16.msra.mxu1 %v1119_v18 }
  0x11   : > { %v288_v5 = vpack.c.bf16 %v281_v3, %v280_v2  ;;  %v283_v6 = vld [vmem:[%s273_s10 + $0x18] sm:$0xff]  ;;  %v284_v7 = vld [vmem:[%s273_s10 + $0x20] sm:$0xff]  ;;  %v285_v8 = vld [vmem:[%s273_s10 + $0x28] sm:$0xff]  ;;  %422 = vst.msk [vmem:[#allocation2 + $0x98] sm:$0x3] %vm403_vm2, %v1135_v14  ;;  %791 = vmatprep.subr.bf16.mxu1 %v1136_v16 }
  0x12   : > { %v289_v9 = vpack.c.bf16 %v283_v6, %v282_v4  ;;  %v290_v10 = vpack.c.bf16 %v285_v8, %v284_v7  ;;  %v286_v11 = vld [vmem:[%s273_s10 + $0x30] sm:$0xff]  ;;  %v287_v12 = vld [vmem:[%s273_s10 + $0x38] sm:$0xff]  ;;  %v456_v52 = vld [vmem:[#allocation2 + $0x2] sm:$0xff]  ;;  %s1138_s10 = smov 48  }
  0x13   : > { %1080 = vmatprep.mubr.msk.bf16.mxu0 %vm315_vm0, %v288_v5  ;;  %v291_v13 = vpack.c.bf16 %v287_v12, %v286_v11 }
  0x14   : > { %1081 = vmatmul.mubr.msk.bf16.vlgmr.msra.gmra.mrb[0].mxu0 %vm315_vm0, %v289_v9  ;;  %792 = vmatpush1.bf16.msra.mxu1 %v1120_v19 }
  0x15   : > { %1084 = vmatprep.mubr.msk.bf16.mxu0 %vm315_vm0, %v290_v10  ;;  %793 = vmatprep.subr.bf16.mxu1 %v1136_v16 }
  0x18   : > { %794 = vmatpush1.bf16.msra.mxu1 %v1121_v26 }
  0x19   : > { %795 = vmatprep.subr.bf16.mxu1 %v1136_v16 }
  0x1c   : > { %1085 = vmatmul.mubr.msk.bf16.gmra.mrb[4].mxu0 %vm315_vm0, %v291_v13  ;;  %796 = vmatpush1.bf16.msra.mxu1 %v1122_v34 }
  0x1d   : > { %797 = vmatprep.subr.bf16.mxu1 %v1136_v16 }
  0x20   : > { %798 = vmatpush1.bf16.msra.mxu1 %v1123_v40 }
  0x21   : > { %799 = vmatprep.subr.bf16.mxu1 %v1136_v16 }
  0x24   : > { %800 = vmatpush1.bf16.msra.mxu1 %v1124_v60 }
  0x25   : > { %801 = vmatprep.subr.bf16.mxu1 %v1136_v16 }
  0x28   : > { %802 = vmatpush1.bf16.msra.mxu1 %v1125_v62 }
  0xe7   : > { %v1082_v21 = vpop.f32.mrb[0].mxu0 }
  0xe8   : > { %v371_v22 = vadd.f32 %v1082_v21, %v1034_v20  ;;  %v362_v23 = vpop.f32.mrb[1].mxu0 }
  0xe9   : > { %v363_v24 = vadd.f32 %v1034_v20, %v362_v23  ;;  %v1083_v25 = vpop.f32.mrb[2].mxu0 }
  0xea   : > { %v395_v27 = vmax.f32 %v371_v22, 0.0  ;;  %v374_v28 = vadd.f32 %v1083_v25, %v1034_v20  ;;  %v365_v29 = vpop.f32.mrb[3].mxu0 }
  0xeb   : > { %v393_v30 = vmax.f32 %v363_v24, 0.0  ;;  %v366_v31 = vadd.f32 %v1034_v20, %v365_v29 }
  0xec   : > { %426 = vst.msk [vmem:[#allocation2 + $0x31] sm:$0xff] %vm401_vm1, %v395_v27  ;;  %v396_v32 = vmax.f32 %v374_v28, 0.0 }
  0xed   : > { %424 = vst.msk [vmem:[#allocation2 + $0x11] sm:$0xff] %vm401_vm1, %v393_v30  ;;  %v394_v33 = vmax.f32 %v366_v31, 0.0 }
  0xee   : > { %427 = vst.msk [vmem:[#allocation2 + $0x41] sm:$0xff] %vm401_vm1, %v396_v32 }
  0xef   : > { %425 = vst.msk [vmem:[#allocation2 + $0x21] sm:$0xff] %vm401_vm1, %v394_v33  ;;  %v1086_v35 = vpop.f32.mrb[4].mxu0 }
  0xf0   : > { %v387_v36 = vadd.f32 %v1086_v35, %v1034_v20  ;;  %v378_v37 = vpop.f32.mrb[5].mxu0  ;;  %v512_v35 = vld [vmem:[#allocation2 + $0x90] sm:$0xff] }
  0xf1   : > { %v379_v38 = vadd.f32 %v1034_v20, %v378_v37  ;;  %v1087_v39 = vpop.f32.mrb[6].mxu0 }
  0xf2   : > { %v399_v41 = vmax.f32 %v387_v36, 0.0  ;;  %v390_v43 = vadd.f32 %v1087_v39, %v1034_v20  ;;  %v381_v44 = vpop.f32.mrb[7].mxu0  ;;  %v524_v36 = vld [vmem:[#allocation2 + $0x91] sm:$0xff] }
  0xf3   : > { %v397_v45 = vmax.f32 %v379_v38, 0.0  ;;  %v382_v46 = vadd.f32 %v1034_v20, %v381_v44  ;;  %v470_v50 = vld [vmem:[#allocation2 + $0x30] sm:$0xff] }
  0xf4   : > { %430 = vst.msk [vmem:[#allocation2 + $0x71] sm:$0xff] %vm401_vm1, %v399_v41  ;;  %v445_v47 = vld [vmem:[#allocation2 + $0x11] sm:$0xff]  ;;  %v400_v48 = vmax.f32 %v390_v43, 0.0  ;;  %v432_v43 = vld [vmem:[#allocation2] sm:$0xff] }
  0xf5   : > { %428 = vst.msk [vmem:[#allocation2 + $0x51] sm:$0xff] %vm401_vm1, %v397_v45  ;;  %v452_v49 = vpack.c.bf16 %v445_v47, %v444_v42  ;;  %v471_v51 = vld [vmem:[#allocation2 + $0x40] sm:$0xff]  ;;  %v398_v53 = vmax.f32 %v382_v46, 0.0  ;;  %v530_v56 = vld [vmem:[#allocation2 + $0x32] sm:$0xff] }
  0xf6   : > { %v477_v54 = vpack.c.bf16 %v471_v51, %v470_v50  ;;  %v529_v55 = vld [vmem:[#allocation2 + $0x22] sm:$0xff]  ;;  %v457_v57 = vld [vmem:[#allocation2 + $0x12] sm:$0xff]  ;;  %431 = vst.msk [vmem:[#allocation2 + $0x81] sm:$0xff] %vm401_vm1, %v400_v48 }
  0xf7   : > { %545 = vrot.lane.b32.xlu0 %v452_v49, %s1137_s29  ;;  %v537_v58 = vpack.c.bf16 %v530_v56, %v529_v55  ;;  %v495_v59 = vld [vmem:[#allocation2 + $0x42] sm:$0xff]  ;;  %429 = vst.msk [vmem:[#allocation2 + $0x61] sm:$0xff] %vm401_vm1, %v398_v53  ;;  %v464_v61 = vpack.c.bf16 %v457_v57, %v456_v52  ;;  %v482_v2 = vld [vmem:[#allocation2 + $0x31] sm:$0xff]  ;;  %v500_v7 = vpack.c.bf16 %v529_v55, %v457_v57 }
  0xf8   : > { %571 = vrot.lane.b32.xlu1 %v477_v54, %s1138_s10  ;;  %v501_v63 = vpack.c.bf16 %v495_v59, %v530_v56  ;;  %v483_v0 = vld [vmem:[#allocation2 + $0x41] sm:$0xff]  ;;  %v1282_v4 = vld [vmem:[#allocation2 + $0x10] sm:$0xff] }
  0xf9   : > { %1051 = vmatprep.mubr.msk.bf16.mxu1 %vm401_vm1, %v537_v58  ;;  %v469_v1 = vld [vmem:[#allocation2 + $0x20] sm:$0xff]  ;;  %v489_v3 = vpack.c.bf16 %v483_v0, %v482_v2  ;;  %v440_v45 = vpack.c.bf16 %v1282_v4, %v432_v43 }
  0xfa   : > { %v476_v5 = vpack.c.bf16 %v469_v1, %v1282_v4  ;;  %v481_v6 = vld [vmem:[#allocation2 + $0x21] sm:$0xff]  ;;  %v1289_v10 = vpack.c.bf16 %v470_v50, %v469_v1 }
  0xfb   : > { %557 = vrot.lane.b32.xlu0 %v464_v61, %s1139_s13  ;;  %v488_v8 = vpack.c.bf16 %v481_v6, %v445_v47  ;;  %v525_v9 = vpack.c.bf16 %v482_v2, %v481_v6  ;;  %v486_v17 = vld [vmem:[#allocation2 + $0x71] sm:$0xff] }
  0xfc   : > { %595 = vrot.lane.b32.xlu1 %v501_v63, %s1140_s14  ;;  %v508_v11 = vld [vmem:[#allocation2 + $0x50] sm:$0xff] }
  0xfd   : > { %v520_v12 = vld [vmem:[#allocation2 + $0x51] sm:$0xff]  ;;  %v1296_v13 = vpack.c.bf16 %v508_v11, %v471_v51  ;;  %v487_v18 = vld [vmem:[#allocation2 + $0x81] sm:$0xff] }
  0xfe   : > { %v526_v14 = vpack.c.bf16 %v520_v12, %v483_v0  ;;  %v461_v15 = vld [vmem:[#allocation2 + $0x52] sm:$0xff]  ;;  %v475_v20 = vld [vmem:[#allocation2 + $0x80] sm:$0xff]  ;;  %v491_v21 = vpack.c.bf16 %v487_v18, %v486_v17  ;;  %v528_v38 = vpack.c.bf16 %v524_v36, %v487_v18 }
  0xff   : > { %583 = vrot.lane.b32.xlu0 %v489_v3, %s1141_s15  ;;  %v1301_v16 = vpack.c.bf16 %v461_v15, %v495_v59  ;;  %v474_v19 = vld [vmem:[#allocation2 + $0x70] sm:$0xff]  ;;  %v473_v23 = vld [vmem:[#allocation2 + $0x60] sm:$0xff]  ;;  %v516_v37 = vpack.c.bf16 %v512_v35, %v475_v20 }
 0x100   : > { %569 = vrot.lane.b32.xlu1 %v476_v5, %s1138_s10  ;;  %v479_v22 = vpack.c.bf16 %v475_v20, %v474_v19  ;;  %v485_v24 = vld [vmem:[#allocation2 + $0x61] sm:$0xff]  ;;  %v478_v25 = vpack.c.bf16 %v473_v23, %v508_v11  ;;  %v1310_v29 = vpack.c.bf16 %v474_v19, %v473_v23  ;;  %v463_v31 = vld [vmem:[#allocation2 + $0x72] sm:$0xff]  ;;  %v1041_v36 = vld [vmem:[%s1394_s4] ss:$0 sm:$0xff] }
 0x101   : > { %v490_v26 = vpack.c.bf16 %v485_v24, %v520_v12  ;;  %v497_v27 = vld [vmem:[#allocation2 + $0x62] sm:$0xff]  ;;  %v527_v30 = vpack.c.bf16 %v486_v17, %v485_v24  ;;  %v536_v19 = vld [vmem:[#allocation2 + $0x92] sm:$0xff] }
 0x102   : > { %v502_v28 = vpack.c.bf16 %v497_v27, %v461_v15  ;;  %v1316_v32 = vld [vmem:[#allocation2 + $0x82] sm:$0xff]  ;;  %v467_v33 = vpack.c.bf16 %v463_v31, %v497_v27 }
 0x103   : > { %593 = vrot.lane.b32.xlu0 %v500_v7, %s1140_s14  ;;  %v503_v34 = vpack.c.bf16 %v1316_v32, %v463_v31  ;;  %v540_v23 = vpack.c.bf16 %v536_v19, %v1316_v32 }
 0x104   : > { %581 = vrot.lane.b32.xlu1 %v488_v8, %s1141_s15 }
 0x107   : > { %617 = vrot.lane.b32.xlu0 %v525_v9, %s1142_s16 }
 0x108   : > { %605 = vrot.lane.b32.xlu1 %v1289_v10, %s1143_s17 }
 0x10b   : > { %559 = vrot.lane.b32.xlu0 %v537_v58, %s1139_s13 }
 0x10c   : > { %547 = vrot.lane.b32.xlu1 %v525_v9, %s1137_s29 }
 0x10f   : > { %607 = vrot.lane.b32.xlu0 %v1296_v13, %s1143_s17 }
 0x110   : > { %619 = vrot.lane.b32.xlu1 %v526_v14, %s1142_s16 }
 0x113   : > { %549 = vrot.lane.b32.xlu0 %v526_v14, %s1137_s29 }
 0x114   : > { %561 = vrot.lane.b32.xlu1 %v1301_v16, %s1139_s13 }
 0x117   : > { %587 = vrot.lane.b32.xlu0 %v491_v21, %s1141_s15 }
 0x118   : > { %575 = vrot.lane.b32.xlu1 %v479_v22, %s1138_s10 }
 0x11b   : > { %573 = vrot.lane.b32.xlu0 %v478_v25, %s1138_s10 }
 0x11c   : > { %585 = vrot.lane.b32.xlu1 %v490_v26, %s1141_s15 }
 0x11f   : > { %597 = vrot.lane.b32.xlu0 %v502_v28, %s1140_s14 }
 0x120   : > { %609 = vrot.lane.b32.xlu1 %v1310_v29, %s1143_s17 }
 0x123   : > { %621 = vrot.lane.b32.xlu0 %v527_v30, %s1142_s16 }
 0x124   : > { %551 = vrot.lane.b32.xlu1 %v527_v30, %s1137_s29 }
 0x127   : > { %563 = vrot.lane.b32.xlu0 %v467_v33, %s1139_s13 }
 0x128   : > { %599 = vrot.lane.b32.xlu1 %v503_v34, %s1140_s14 }
 0x12b   : > { %611 = vrot.lane.b32.xlu0 %v516_v37, %s1143_s17 }
 0x12c   : > { %623 = vrot.lane.b32.xlu1 %v528_v38, %s1142_s16 }
 0x169   : > { %v546_v39 = vpop.permute.xlu0 %545 }
 0x16a   : > { %v572_v40 = vpop.permute.xlu1 %571  ;;  %v627_v47 = vsel %vm401_vm1, %v440_v45, %v546_v39 }
 0x16d   : > { %v558_v41 = vpop.permute.xlu0 %557 }
 0x16e   : > { %v596_v42 = vpop.permute.xlu1 %595  ;;  %v638_v48 = vsel %vm315_vm0, %v627_v47, %v558_v41 }
 0x171   : > { %v584_v44 = vpop.permute.xlu0 %583 }
 0x172   : > { %v570_v46 = vpop.permute.xlu1 %569 }
 0x173   : > { %v647_v50 = vsel %vm645_vm3, %v638_v48, %v570_v46 }
 0x175   : > { %v594_v49 = vpop.permute.xlu0 %593 }
 0x176   : > { %v582_v51 = vpop.permute.xlu1 %581 }
 0x177   : > { %v656_v52 = vsel %vm654_vm4, %v647_v50, %v582_v51 }
 0x178   : > { %v665_v55 = vsel %vm663_vm5, %v656_v52, %v594_v49 }
 0x179   : > { %v618_v53 = vpop.permute.xlu0 %617 }
 0x17a   : > { %v606_v54 = vpop.permute.xlu1 %605 }
 0x17b   : > { %v674_v56 = vsel %vm672_vm6, %v665_v55, %v606_v54 }
 0x17c   : > { %v683_v57 = vsel %vm681_vm7, %v674_v56, %v618_v53 }
 0x17d   : > { %v560_v58 = vpop.permute.xlu0 %559  ;;  %818 = vmatmul.mubr.bf16.vlgmr.msra.gmra.mrb[0].mxu1 %v683_v57 }
 0x17e   : > { %v548_v59 = vpop.permute.xlu1 %547  ;;  %1052 = vmatprep.mubr.msk.bf16.mxu1 %vm401_vm1, %v1301_v16 }
 0x17f   : > { %v630_v60 = vsel %vm401_vm1, %v1289_v10, %v548_v59 }
 0x180   : > { %v640_v61 = vsel %vm315_vm0, %v630_v60, %v560_v58 }
 0x181   : > { %v649_v62 = vsel %vm645_vm3, %v640_v61, %v572_v40  ;;  %v608_v63 = vpop.permute.xlu0 %607 }
 0x182   : > { %v658_v0 = vsel %vm654_vm4, %v649_v62, %v584_v44  ;;  %v620_v1 = vpop.permute.xlu1 %619 }
 0x183   : > { %v667_v2 = vsel %vm663_vm5, %v658_v0, %v596_v42 }
 0x184   : > { %v676_v3 = vsel %vm672_vm6, %v667_v2, %v608_v63 }
 0x185   : > { %v550_v4 = vpop.permute.xlu0 %549  ;;  %v686_v5 = vsel %vm681_vm7, %v676_v3, %v620_v1 }
 0x186   : > { %v562_v6 = vpop.permute.xlu1 %561  ;;  %826 = vmatmul.mubr.bf16.gmra.mrb[4].mxu1 %v686_v5  ;;  %v633_v8 = vsel %vm401_vm1, %v1296_v13, %v550_v4 }
 0x187   : > { %1053 = vmatprep.mubr.msk.bf16.mxu1 %vm401_vm1, %v467_v33  ;;  %v642_v10 = vsel %vm315_vm0, %v633_v8, %v562_v6 }
 0x189   : > { %v588_v7 = vpop.permute.xlu0 %587 }
 0x18a   : > { %v576_v9 = vpop.permute.xlu1 %575 }
 0x18d   : > { %v574_v11 = vpop.permute.xlu0 %573 }
 0x18e   : > { %v651_v12 = vsel %vm645_vm3, %v642_v10, %v574_v11  ;;  %v586_v14 = vpop.permute.xlu1 %585 }
 0x18f   : > { %v660_v15 = vsel %vm654_vm4, %v651_v12, %v586_v14 }
 0x191   : > { %v598_v16 = vpop.permute.xlu0 %597 }
 0x192   : > { %v669_v17 = vsel %vm663_vm5, %v660_v15, %v598_v16  ;;  %v610_v18 = vpop.permute.xlu1 %609 }
 0x193   : > { %v678_v20 = vsel %vm672_vm6, %v669_v17, %v610_v18 }
 0x195   : > { %v622_v21 = vpop.permute.xlu0 %621 }
 0x196   : > { %v552_v22 = vpop.permute.xlu1 %551  ;;  %v689_v13 = vsel %vm681_vm7, %v678_v20, %v622_v21 }
 0x197   : > { %834 = vmatmul.mubr.bf16.gmra.mrb[8].mxu1 %v689_v13  ;;  %v636_v24 = vsel %vm401_vm1, %v1310_v29, %v552_v22  ;;  %v1126_v29 = vld [vmem:[%s1395_s5] sm:$0xff]  }
 0x198   : > { %1054 = vmatprep.mubr.msk.bf16.mxu1 %vm401_vm1, %v540_v23  ;;  %1088 = vmatprep.subr.bf16.mxu0 %v1126_v29 }
 0x199   : > { %v564_v25 = vpop.permute.xlu0 %563  ;;  %1089 = vmatpush3.bf16.msra.mxu0 %v1126_v29 }
 0x19a   : > { %v644_v26 = vsel %vm315_vm0, %v636_v24, %v564_v25  ;;  %v600_v27 = vpop.permute.xlu1 %599 }
 0x19b   : > { %v653_v28 = vsel %vm645_vm3, %v644_v26, %v576_v9  ;;  %v1055_v9 = vld [vmem:[%s1396_s6] ss:$0 sm:$0xff] }
 0x19c   : > { %v662_v30 = vsel %vm654_vm4, %v653_v28, %v588_v7 }
 0x19d   : > { %v671_v31 = vsel %vm663_vm5, %v662_v30, %v600_v27  ;;  %v612_v33 = vpop.permute.xlu0 %611 }
 0x19e   : > { %v680_v34 = vsel %vm672_vm6, %v671_v31, %v612_v33  ;;  %v624_v32 = vpop.permute.xlu1 %623 }
 0x19f   : > { %v692_v35 = vsel %vm681_vm7, %v680_v34, %v624_v32 }
 0x1a0   : > { %842 = vmatmul.mubr.bf16.gmra.mrb[12].mxu1 %v692_v35 }
 0x250   : > { %v819_v37 = vpop.f32.mrb[0].mxu1 }
 0x251   : > { %v820_v38 = vadd.f32 %v1041_v36, %v819_v37  ;;  %v821_v39 = vpop.f32.mrb[1].mxu1 }
 0x252   : > { %v822_v40 = vpop.f32.mrb[2].mxu1 }
 0x253   : > { %v823_v41 = vadd.f32 %v1041_v36, %v822_v40  ;;  %v824_v42 = vpop.f32.mrb[3].mxu1  ;;  %v850_v43 = vmax.f32 %v820_v38, 0.0 }
 0x255   : > { %v851_v44 = vmax.f32 %v823_v41, 0.0 }
 0x257   : > { %v858_v45 = vpack.c.bf16 %v851_v44, %v850_v43 }
 0x259   : > { %v827_v46 = vpop.f32.mrb[4].mxu1  ;;  %1090 = vmatprep.mubr.msk.bf16.mxu0 %vm401_vm1, %v858_v45 }
 0x25a   : > { %v828_v47 = vadd.f32 %v1041_v36, %v827_v46  ;;  %v829_v48 = vpop.f32.mrb[5].mxu1 }
 0x25b   : > { %v830_v49 = vpop.f32.mrb[6].mxu1 }
 0x25c   : > { %v831_v50 = vadd.f32 %v1041_v36, %v830_v49  ;;  %v832_v51 = vpop.f32.mrb[7].mxu1  ;;  %v852_v52 = vmax.f32 %v828_v47, 0.0 }
 0x25e   : > { %v853_v53 = vmax.f32 %v831_v50, 0.0 }
 0x260   : > { %v859_v54 = vpack.c.bf16 %v853_v53, %v852_v52 }
 0x262   : > { %1091 = vmatmul.mubr.msk.bf16.vlgmr.msra.gmra.mrb[8].mxu0 %vm401_vm1, %v859_v54 }
 0x26a   : > { %v835_v55 = vpop.f32.mrb[8].mxu1 }
 0x26b   : > { %v836_v56 = vadd.f32 %v1041_v36, %v835_v55  ;;  %v837_v57 = vpop.f32.mrb[9].mxu1 }
 0x26c   : > { %v838_v58 = vpop.f32.mrb[10].mxu1 }
 0x26d   : > { %v839_v59 = vadd.f32 %v1041_v36, %v838_v58  ;;  %v840_v60 = vpop.f32.mrb[11].mxu1  ;;  %v854_v61 = vmax.f32 %v836_v56, 0.0 }
 0x26f   : > { %v855_v62 = vmax.f32 %v839_v59, 0.0 }
 0x271   : > { %v860_v63 = vpack.c.bf16 %v855_v62, %v854_v61 }
 0x273   : > { %v843_v0 = vpop.f32.mrb[12].mxu1  ;;  %1094 = vmatprep.mubr.msk.bf16.mxu0 %vm401_vm1, %v860_v63 }
 0x274   : > { %v844_v1 = vadd.f32 %v1041_v36, %v843_v0  ;;  %v845_v2 = vpop.f32.mrb[13].mxu1 }
 0x275   : > { %v846_v3 = vpop.f32.mrb[14].mxu1 }
 0x276   : > { %v847_v4 = vadd.f32 %v1041_v36, %v846_v3  ;;  %v848_v5 = vpop.f32.mrb[15].mxu1  ;;  %v856_v6 = vmax.f32 %v844_v1, 0.0 }
 0x278   : > { %v857_v7 = vmax.f32 %v847_v4, 0.0 }
 0x27a   : > { %v861_v8 = vpack.c.bf16 %v857_v7, %v856_v6 }
 0x27c   : > { %1095 = vmatmul.mubr.msk.bf16.gmra.mrb[12].mxu0 %vm401_vm1, %v861_v8 }
 0x335   : > { %v1092_v10 = vpop.f32.mrb[8].mxu0 }
 0x336   : > { %v932_v11 = vadd.f32 %v1092_v10, %v1055_v9  ;;  %v923_v12 = vpop.f32.mrb[9].mxu0 }
 0x337   : > { %v924_v14 = vadd.f32 %v1055_v9, %v923_v12  ;;  %v1093_v15 = vpop.f32.mrb[10].mxu0 }
 0x338   : > { %v956_v16 = vmax.f32 %v932_v11, 0.0  ;;  %v935_v17 = vadd.f32 %v1093_v15, %v1055_v9  ;;  %v926_v18 = vpop.f32.mrb[11].mxu0 }
 0x339   : > { %v954_v19 = vmax.f32 %v924_v14, 0.0  ;;  %v927_v20 = vadd.f32 %v1055_v9, %v926_v18 }
 0x33a   : > { %964 = vst.msk [vmem:[%s278_s28 + $0x10] sm:$0xff] %vm315_vm0, %v956_v16  ;;  %v957_v21 = vmax.f32 %v935_v17, 0.0 }
 0x33b   : > { %962 = vst.msk [vmem:[%s278_s28] sm:$0xff] %vm315_vm0, %v954_v19  ;;  %v955_v22 = vmax.f32 %v927_v20, 0.0 }
 0x33c   : > { %965 = vst.msk [vmem:[%s278_s28 + $0x18] sm:$0xff] %vm315_vm0, %v957_v21 }
 0x33d   : > { %963 = vst.msk [vmem:[%s278_s28 + $0x8] sm:$0xff] %vm315_vm0, %v955_v22 }
 0x34f   : > { %v1096_v13 = vpop.f32.mrb[12].mxu0 }
 0x350   : > { %v948_v23 = vadd.f32 %v1096_v13, %v1055_v9  ;;  %v939_v24 = vpop.f32.mrb[13].mxu0 }
 0x351   : > { %v940_v25 = vadd.f32 %v1055_v9, %v939_v24  ;;  %v1097_v26 = vpop.f32.mrb[14].mxu0 }
 0x352   : > { %v960_v27 = vmax.f32 %v948_v23, 0.0  ;;  %v951_v28 = vadd.f32 %v1097_v26, %v1055_v9  ;;  %v942_v30 = vpop.f32.mrb[15].mxu0 }
 0x353   : > { %v958_v31 = vmax.f32 %v940_v25, 0.0  ;;  %v943_v33 = vadd.f32 %v1055_v9, %v942_v30 }
 0x354   : > { %968 = vst.msk [vmem:[%s278_s28 + $0x30] sm:$0xff] %vm315_vm0, %v960_v27  ;;  %v961_v34 = vmax.f32 %v951_v28, 0.0 }
 0x355   : > { %966 = vst.msk [vmem:[%s278_s28 + $0x20] sm:$0xff] %vm315_vm0, %v958_v31  ;;  %v959_v32 = vmax.f32 %v943_v33, 0.0 }
 0x356   : > { %969 = vst.msk [vmem:[%s278_s28 + $0x38] sm:$0xff] %vm315_vm0, %v961_v34 }
 0x357   : > { %967 = vst.msk [vmem:[%s278_s28 + $0x28] sm:$0xff] %vm315_vm0, %v959_v32 }
 0x358 PF: > { %s17_s24 = sadd.s32 1, %s1133_s24  }
 0x359   : > { %p14_p4 = scmp.ge.s32.totalorder %s17_s24, 4  }
 0x35b   :  { %16 = sbr.rel (!%p14_p4) target bundleno = 1 (0x1), region = 80 }

// kernel: generator_forward.3
= control target key start
LH: loop header
LB: loop body
LE: loop exit
PB: predicated region body
PF: predicated region fallthrough
CT: control target
= control target key end

     0   :  { %s1880_s12 = smov 0   ;;  %s2646_s0 = inlined_call_operand.vmem [shape: f32[2,16,16,3], index: 0, kind: input, shape index: {}]   ;;  %s2647_s1 = inlined_call_operand.vmem [shape: bf16[27,8], index: 1, kind: input, shape index: {}]   ;;  %s2648_s2 = inlined_call_operand.vmem [shape: f32[1,8], index: 2, kind: input, shape index: {}]   ;;  %s2649_s3 = inlined_call_operand.vmem [shape: f32[2,16,16,8], index: 3, kind: output, shape index: {}]  }
   0x1 LB: > { %s1732_s13 = sadd.s32 4294967295, %s1848_s12   ;;  %p1736_p0 = scmp.ge.s32.totalorder %s1848_s12, 1  ;;  %s1848_s12 = sphi %s1880_s12, %s13_s12  }
   0x2   : > { %p137_p1 = scmp.lt.s32.totalorder %s1848_s12, 3 }
   0x4   : > { %p138_p2 = pnand %p1736_p0, %p137_p1 }
   0x5   : > { %vm204_vm0 = vcmask (!%p138_p2), 23552   ;;  %vm207_vm1 = vcmask (!%p138_p2), 17408   ;;  %v1850_v0 = vmov (!%p138_p2), 0.0   ;;  %p161_p3 = scmp.lt.s32.totalorder (!%p138_p2), %s1732_s13, 1  ;;  %s1851_s18 = smov (!%p138_p2), 3   ;;  %vm1444_vm2 = vcmask (!%p138_p2), 1044480  }
   0x6   : > { %141 = sbr.rel (%p138_p2) target bundleno = 631 (0x277), region = 32  ;;  %205 = vst.msk [vmem:[#allocation2] sm:$0xff] (!%p138_p2), %vm204_vm0, %v1850_v0  ;;  %206 = vst.msk [vmem:[#allocation2 + $0x8] sm:$0xff] (!%p138_p2), %vm204_vm0, %v1850_v0  ;;  %s1852_s19 = smov (!%p138_p2), 6   ;;  %vm1445_vm3 = vcmask (!%p138_p2), 1045504   ;;  %vm1158_vm4 = vcmask (!%p138_p2), 48128  }
   0x7   : > { %208 = vst.msk [vmem:[#allocation2 + $0x10] sm:$0x3] (!%p138_p2), %vm207_vm1, %v1850_v0  ;;  %211 = vst.msk [vmem:[#allocation2 + $0x28] sm:$0x3] (!%p138_p2), %vm207_vm1, %v1850_v0  ;;  %s1853_s20 = smov (!%p138_p2), 9   ;;  %s1854_s21 = smov (!%p138_p2), 12  }
   0x8   : > { %209 = vst.msk [vmem:[#allocation2 + $0x18] sm:$0xff] (!%p138_p2), %vm204_vm0, %v1850_v0  ;;  %210 = vst.msk [vmem:[#allocation2 + $0x20] sm:$0xff] (!%p138_p2), %vm204_vm0, %v1850_v0  ;;  %s1855_s22 = smov (!%p138_p2), 15   ;;  %s1856_s23 = smov (!%p138_p2), 18   ;;  %vm1191_vm5 = vcmask (!%p138_p2), 72704   ;;  %vm1224_vm6 = vcmask (!%p138_p2), 97280  }
   0x9   : > { %212 = vst.msk [vmem:[#allocation2 + $0x30] sm:$0xff] (!%p138_p2), %vm204_vm0, %v1850_v0  ;;  %213 = vst.msk [vmem:[#allocation2 + $0x38] sm:$0xff] (!%p138_p2), %vm204_vm0, %v1850_v0  ;;  %s1858_s28 = smov (!%p138_p2), 21   ;;  %s1859_s29 = smov (!%p138_p2), 24   ;;  %vm1257_vm7 = vcmask (!%p138_p2), 121856   ;;  %vm1290_vm8 = vcmask (!%p138_p2), 146432  }
   0xa   : > { %214 = vst.msk [vmem:[#allocation2 + $0x40] sm:$0x3] (!%p138_p2), %vm207_vm1, %v1850_v0  ;;  %217 = vst.msk [vmem:[#allocation2 + $0x58] sm:$0x3] (!%p138_p2), %vm207_vm1, %v1850_v0  ;;  %vm1323_vm9 = vcmask (!%p138_p2), 171008   ;;  %vm1356_vm10 = vcmask (!%p138_p2), 195584  }
   0xb   : > { %215 = vst.msk [vmem:[#allocation2 + $0x48] sm:$0xff] (!%p138_p2), %vm204_vm0, %v1850_v0  ;;  %216 = vst.msk [vmem:[#allocation2 + $0x50] sm:$0xff] (!%p138_p2), %vm204_vm0, %v1850_v0  ;;  %vm1411_vm11 = vcmask (!%p138_p2), 220160   ;;  %vm1644_vm12 = vcmask (!%p138_p2), 64512  }
   0xc   : > { %218 = vst.msk [vmem:[#allocation2 + $0x60] sm:$0xff] (!%p138_p2), %vm204_vm0, %v1850_v0  ;;  %219 = vst.msk [vmem:[#allocation2 + $0x68] sm:$0xff] (!%p138_p2), %vm204_vm0, %v1850_v0 }
   0xd   : > { %220 = vst.msk [vmem:[#allocation2 + $0x70] sm:$0x3] %vm207_vm1, %v1850_v0  ;;  %223 = vst.msk [vmem:[#allocation2 + $0x88] sm:$0x3] %vm207_vm1, %v1850_v0  ;;  %s2651_s13 = smov (!%p161_p3, %s1732_s13), 1  ;;  %v341_v4 = vld [vmem:[#allocation2 + $0x1] sm:$0xff] }
   0xe   : > { %221 = vst.msk [vmem:[#allocation2 + $0x78] sm:$0xff] %vm204_vm0, %v1850_v0  ;;  %222 = vst.msk [vmem:[#allocation2 + $0x80] sm:$0xff] %vm204_vm0, %v1850_v0  ;;  %s1762_s14 = sshll.u32 %s2651_s13, 8  ;;  %v342_v5 = vld [vmem:[#allocation2 + $0x9] sm:$0xff] }
   0xf   : > { %224 = vst.msk [vmem:[#allocation2 + $0x90] sm:$0xff] %vm204_vm0, %v1850_v0  ;;  %225 = vst.msk [vmem:[#allocation2 + $0x98] sm:$0xff] %vm204_vm0, %v1850_v0  ;;  %s1954_s17 = scalar_lea.vmem %s2646_s0, %s1762_s14  ;;  %v389_v6 = vld [vmem:[#allocation2 + $0x2] sm:$0xff]  ;;  %v373_v7 = vpack.c.bf16 %v342_v5, %v341_v4  ;;  %v390_v8 = vld [vmem:[#allocation2 + $0xa] sm:$0xff]  ;;  %s2546_s7 = scalar_lea.vmem %s2649_s3, %s1762_s14 }
  0x10   : > { %226 = vst.msk [vmem:[#allocation2 + $0xa0] sm:$0x3] %vm207_vm1, %v1850_v0  ;;  %229 = vst.msk [vmem:[#allocation2 + $0xb8] sm:$0x3] %vm207_vm1, %v1850_v0  ;;  %v172_v1 = vld [vmem:[%s1954_s17] sm:$0xff]  ;;  %v173_v2 = vld [vmem:[%s1954_s17 + $0x8] sm:$0xff]  ;;  %v421_v14 = vpack.c.bf16 %v390_v8, %v389_v6 }
  0x11   : > { %227 = vst.msk [vmem:[#allocation2 + $0xa8] sm:$0xff] %vm204_vm0, %v1850_v0  ;;  %228 = vst.msk [vmem:[#allocation2 + $0xb0] sm:$0xff] %vm204_vm0, %v1850_v0  ;;  %v186_v3 = vld [vmem:[%s1954_s17 + $0x70] sm:$0xff]  ;;  %v187_v9 = vld [vmem:[%s1954_s17 + $0x78] sm:$0xff]  ;;  %742 = vrot.lane.b32.xlu0 %v373_v7, %s1851_s18 }
  0x12   : > { %230 = vst.msk [vmem:[#allocation2 + $0xc0] sm:$0xff] %vm204_vm0, %v1850_v0  ;;  %231 = vst.msk [vmem:[#allocation2 + $0xc8] sm:$0xff] %vm204_vm0, %v1850_v0  ;;  %v188_v10 = vld [vmem:[%s1954_s17 + $0x80] sm:$0xff]  ;;  %v189_v11 = vld [vmem:[%s1954_s17 + $0x88] sm:$0xff] }
  0x13   : > { %232 = vst.msk [vmem:[#allocation2 + $0xd0] sm:$0x3] %vm207_vm1, %v1850_v0  ;;  %235 = vst.msk [vmem:[#allocation2 + $0xe8] sm:$0x3] %vm207_vm1, %v1850_v0  ;;  %v174_v12 = vld [vmem:[%s1954_s17 + $0x10] sm:$0xff]  ;;  %v175_v13 = vld [vmem:[%s1954_s17 + $0x18] sm:$0xff] }
  0x14   : > { %233 = vst.msk [vmem:[#allocation2 + $0xd8] sm:$0xff] %vm204_vm0, %v1850_v0  ;;  %234 = vst.msk [vmem:[#allocation2 + $0xe0] sm:$0xff] %vm204_vm0, %v1850_v0  ;;  %v190_v15 = vld [vmem:[%s1954_s17 + $0x90] sm:$0xff]  ;;  %v191_v16 = vld [vmem:[%s1954_s17 + $0x98] sm:$0xff] }
  0x15   : > { %236 = vst.msk [vmem:[#allocation2 + $0xf0] sm:$0xff] %vm204_vm0, %v1850_v0  ;;  %237 = vst.msk [vmem:[#allocation2 + $0xf8] sm:$0xff] %vm204_vm0, %v1850_v0  ;;  %v176_v17 = vld [vmem:[%s1954_s17 + $0x20] sm:$0xff]  ;;  %v177_v18 = vld [vmem:[%s1954_s17 + $0x28] sm:$0xff]  ;;  %790 = vrot.lane.b32.xlu0 %v421_v14, %s1852_s19 }
  0x16   : > { %238 = vst.msk [vmem:[#allocation2 + $0x100] sm:$0x3] %vm207_vm1, %v1850_v0  ;;  %241 = vst.msk [vmem:[#allocation2 + $0x118] sm:$0x3] %vm207_vm1, %v1850_v0  ;;  %v192_v19 = vld [vmem:[%s1954_s17 + $0xa0] sm:$0xff]  ;;  %v193_v20 = vld [vmem:[%s1954_s17 + $0xa8] sm:$0xff] }
  0x17   : > { %239 = vst.msk [vmem:[#allocation2 + $0x108] sm:$0xff] %vm204_vm0, %v1850_v0  ;;  %240 = vst.msk [vmem:[#allocation2 + $0x110] sm:$0xff] %vm204_vm0, %v1850_v0  ;;  %v178_v21 = vld [vmem:[%s1954_s17 + $0x30] sm:$0xff]  ;;  %v179_v22 = vld [vmem:[%s1954_s17 + $0x38] sm:$0xff] }
  0x18   : > { %242 = vst.msk [vmem:[#allocation2 + $0x120] sm:$0xff] %vm204_vm0, %v1850_v0  ;;  %243 = vst.msk [vmem:[#allocation2 + $0x128] sm:$0xff] %vm204_vm0, %v1850_v0  ;;  %v194_v23 = vld [vmem:[%s1954_s17 + $0xb0] sm:$0xff]  ;;  %v195_v24 = vld [vmem:[%s1954_s17 + $0xb8] sm:$0xff] }
  0x19   : > { %244 = vst.msk [vmem:[#allocation2 + $0x130] sm:$0x3] %vm207_vm1, %v1850_v0  ;;  %247 = vst.msk [vmem:[#allocation2 + $0x148] sm:$0x3] %vm207_vm1, %v1850_v0  ;;  %v180_v25 = vld [vmem:[%s1954_s17 + $0x40] sm:$0xff]  ;;  %v181_v26 = vld [vmem:[%s1954_s17 + $0x48] sm:$0xff] }
  0x1a   : > { %245 = vst.msk [vmem:[#allocation2 + $0x138] sm:$0xff] %vm204_vm0, %v1850_v0  ;;  %246 = vst.msk [vmem:[#allocation2 + $0x140] sm:$0xff] %vm204_vm0, %v1850_v0  ;;  %v196_v58 = vld [vmem:[%s1954_s17 + $0xc0] sm:$0xff]  ;;  %v197_v60 = vld [vmem:[%s1954_s17 + $0xc8] sm:$0xff] }
  0x1b   : > { %248 = vst.msk [vmem:[#allocation2 + $0x150] sm:$0xff] %vm204_vm0, %v1850_v0  ;;  %249 = vst.msk [vmem:[#allocation2 + $0x158] sm:$0xff] %vm204_vm0, %v1850_v0  ;;  %v182_v62 = vld [vmem:[%s1954_s17 + $0x50] sm:$0xff]  ;;  %v183_v63 = vld [vmem:[%s1954_s17 + $0x58] sm:$0xff] }
  0x1c   : > { %250 = vst.msk [vmem:[#allocation2 + $0x160] sm:$0x3] %vm207_vm1, %v1850_v0  ;;  %253 = vst.msk [vmem:[#allocation2 + $0x178] sm:$0x3] %vm207_vm1, %v1850_v0 }
  0x1d   : > { %251 = vst.msk [vmem:[#allocation2 + $0x168] sm:$0xff] %vm204_vm0, %v1850_v0  ;;  %252 = vst.msk [vmem:[#allocation2 + $0x170] sm:$0xff] %vm204_vm0, %v1850_v0 }
  0x1e   : > { %254 = vst.msk [vmem:[#allocation2 + $0x180] sm:$0xff] %vm204_vm0, %v1850_v0  ;;  %255 = vst.msk [vmem:[#allocation2 + $0x188] sm:$0xff] %vm204_vm0, %v1850_v0 }
  0x1f   : > { %256 = vst.msk [vmem:[#allocation2 + $0x190] sm:$0x3] %vm207_vm1, %v1850_v0  ;;  %259 = vst.msk [vmem:[#allocation2 + $0x1a8] sm:$0x3] %vm207_vm1, %v1850_v0 }
  0x20   : > { %257 = vst.msk [vmem:[#allocation2 + $0x198] sm:$0xff] %vm204_vm0, %v1850_v0  ;;  %258 = vst.msk [vmem:[#allocation2 + $0x1a0] sm:$0xff] %vm204_vm0, %v1850_v0  ;;  %v198_v0 = vld [vmem:[%s1954_s17 + $0xd0] sm:$0xff] }
  0x21   : > { %261 = vst.msk [vmem:[#allocation2 + $0x19] sm:$0xff] %vm204_vm0, %v172_v1  ;;  %262 = vst.msk [vmem:[#allocation2 + $0x21] sm:$0xff] %vm204_vm0, %v173_v2  ;;  %v199_v1 = vld [vmem:[%s1954_s17 + $0xd8] sm:$0xff] }
  0x22   : > { %275 = vst.msk [vmem:[#allocation2 + $0xc1] sm:$0xff] %vm204_vm0, %v186_v3  ;;  %276 = vst.msk [vmem:[#allocation2 + $0xc9] sm:$0xff] %vm204_vm0, %v187_v9 }
  0x23   : > { %277 = vst.msk [vmem:[#allocation2 + $0xd9] sm:$0xff] %vm204_vm0, %v188_v10  ;;  %278 = vst.msk [vmem:[#allocation2 + $0xe1] sm:$0xff] %vm204_vm0, %v189_v11  ;;  %v184_v10 = vld [vmem:[%s1954_s17 + $0x60] sm:$0xff]  ;;  %v185_v11 = vld [vmem:[%s1954_s17 + $0x68] sm:$0xff] }
  0x24   : > { %263 = vst.msk [vmem:[#allocation2 + $0x31] sm:$0xff] %vm204_vm0, %v174_v12  ;;  %264 = vst.msk [vmem:[#allocation2 + $0x39] sm:$0xff] %vm204_vm0, %v175_v13 }
  0x25   : > { %279 = vst.msk [vmem:[#allocation2 + $0xf1] sm:$0xff] %vm204_vm0, %v190_v15  ;;  %280 = vst.msk [vmem:[#allocation2 + $0xf9] sm:$0xff] %vm204_vm0, %v191_v16  ;;  %v200_v15 = vld [vmem:[%s1954_s17 + $0xe0] sm:$0xff] }
  0x26   : > { %265 = vst.msk [vmem:[#allocation2 + $0x49] sm:$0xff] %vm204_vm0, %v176_v17  ;;  %266 = vst.msk [vmem:[#allocation2 + $0x51] sm:$0xff] %vm204_vm0, %v177_v18  ;;  %v201_v17 = vld [vmem:[%s1954_s17 + $0xe8] sm:$0xff]  ;;  %v1840_v18 = vld [vmem:[%s2647_s1] sm:$0xff]  }
  0x27   : > { %281 = vst.msk [vmem:[#allocation2 + $0x109] sm:$0xff] %vm204_vm0, %v192_v19  ;;  %282 = vst.msk [vmem:[#allocation2 + $0x111] sm:$0xff] %vm204_vm0, %v193_v20  ;;  %1782 = vmatprep.subr.bf16.mxu0 %v1840_v18  ;;  %1818 = vmatprep.subr.bf16.mxu1 %v1840_v18 }
  0x28   : > { %267 = vst.msk [vmem:[#allocation2 + $0x61] sm:$0xff] %vm204_vm0, %v178_v21  ;;  %268 = vst.msk [vmem:[#allocation2 + $0x69] sm:$0xff] %vm204_vm0, %v179_v22  ;;  %v343_v27 = vld [vmem:[#allocation2 + $0x19] sm:$0xff]  ;;  %v344_v28 = vld [vmem:[#allocation2 + $0x21] sm:$0xff]  ;;  %v1857_v22 = vmov 65535   ;;  %1783 = vmatpush3.bf16.msra.mxu0 %v1840_v18  ;;  %1820 = vmatpush3.bf16.msra.mxu1 %v1840_v18 }
  0x29   : > { %283 = vst.msk [vmem:[#allocation2 + $0x121] sm:$0xff] %vm204_vm0, %v194_v23  ;;  %v357_v29 = vld [vmem:[#allocation2 + $0xc1] sm:$0xff]  ;;  %284 = vst.msk [vmem:[#allocation2 + $0x129] sm:$0xff] %vm204_vm0, %v195_v24  ;;  %v374_v30 = vpack.c.bf16 %v344_v28, %v343_v27  ;;  %v358_v32 = vld [vmem:[#allocation2 + $0xc9] sm:$0xff]  ;;  %v1446_v23 = vsel %vm1444_vm2, 4294967295, %v1857_v22 }
  0x2a   : > { %269 = vst.msk [vmem:[#allocation2 + $0x79] sm:$0xff] %vm204_vm0, %v180_v25  ;;  %270 = vst.msk [vmem:[#allocation2 + $0x81] sm:$0xff] %vm204_vm0, %v181_v26  ;;  %v391_v31 = vld [vmem:[#allocation2 + $0x1a] sm:$0xff]  ;;  %v392_v34 = vld [vmem:[#allocation2 + $0x22] sm:$0xff]  ;;  %v381_v35 = vpack.c.bf16 %v358_v32, %v357_v29  ;;  %v1447_v26 = vsel %vm1445_vm3, %v1446_v23, 0 }
  0x2b   : > { %v359_v33 = vld [vmem:[#allocation2 + $0xd9] sm:$0xff]  ;;  %744 = vrot.lane.b32.xlu1 %v374_v30, %s1851_s18  ;;  %v360_v36 = vld [vmem:[#allocation2 + $0xe1] sm:$0xff]  ;;  %v406_v39 = vld [vmem:[#allocation2 + $0xca] sm:$0xff]  ;;  %v422_v40 = vpack.c.bf16 %v392_v34, %v391_v31  ;;  %285 = vst.msk [vmem:[#allocation2 + $0x139] sm:$0xff] %vm204_vm0, %v196_v58 }
  0x2c   : > { %v382_v37 = vpack.c.bf16 %v360_v36, %v359_v33  ;;  %v405_v38 = vld [vmem:[#allocation2 + $0xc2] sm:$0xff]  ;;  %758 = vrot.lane.b32.xlu0 %v381_v35, %s1851_s18  ;;  %v437_v41 = vld [vmem:[#allocation2 + $0x18] sm:$0xff]  ;;  %v439_v47 = vld [vmem:[#allocation2 + $0x30] sm:$0xff]  ;;  %286 = vst.msk [vmem:[#allocation2 + $0x141] sm:$0xff] %vm204_vm0, %v197_v60 }
  0x2d   : > { %v438_v42 = vld [vmem:[#allocation2 + $0x20] sm:$0xff]  ;;  %v429_v43 = vpack.c.bf16 %v406_v39, %v405_v38  ;;  %v440_v48 = vld [vmem:[#allocation2 + $0x38] sm:$0xff]  ;;  %v455_v54 = vld [vmem:[#allocation2 + $0xf0] sm:$0xff]  ;;  %271 = vst.msk [vmem:[#allocation2 + $0x91] sm:$0xff] %vm204_vm0, %v182_v62 }
  0x2e   : > { %v407_v44 = vld [vmem:[#allocation2 + $0xda] sm:$0xff]  ;;  %v408_v45 = vld [vmem:[#allocation2 + $0xe2] sm:$0xff]  ;;  %v2002_v46 = vpack.c.bf16 %v438_v42, %v437_v41  ;;  %v2007_v52 = vpack.c.bf16 %v440_v48, %v439_v47  ;;  %v487_v56 = vld [vmem:[#allocation2 + $0x31] sm:$0xff]  ;;  %272 = vst.msk [vmem:[#allocation2 + $0x99] sm:$0xff] %vm204_vm0, %v183_v63 }
  0x2f   : > { %760 = vrot.lane.b32.xlu1 %v382_v37, %s1851_s18  ;;  %v430_v49 = vpack.c.bf16 %v408_v45, %v407_v44  ;;  %v453_v50 = vld [vmem:[#allocation2 + $0xd8] sm:$0xff]  ;;  %v454_v51 = vld [vmem:[#allocation2 + $0xe0] sm:$0xff]  ;;  %287 = vst.msk [vmem:[#allocation2 + $0x151] sm:$0xff] %vm204_vm0, %v198_v0  ;;  %288 = vst.msk [vmem:[#allocation2 + $0x159] sm:$0xff] %vm204_vm0, %v199_v1 }
  0x30   : > { %792 = vrot.lane.b32.xlu0 %v422_v40, %s1852_s19  ;;  %v2010_v53 = vpack.c.bf16 %v454_v51, %v453_v50  ;;  %v456_v55 = vld [vmem:[#allocation2 + $0xf8] sm:$0xff]  ;;  %273 = vst.msk [vmem:[#allocation2 + $0xa9] sm:$0xff] %vm204_vm0, %v184_v10  ;;  %274 = vst.msk [vmem:[#allocation2 + $0xb1] sm:$0xff] %vm204_vm0, %v185_v11  ;;  %v584_v12 = vld [vmem:[#allocation2 + $0x48] sm:$0xff] }
  0x31   : > { %v488_v57 = vld [vmem:[#allocation2 + $0x39] sm:$0xff]  ;;  %v2017_v59 = vpack.c.bf16 %v456_v55, %v455_v54  ;;  %v503_v2 = vld [vmem:[#allocation2 + $0xf1] sm:$0xff]  ;;  %289 = vst.msk [vmem:[#allocation2 + $0x169] sm:$0xff] %vm204_vm0, %v200_v15  ;;  %290 = vst.msk [vmem:[#allocation2 + $0x171] sm:$0xff] %vm204_vm0, %v201_v17 }
  0x32   : > { %v2023_v61 = vpack.c.bf16 %v488_v57, %v487_v56  ;;  %v504_v3 = vld [vmem:[#allocation2 + $0xf9] sm:$0xff]  ;;  %v585_v13 = vld [vmem:[#allocation2 + $0x50] sm:$0xff]  ;;  %v600_v19 = vld [vmem:[#allocation2 + $0x108] sm:$0xff] }
  0x33   : > { %806 = vrot.lane.b32.xlu1 %v429_v43, %s1852_s19  ;;  %v535_v4 = vld [vmem:[#allocation2 + $0x32] sm:$0xff]  ;;  %v536_v5 = vld [vmem:[#allocation2 + $0x3a] sm:$0xff]  ;;  %v2038_v6 = vpack.c.bf16 %v504_v3, %v503_v2  ;;  %v2055_v16 = vpack.c.bf16 %v585_v13, %v584_v12  ;;  %v1841_v21 = vld [vmem:[%s2647_s1 + $0x8] sm:$0x3f]  }
  0x34   : > { %838 = vrot.lane.b32.xlu0 %v2002_v46, %s1853_s20  ;;  %v2041_v7 = vpack.c.bf16 %v536_v5, %v535_v4  ;;  %v551_v8 = vld [vmem:[#allocation2 + $0xf2] sm:$0xff]  ;;  %v552_v9 = vld [vmem:[#allocation2 + $0xfa] sm:$0xff]  ;;  %v632_v24 = vld [vmem:[#allocation2 + $0x49] sm:$0xff]  ;;  %v1449_v28 = vand.u32 %v1841_v21, %v1447_v26 }
  0x35   : > { %v574_v14 = vpack.c.bf16 %v552_v9, %v551_v8  ;;  %v601_v20 = vld [vmem:[#allocation2 + $0x110] sm:$0xff]  ;;  %v443_v39 = vld [vmem:[#allocation2 + $0x60] sm:$0xff]  ;;  %v203_v42 = vld [vmem:[%s1954_s17 + $0xf8] sm:$0xff] }
  0x36   : > { %v633_v25 = vld [vmem:[#allocation2 + $0x51] sm:$0xff]  ;;  %v2071_v27 = vpack.c.bf16 %v601_v20, %v600_v19  ;;  %1784 = vmatprep.subr.bf16.mxu0 %v1449_v28  ;;  %1819 = vmatprep.subr.bf16.mxu1 %v1449_v28  ;;  %292 = vst.msk [vmem:[#allocation2 + $0x189] sm:$0xff] %vm204_vm0, %v203_v42  ;;  %v459_v44 = vld [vmem:[#allocation2 + $0x120] sm:$0xff]  ;;  %v460_v45 = vld [vmem:[#allocation2 + $0x128] sm:$0xff] }
  0x37   : > { %808 = vrot.lane.b32.xlu1 %v430_v49, %s1852_s19  ;;  %v663_v29 = vpack.c.bf16 %v633_v25, %v632_v24  ;;  %1785 = vmatpush3.bf16.msra.mxu0 %v1449_v28  ;;  %v649_v31 = vld [vmem:[#allocation2 + $0x111] sm:$0xff]  ;;  %v491_v47 = vld [vmem:[#allocation2 + $0x61] sm:$0xff]  ;;  %v492_v48 = vld [vmem:[#allocation2 + $0x69] sm:$0xff] }
  0x38   : > { %840 = vrot.lane.b32.xlu0 %v2007_v52, %s1853_s20  ;;  %1821 = vmatpush3.bf16.msra.mxu1 %v1449_v28  ;;  %v680_v33 = vld [vmem:[#allocation2 + $0x4a] sm:$0xff]  ;;  %v681_v34 = vld [vmem:[#allocation2 + $0x52] sm:$0xff]  ;;  %v520_v50 = vpack.c.bf16 %v492_v48, %v491_v47  ;;  %v507_v51 = vld [vmem:[#allocation2 + $0x121] sm:$0xff] }
  0x39   : > { %v711_v35 = vpack.c.bf16 %v681_v34, %v680_v33  ;;  %v696_v36 = vld [vmem:[#allocation2 + $0x10a] sm:$0xff]  ;;  %v539_v55 = vld [vmem:[#allocation2 + $0x62] sm:$0xff]  ;;  %v588_v62 = vld [vmem:[#allocation2 + $0x78] sm:$0xff] }
  0x3a   : > { %v202_v41 = vld [vmem:[%s1954_s17 + $0xf0] sm:$0xff]  ;;  %v555_v60 = vld [vmem:[#allocation2 + $0x122] sm:$0xff]  ;;  %v604_v2 = vld [vmem:[#allocation2 + $0x138] sm:$0xff] }
  0x3b   : > { %854 = vrot.lane.b32.xlu1 %v2010_v53, %s1853_s20  ;;  %291 = vst.msk [vmem:[#allocation2 + $0x181] sm:$0xff] %vm204_vm0, %v202_v41  ;;  %v508_v54 = vld [vmem:[#allocation2 + $0x129] sm:$0xff]  ;;  %v589_v63 = vld [vmem:[#allocation2 + $0x80] sm:$0xff]  ;;  %v448_v33 = vld [vmem:[#allocation2 + $0x98] sm:$0xff] }
  0x3c   : > { %886 = vrot.lane.b32.xlu0 %v374_v30, %s1854_s21  ;;  %v648_v30 = vld [vmem:[#allocation2 + $0x109] sm:$0xff]  ;;  %v528_v57 = vpack.c.bf16 %v508_v54, %v507_v51  ;;  %v2115_v1 = vpack.c.bf16 %v589_v63, %v588_v62  ;;  %v605_v3 = vld [vmem:[#allocation2 + $0x140] sm:$0xff]  ;;  %v495_v41 = vld [vmem:[#allocation2 + $0x91] sm:$0xff] }
  0x3d   : > { %v671_v32 = vpack.c.bf16 %v649_v31, %v648_v30  ;;  %v540_v56 = vld [vmem:[#allocation2 + $0x6a] sm:$0xff]  ;;  %v636_v4 = vld [vmem:[#allocation2 + $0x79] sm:$0xff]  ;;  %v637_v5 = vld [vmem:[#allocation2 + $0x81] sm:$0xff] }
  0x3e   : > { %v568_v58 = vpack.c.bf16 %v540_v56, %v539_v55  ;;  %v652_v9 = vld [vmem:[#allocation2 + $0x139] sm:$0xff]  ;;  %v653_v10 = vld [vmem:[#allocation2 + $0x141] sm:$0xff]  ;;  %v511_v51 = vld [vmem:[#allocation2 + $0x151] sm:$0xff] }
  0x3f   : > { %856 = vrot.lane.b32.xlu1 %v2017_v59, %s1853_s20  ;;  %v673_v12 = vpack.c.bf16 %v653_v10, %v652_v9  ;;  %v685_v15 = vld [vmem:[#allocation2 + $0x82] sm:$0xff]  ;;  %v700_v21 = vld [vmem:[#allocation2 + $0x13a] sm:$0xff]  ;;  %v543_v56 = vld [vmem:[#allocation2 + $0x92] sm:$0xff] }
  0x40   : > { %888 = vrot.lane.b32.xlu0 %v2023_v61, %s1854_s21  ;;  %v701_v22 = vld [vmem:[#allocation2 + $0x142] sm:$0xff]  ;;  %v496_v42 = vld [vmem:[#allocation2 + $0x99] sm:$0xff] }
  0x41   : > { %v2150_v25 = vpack.c.bf16 %v701_v22, %v700_v21  ;;  %v2192_v47 = vpack.c.bf16 %v496_v42, %v495_v41  ;;  %v294_v48 = vld [vmem:[#allocation2 + $0x8] sm:$0xff]  ;;  %v512_v54 = vld [vmem:[#allocation2 + $0x159] sm:$0xff]  ;;  %v609_v41 = vld [vmem:[#allocation2 + $0x170] sm:$0xff] }
  0x43   : > { %902 = vrot.lane.b32.xlu1 %v382_v37, %s1854_s21  ;;  %v697_v37 = vld [vmem:[#allocation2 + $0x112] sm:$0xff] }
  0x44   : > { %934 = vrot.lane.b32.xlu0 %v422_v40, %s1855_s22  ;;  %v719_v38 = vpack.c.bf16 %v697_v37, %v696_v36  ;;  %v444_v40 = vld [vmem:[#allocation2 + $0x68] sm:$0xff] }
  0x45   : > { %v472_v43 = vpack.c.bf16 %v444_v40, %v443_v39  ;;  %v464_v39 = vld [vmem:[#allocation2 + $0x158] sm:$0xff] }
  0x47   : > { %904 = vrot.lane.b32.xlu1 %v2038_v6, %s1854_s21 }
  0x48   : > { %936 = vrot.lane.b32.xlu0 %v2041_v7, %s1855_s22 }
  0x4b   : > { %950 = vrot.lane.b32.xlu1 %v430_v49, %s1855_s22  ;;  %v480_v49 = vpack.c.bf16 %v460_v45, %v459_v44 }
  0x4c   : > { %982 = vrot.lane.b32.xlu0 %v2007_v52, %s1856_s23 }
  0x4f   : > { %952 = vrot.lane.b32.xlu1 %v574_v14, %s1855_s22 }
  0x50   : > { %984 = vrot.lane.b32.xlu0 %v2055_v16, %s1856_s23 }
  0x53   : > { %998 = vrot.lane.b32.xlu1 %v2017_v59, %s1856_s23 }
  0x54   : > { %1030 = vrot.lane.b32.xlu0 %v2023_v61, %s1858_s28 }
  0x57   : > { %1000 = vrot.lane.b32.xlu1 %v2071_v27, %s1856_s23 }
  0x58   : > { %1032 = vrot.lane.b32.xlu0 %v663_v29, %s1858_s28 }
  0x5b   : > { %1046 = vrot.lane.b32.xlu1 %v2038_v6, %s1858_s28 }
  0x5c   : > { %1078 = vrot.lane.b32.xlu0 %v2041_v7, %s1859_s29 }
  0x5f   : > { %1048 = vrot.lane.b32.xlu1 %v671_v32, %s1858_s28 }
  0x60   : > { %746 = vrot.lane.b32.xlu0 %v2023_v61, %s1851_s18  ;;  %v556_v61 = vld [vmem:[#allocation2 + $0x12a] sm:$0xff] }
  0x61   : > { %v576_v0 = vpack.c.bf16 %v556_v61, %v555_v60  ;;  %v2203_v61 = vpack.c.bf16 %v512_v54, %v511_v51  ;;  %v640_v51 = vld [vmem:[#allocation2 + $0xa9] sm:$0xff]  ;;  %v641_v54 = vld [vmem:[#allocation2 + $0xb1] sm:$0xff] }
  0x63   : > { %1094 = vrot.lane.b32.xlu1 %v574_v14, %s1859_s29 }
  0x64   : > { %1080 = vrot.lane.b32.xlu0 %v711_v35, %s1859_s29 }
  0x67   : > { %762 = vrot.lane.b32.xlu1 %v2038_v6, %s1851_s18  ;;  %v2121_v6 = vpack.c.bf16 %v605_v3, %v604_v2  ;;  %v310_v2 = vld [vmem:[#allocation2 + $0xc8] sm:$0xff] }
  0x68   : > { %748 = vrot.lane.b32.xlu0 %v663_v29, %s1851_s18 }
  0x6b   : > { %1096 = vrot.lane.b32.xlu1 %v719_v38, %s1859_s29 }
  0x6c   : > { %794 = vrot.lane.b32.xlu0 %v2041_v7, %s1852_s19  ;;  %v665_v7 = vpack.c.bf16 %v637_v5, %v636_v4  ;;  %v559_v5 = vld [vmem:[#allocation2 + $0x152] sm:$0xff] }
  0x6f   : > { %764 = vrot.lane.b32.xlu1 %v671_v32, %s1851_s18 }
  0x70   : > { %796 = vrot.lane.b32.xlu0 %v711_v35, %s1852_s19 }
  0x73   : > { %810 = vrot.lane.b32.xlu1 %v574_v14, %s1852_s19  ;;  %v684_v14 = vld [vmem:[#allocation2 + $0x7a] sm:$0xff] }
  0x74   : > { %842 = vrot.lane.b32.xlu0 %v2055_v16, %s1853_s20  ;;  %v713_v19 = vpack.c.bf16 %v685_v15, %v684_v14  ;;  %v593_v14 = vld [vmem:[#allocation2 + $0xb0] sm:$0xff] }
  0x77   : > { %812 = vrot.lane.b32.xlu1 %v719_v38, %s1852_s19 }
  0x78   : > { %844 = vrot.lane.b32.xlu0 %v472_v43, %s1853_s20 }
  0x7b   : > { %858 = vrot.lane.b32.xlu1 %v2071_v27, %s1853_s20 }
  0x7c   : > { %890 = vrot.lane.b32.xlu0 %v663_v29, %s1854_s21 }
  0x7f   : > { %860 = vrot.lane.b32.xlu1 %v480_v49, %s1853_s20 }
  0x80   : > { %892 = vrot.lane.b32.xlu0 %v520_v50, %s1854_s21 }
  0x83   : > { %906 = vrot.lane.b32.xlu1 %v671_v32, %s1854_s21  ;;  %v2124_v8 = vpop.permute.xlu0 %742  ;;  %v447_v32 = vld [vmem:[#allocation2 + $0x90] sm:$0xff] }
  0x84   : > { %938 = vrot.lane.b32.xlu0 %v711_v35, %s1855_s22  ;;  %v2175_v36 = vpack.c.bf16 %v448_v33, %v447_v32 }
  0x87   : > { %908 = vrot.lane.b32.xlu1 %v528_v57, %s1854_s21  ;;  %v2129_v11 = vpop.permute.xlu0 %790 }
  0x88   : > { %940 = vrot.lane.b32.xlu0 %v568_v58, %s1855_s22 }
  0x8b   : > { %954 = vrot.lane.b32.xlu1 %v719_v38, %s1855_s22  ;;  %v463_v38 = vld [vmem:[#allocation2 + $0x150] sm:$0xff] }
  0x8c   : > { %986 = vrot.lane.b32.xlu0 %v472_v43, %s1856_s23  ;;  %v2187_v44 = vpack.c.bf16 %v464_v39, %v463_v38  ;;  %v608_v39 = vld [vmem:[#allocation2 + $0x168] sm:$0xff] }
  0x8f   : > { %956 = vrot.lane.b32.xlu1 %v576_v0, %s1855_s22 }
  0x90   : > { %988 = vrot.lane.b32.xlu0 %v2115_v1, %s1856_s23 }
  0x93   : > { %1002 = vrot.lane.b32.xlu1 %v480_v49, %s1856_s23 }
  0x94   : > { %1034 = vrot.lane.b32.xlu0 %v520_v50, %s1858_s28 }
  0x97   : > { %1004 = vrot.lane.b32.xlu1 %v2121_v6, %s1856_s23 }
  0x98   : > { %1036 = vrot.lane.b32.xlu0 %v665_v7, %s1858_s28 }
  0x9b   : > { %1050 = vrot.lane.b32.xlu1 %v528_v57, %s1858_s28 }
  0x9c   : > { %1082 = vrot.lane.b32.xlu0 %v568_v58, %s1859_s29 }
  0x9d   : > { %v2133_v13 = vpop.permute.xlu1 %744 }
  0x9e   : > { %v2135_v17 = vpop.permute.xlu0 %758  ;;  %v1115_v42 = vsel %vm204_vm0, %v2002_v46, %v2133_v13 }
  0x9f   : > { %1052 = vrot.lane.b32.xlu1 %v673_v12, %s1858_s28 }
  0xa0   : > { %750 = vrot.lane.b32.xlu0 %v520_v50, %s1851_s18  ;;  %v293_v50 = vld [vmem:[#allocation2] sm:$0xff] }
  0xa1   : > { %v2139_v18 = vpop.permute.xlu1 %760 }
  0xa2   : > { %v2141_v20 = vpop.permute.xlu0 %792 }
  0xa3   : > { %1098 = vrot.lane.b32.xlu1 %v576_v0, %s1859_s29 }
  0xa4   : > { %1084 = vrot.lane.b32.xlu0 %v713_v19, %s1859_s29 }
  0xa5   : > { %v2145_v23 = vpop.permute.xlu1 %806 }
  0xa6   : > { %v2147_v24 = vpop.permute.xlu0 %838 }
  0xa7   : > { %766 = vrot.lane.b32.xlu1 %v528_v57, %s1851_s18  ;;  %v544_v57 = vld [vmem:[#allocation2 + $0x9a] sm:$0xff] }
  0xa8   : > { %752 = vrot.lane.b32.xlu0 %v665_v7, %s1851_s18  ;;  %v2206_v63 = vpack.c.bf16 %v544_v57, %v543_v56  ;;  %v2263_v56 = vpack.c.bf16 %v609_v41, %v608_v39 }
  0xa9   : > { %v2153_v26 = vpop.permute.xlu1 %808 }
  0xaa   : > { %v2155_v28 = vpop.permute.xlu0 %840 }
  0xab   : > { %1100 = vrot.lane.b32.xlu1 %v2150_v25, %s1859_s29 }
  0xac   : > { %798 = vrot.lane.b32.xlu0 %v568_v58, %s1852_s19  ;;  %v325_v58 = vpack.c.bf16 %v294_v48, %v293_v50 }
  0xad   : > { %v2160_v29 = vpop.permute.xlu1 %854 }
  0xae   : > { %v2162_v30 = vpop.permute.xlu0 %886  ;;  %v1112_v3 = vsel %vm204_vm0, %v325_v58, %v2124_v8  ;;  %v592_v8 = vld [vmem:[#allocation2 + $0xa8] sm:$0xff]  ;;  %v2273_v58 = vpack.c.bf16 %v641_v54, %v640_v51 }
  0xaf   : > { %768 = vrot.lane.b32.xlu1 %v673_v12, %s1851_s18  ;;  %v2234_v33 = vpack.c.bf16 %v593_v14, %v592_v8  ;;  %v499_v51 = vld [vmem:[#allocation2 + $0xc1] sm:$0xff]  ;;  %v500_v54 = vld [vmem:[#allocation2 + $0xc9] sm:$0xff] }
  0xb0   : > { %800 = vrot.lane.b32.xlu0 %v713_v19, %s1852_s19 }
  0xb1   : > { %v2166_v31 = vpop.permute.xlu1 %856 }
  0xb2   : > { %v2168_v34 = vpop.permute.xlu0 %888 }
  0xb3   : > { %814 = vrot.lane.b32.xlu1 %v576_v0, %s1852_s19  ;;  %v309_v0 = vld [vmem:[#allocation2 + $0xc0] sm:$0xff] }
  0xb4   : > { %846 = vrot.lane.b32.xlu0 %v2115_v1, %s1853_s20  ;;  %v2212_v9 = vpack.c.bf16 %v310_v2, %v309_v0 }
  0xb5   : > { %v2173_v35 = vpop.permute.xlu1 %902 }
  0xb6   : > { %v935_v37 = vpop.permute.xlu0 %934 }
  0xb7   : > { %816 = vrot.lane.b32.xlu1 %v2150_v25, %s1852_s19 }
  0xb8   : > { %848 = vrot.lane.b32.xlu0 %v2175_v36, %s1853_s20 }
  0xb9   : > { %v2181_v40 = vpop.permute.xlu1 %904 }
  0xba   : > { %v2183_v43 = vpop.permute.xlu0 %936 }
  0xbb   : > { %862 = vrot.lane.b32.xlu1 %v2121_v6, %s1853_s20 }
  0xbc   : > { %894 = vrot.lane.b32.xlu0 %v665_v7, %s1854_s21  ;;  %v560_v7 = vld [vmem:[#allocation2 + $0x15a] sm:$0xff] }
  0xbd   : > { %v2190_v45 = vpop.permute.xlu1 %950  ;;  %v2224_v21 = vpack.c.bf16 %v560_v7, %v559_v5  ;;  %v657_v5 = vld [vmem:[#allocation2 + $0x171] sm:$0xff] }
  0xbe   : > { %v983_v49 = vpop.permute.xlu0 %982 }
  0xbf   : > { %864 = vrot.lane.b32.xlu1 %v2187_v44, %s1853_s20 }
  0xc0   : > { %896 = vrot.lane.b32.xlu0 %v2192_v47, %s1854_s21 }
  0xc1   : > { %v2198_v55 = vpop.permute.xlu1 %952 }
  0xc2   : > { %v2200_v60 = vpop.permute.xlu0 %984 }
  0xc3   : > { %910 = vrot.lane.b32.xlu1 %v673_v12, %s1854_s21  ;;  %v1160_v12 = vsel %vm1158_vm4, %v1112_v3, %v2129_v11  ;;  %v1136_v11 = vsel %vm204_vm0, %v2212_v9, %v2135_v17 }
  0xc4   : > { %942 = vrot.lane.b32.xlu0 %v713_v19, %s1855_s22  ;;  %v1193_v15 = vsel %vm1191_vm5, %v1160_v12, %v2147_v24  ;;  %v1176_v17 = vsel %vm1158_vm4, %v1136_v11, %v2145_v23  ;;  %v1162_v23 = vsel %vm1158_vm4, %v1115_v42, %v2141_v20 }
  0xc5   : > { %v999_v62 = vpop.permute.xlu1 %998  ;;  %v1226_v22 = vsel %vm1224_vm6, %v1193_v15, %v2162_v30  ;;  %v1209_v48 = vsel %vm1191_vm5, %v1176_v17, %v2160_v29  ;;  %v1195_v46 = vsel %vm1191_vm5, %v1162_v23, %v2155_v28  ;;  %v468_v23 = vld [vmem:[#allocation2 + $0x188] sm:$0xff] }
  0xc6   : > { %v1031_v4 = vpop.permute.xlu0 %1030  ;;  %v1259_v32 = vsel %vm1257_vm7, %v1226_v22, %v935_v37  ;;  %v1242_v50 = vsel %vm1224_vm6, %v1209_v48, %v2173_v35  ;;  %v1228_v20 = vsel %vm1224_vm6, %v1195_v46, %v2168_v34  ;;  %v1139_v34 = vsel %vm204_vm0, %v2010_v53, %v2139_v18  ;;  %v689_v22 = vld [vmem:[#allocation2 + $0xb2] sm:$0xff] }
  0xc7   : > { %912 = vrot.lane.b32.xlu1 %v2203_v61, %s1854_s21  ;;  %v1275_v13 = vsel %vm1257_vm7, %v1242_v50, %v2190_v45  ;;  %v1261_v57 = vsel %vm1257_vm7, %v1228_v20, %v2183_v43  ;;  %v1178_v3 = vsel %vm1158_vm4, %v1139_v34, %v2153_v26  ;;  %v524_v20 = vpack.c.bf16 %v500_v54, %v499_v51 }
  0xc8   : > { %944 = vrot.lane.b32.xlu0 %v2206_v63, %s1855_s22  ;;  %v1308_v35 = vsel %vm1290_vm8, %v1275_v13, %v999_v62  ;;  %v1294_v0 = vsel %vm1290_vm8, %v1261_v57, %v2200_v60  ;;  %v656_v60 = vld [vmem:[#allocation2 + $0x169] sm:$0xff]  ;;  %v1211_v7 = vsel %vm1191_vm5, %v1178_v3, %v2166_v31  ;;  %v515_v57 = vld [vmem:[#allocation2 + $0x181] sm:$0xff] }
  0xc9   : > { %v2216_v10 = vpop.permute.xlu1 %1000  ;;  %v1244_v18 = vsel %vm1224_vm6, %v1211_v7, %v2181_v40  ;;  %v675_v8 = vpack.c.bf16 %v657_v5, %v656_v60  ;;  %v564_v60 = vld [vmem:[#allocation2 + $0x18a] sm:$0xff] }
  0xca   : > { %v1033_v19 = vpop.permute.xlu0 %1032  ;;  %v1277_v26 = vsel %vm1257_vm7, %v1244_v18, %v2198_v55 }
  0xcb   : > { %958 = vrot.lane.b32.xlu1 %v2150_v25, %s1855_s22  ;;  %v1292_v25 = vsel %vm1290_vm8, %v1259_v32, %v983_v49  ;;  %v1327_v62 = vsel %vm1323_vm9, %v1294_v0, %v1033_v19  ;;  %v1310_v31 = vsel %vm1290_vm8, %v1277_v26, %v2216_v10  ;;  %v688_v19 = vld [vmem:[#allocation2 + $0xaa] sm:$0xff]  ;;  %v547_v0 = vld [vmem:[#allocation2 + $0xc2] sm:$0xff]  ;;  %v596_v26 = vld [vmem:[#allocation2 + $0xd8] sm:$0xff] }
  0xcc   : > { %990 = vrot.lane.b32.xlu0 %v2175_v36, %s1856_s23  ;;  %v1325_v38 = vsel %vm1323_vm9, %v1292_v25, %v1031_v4  ;;  %v715_v11 = vpack.c.bf16 %v689_v22, %v688_v19  ;;  %v705_v25 = vld [vmem:[#allocation2 + $0x172] sm:$0xff] }
  0xcd   : > { %v1047_v24 = vpop.permute.xlu1 %1046 }
  0xce   : > { %v1079_v30 = vpop.permute.xlu0 %1078  ;;  %v1341_v28 = vsel %vm1323_vm9, %v1308_v35, %v1047_v24  ;;  %v704_v24 = vld [vmem:[#allocation2 + $0x16a] sm:$0xff] }
  0xcf   : > { %960 = vrot.lane.b32.xlu1 %v2224_v21, %s1855_s22  ;;  %v1358_v37 = vsel %vm1356_vm10, %v1325_v38, %v1079_v30  ;;  %v723_v17 = vpack.c.bf16 %v705_v25, %v704_v24 }
  0xd0   : > { %992 = vrot.lane.b32.xlu0 %v2234_v33, %s1856_s23  ;;  %1786 = vmatprep.mubr.msk.bf16.mxu0 %vm1411_vm11, %v1358_v37 }
  0xd1   : > { %v1049_v49 = vpop.permute.xlu1 %1048 }
  0xd2   : > { %v2259_v29 = vpop.permute.xlu0 %746  ;;  %v1343_v14 = vsel %vm1323_vm9, %v1310_v31, %v1049_v49  ;;  %v467_v49 = vld [vmem:[#allocation2 + $0x180] sm:$0xff] }
  0xd3   : > { %1006 = vrot.lane.b32.xlu1 %v2187_v44, %s1856_s23  ;;  %v1118_v5 = vsel %vm204_vm0, %v2007_v52, %v2259_v29 }
  0xd4   : > { %1038 = vrot.lane.b32.xlu0 %v2192_v47, %s1858_s28 }
  0xd5   : > { %v1095_v45 = vpop.permute.xlu1 %1094 }
  0xd6   : > { %v1374_v2 = vsel %vm1356_vm10, %v1341_v28, %v1095_v45  ;;  %v1081_v43 = vpop.permute.xlu0 %1080  ;;  %v516_v28 = vld [vmem:[#allocation2 + $0x189] sm:$0xff] }
  0xd7   : > { %1008 = vrot.lane.b32.xlu1 %v2263_v56, %s1856_s23  ;;  %1802 = vmatprep.mubr.msk.bf16.mxu1 %vm1411_vm11, %v1374_v2  ;;  %v1360_v4 = vsel %vm1356_vm10, %v1327_v62, %v1081_v43  ;;  %v548_v2 = vld [vmem:[#allocation2 + $0xca] sm:$0xff]  ;;  %v2365_v62 = vpack.c.bf16 %v516_v28, %v515_v57 }
  0xd8   : > { %1040 = vrot.lane.b32.xlu0 %v2273_v58, %s1858_s28  ;;  %1787 = vmatmul.mubr.msk.bf16.vlgmr.msra.gmra.mrb[0].mxu0 %vm1411_vm11, %v1360_v4  ;;  %v2368_v43 = vpack.c.bf16 %v548_v2, %v547_v0  ;;  %v563_v4 = vld [vmem:[#allocation2 + $0x182] sm:$0xff]  ;;  %v660_v2 = vld [vmem:[#allocation2 + $0x199] sm:$0xff] }
  0xd9   : > { %v2292_v53 = vpop.permute.xlu1 %762 }
  0xda   : > { %v2299_v12 = vpop.permute.xlu0 %748 }
  0xdb   : > { %1054 = vrot.lane.b32.xlu1 %v2203_v61, %s1858_s28 }
  0xdc   : > { %1086 = vrot.lane.b32.xlu0 %v2206_v63, %s1859_s29 }
  0xdd   : > { %v1097_v15 = vpop.permute.xlu1 %1096 }
  0xde   : > { %v1376_v40 = vsel %vm1356_vm10, %v1343_v14, %v1097_v15  ;;  %v2309_v55 = vpop.permute.xlu0 %794  ;;  %v2383_v15 = vpack.c.bf16 %v564_v60, %v563_v4  ;;  %v693_v4 = vld [vmem:[#allocation2 + $0xe2] sm:$0xff] }
  0xdf   : > { %1056 = vrot.lane.b32.xlu1 %v675_v8, %s1858_s28  ;;  %1803 = vmatmul.mubr.msk.bf16.vlgmr.msra.gmra.mrb[0].mxu1 %vm1411_vm11, %v1376_v40  ;;  %v1164_v18 = vsel %vm1158_vm4, %v1118_v5, %v2309_v55  ;;  %v1142_v55 = vsel %vm204_vm0, %v2017_v59, %v2292_v53 }
  0xe0   : > { %754 = vrot.lane.b32.xlu0 %v2192_v47, %s1851_s18 }
  0xe1   : > { %v2315_v10 = vpop.permute.xlu1 %764 }
  0xe2   : > { %v2317_v32 = vpop.permute.xlu0 %796 }
  0xe3   : > { %1102 = vrot.lane.b32.xlu1 %v2224_v21, %s1859_s29 }
  0xe4   : > { %1088 = vrot.lane.b32.xlu0 %v715_v11, %s1859_s29 }
  0xe5   : > { %v2322_v38 = vpop.permute.xlu1 %810 }
  0xe6   : > { %v843_v30 = vpop.permute.xlu0 %842 }
  0xe7   : > { %770 = vrot.lane.b32.xlu1 %v2203_v61, %s1851_s18  ;;  %v1197_v31 = vsel %vm1191_vm5, %v1164_v18, %v843_v30 }
  0xe8   : > { %756 = vrot.lane.b32.xlu0 %v2273_v58, %s1851_s18 }
  0xe9   : > { %v2328_v47 = vpop.permute.xlu1 %812 }
  0xea   : > { %v2330_v37 = vpop.permute.xlu0 %844 }
  0xeb   : > { %1104 = vrot.lane.b32.xlu1 %v723_v17, %s1859_s29 }
  0xec   : > { %802 = vrot.lane.b32.xlu0 %v2206_v63, %s1852_s19 }
  0xed   : > { %v2335_v39 = vpop.permute.xlu1 %858 }
  0xee   : > { %v891_v41 = vpop.permute.xlu0 %890 }
  0xef   : > { %772 = vrot.lane.b32.xlu1 %v675_v8, %s1851_s18  ;;  %v1230_v40 = vsel %vm1224_vm6, %v1197_v31, %v891_v41  ;;  %v613_v41 = vld [vmem:[#allocation2 + $0x1a0] sm:$0xff] }
  0xf0   : > { %804 = vrot.lane.b32.xlu0 %v715_v11, %s1852_s19 }
  0xf1   : > { %v2339_v61 = vpop.permute.xlu1 %860 }
  0xf2   : > { %v2341_v42 = vpop.permute.xlu0 %892 }
  0xf3   : > { %818 = vrot.lane.b32.xlu1 %v2224_v21, %s1852_s19  ;;  %v484_v21 = vpack.c.bf16 %v468_v23, %v467_v49 }
  0xf4   : > { %850 = vrot.lane.b32.xlu0 %v2234_v33, %s1853_s20 }
  0xf5   : > { %v2347_v48 = vpop.permute.xlu1 %906 }
  0xf6   : > { %v939_v63 = vpop.permute.xlu0 %938 }
  0xf7   : > { %820 = vrot.lane.b32.xlu1 %v723_v17, %s1852_s19  ;;  %v1263_v52 = vsel %vm1257_vm7, %v1230_v40, %v939_v63  ;;  %v644_v63 = vld [vmem:[#allocation2 + $0xd9] sm:$0xff] }
  0xf8   : > { %852 = vrot.lane.b32.xlu0 %v2212_v9, %s1853_s20 }
  0xf9   : > { %v2352_v50 = vpop.permute.xlu1 %908 }
  0xfa   : > { %v2354_v46 = vpop.permute.xlu0 %940 }
  0xfb   : > { %866 = vrot.lane.b32.xlu1 %v2263_v56, %s1853_s20 }
  0xfc   : > { %898 = vrot.lane.b32.xlu0 %v2273_v58, %s1854_s21 }
  0xfd   : > { %v955_v13 = vpop.permute.xlu1 %954 }
  0xfe   : > { %v987_v35 = vpop.permute.xlu0 %986 }
  0xff   : > { %868 = vrot.lane.b32.xlu1 %v484_v21, %s1853_s20  ;;  %v1296_v22 = vsel %vm1290_vm8, %v1263_v52, %v987_v35 }
 0x100   : > { %900 = vrot.lane.b32.xlu0 %v524_v20, %s1854_s21 }
 0x101   : > { %v2362_v45 = vpop.permute.xlu1 %956 }
 0x102   : > { %v989_v34 = vpop.permute.xlu0 %988 }
 0x103   : > { %914 = vrot.lane.b32.xlu1 %v675_v8, %s1854_s21  ;;  %v597_v8 = vld [vmem:[#allocation2 + $0xe0] sm:$0xff] }
 0x104   : > { %946 = vrot.lane.b32.xlu0 %v715_v11, %s1855_s22  ;;  %v621_v19 = vpack.c.bf16 %v597_v8, %v596_v26  ;;  %v1121_v11 = vsel %vm204_vm0, %v2055_v16, %v2299_v12 }
 0x105   : > { %v1003_v58 = vpop.permute.xlu1 %1002  ;;  %v1166_v16 = vsel %vm1158_vm4, %v1121_v11, %v2317_v32 }
 0x106   : > { %v1035_v3 = vpop.permute.xlu0 %1034  ;;  %v1199_v49 = vsel %vm1191_vm5, %v1166_v16, %v2330_v37  ;;  %v301_v16 = vld [vmem:[#allocation2 + $0x60] sm:$0xff] }
 0x107   : > { %916 = vrot.lane.b32.xlu1 %v2365_v62, %s1854_s21  ;;  %v1329_v24 = vsel %vm1323_vm9, %v1296_v22, %v1035_v3  ;;  %v1232_v54 = vsel %vm1224_vm6, %v1199_v49, %v2341_v42  ;;  %v692_v3 = vld [vmem:[#allocation2 + $0xda] sm:$0xff] }
 0x108   : > { %948 = vrot.lane.b32.xlu0 %v2368_v43, %s1855_s22 }
 0x109   : > { %v2377_v7 = vpop.permute.xlu1 %1004 }
 0x10a   : > { %v1037_v14 = vpop.permute.xlu0 %1036 }
 0x10b   : > { %962 = vrot.lane.b32.xlu1 %v723_v17, %s1855_s22  ;;  %v612_v17 = vld [vmem:[#allocation2 + $0x198] sm:$0xff] }
 0x10c   : > { %994 = vrot.lane.b32.xlu0 %v2212_v9, %s1856_s23  ;;  %v1180_v9 = vsel %vm1158_vm4, %v1142_v55, %v2322_v38  ;;  %v645_v38 = vld [vmem:[#allocation2 + $0xe1] sm:$0xff] }
 0x10d   : > { %v1051_v29 = vpop.permute.xlu1 %1050  ;;  %v1213_v59 = vsel %vm1191_vm5, %v1180_v9, %v2335_v39  ;;  %v629_v39 = vpack.c.bf16 %v613_v41, %v612_v17  ;;  %v669_v57 = vpack.c.bf16 %v645_v38, %v644_v63 }
 0x10e   : > { %v1083_v25 = vpop.permute.xlu0 %1082  ;;  %v1246_v12 = vsel %vm1224_vm6, %v1213_v59, %v2347_v48  ;;  %v1265_v48 = vsel %vm1257_vm7, %v1232_v54, %v2354_v46 }
 0x10f   : > { %964 = vrot.lane.b32.xlu1 %v2383_v15, %s1855_s22  ;;  %v1362_v30 = vsel %vm1356_vm10, %v1329_v24, %v1083_v25  ;;  %v1279_v23 = vsel %vm1257_vm7, %v1246_v12, %v955_v13  ;;  %v1298_v13 = vsel %vm1290_vm8, %v1265_v48, %v989_v34  ;;  %v661_v34 = vld [vmem:[#allocation2 + $0x1a1] sm:$0xff] }
 0x110   : > { %996 = vrot.lane.b32.xlu0 %v621_v19, %s1856_s23  ;;  %1790 = vmatprep.mubr.msk.bf16.mxu0 %vm1411_vm11, %v1362_v30  ;;  %v1312_v32 = vsel %vm1290_vm8, %v1279_v23, %v1003_v58  ;;  %v1331_v42 = vsel %vm1323_vm9, %v1298_v13, %v1037_v14  ;;  %v677_v5 = vpack.c.bf16 %v661_v34, %v660_v2  ;;  %v317_v23 = vld [vmem:[#allocation2 + $0x120] sm:$0xff] }
 0x111   : > { %v1053_v53 = vpop.permute.xlu1 %1052  ;;  %v1345_v35 = vsel %vm1323_vm9, %v1312_v32, %v1051_v29 }
 0x112   : > { %v2413_v51 = vpop.permute.xlu0 %750 }
 0x113   : > { %1010 = vrot.lane.b32.xlu1 %v484_v21, %s1856_s23  ;;  %v1145_v21 = vsel %vm204_vm0, %v2071_v27, %v2315_v10 }
 0x114   : > { %1042 = vrot.lane.b32.xlu0 %v524_v20, %s1858_s28  ;;  %v1182_v46 = vsel %vm1158_vm4, %v1145_v21, %v2328_v47 }
 0x115   : > { %v1099_v37 = vpop.permute.xlu1 %1098  ;;  %v1215_v58 = vsel %vm1191_vm5, %v1182_v46, %v2339_v61 }
 0x116   : > { %v1378_v28 = vsel %vm1356_vm10, %v1345_v35, %v1099_v37  ;;  %v1085_v0 = vpop.permute.xlu0 %1084  ;;  %v1248_v10 = vsel %vm1224_vm6, %v1215_v58, %v2352_v50  ;;  %v717_v50 = vpack.c.bf16 %v693_v4, %v692_v3 }
 0x117   : > { %1012 = vrot.lane.b32.xlu1 %v629_v39, %s1856_s23  ;;  %1806 = vmatprep.mubr.msk.bf16.mxu1 %vm1411_vm11, %v1378_v28  ;;  %v1364_v20 = vsel %vm1356_vm10, %v1331_v42, %v1085_v0  ;;  %v1281_v47 = vsel %vm1257_vm7, %v1248_v10, %v2362_v45  ;;  %v708_v45 = vld [vmem:[#allocation2 + $0x19a] sm:$0xff]  ;;  %v318_v39 = vld [vmem:[#allocation2 + $0x128] sm:$0xff] }
 0x118   : > { %1044 = vrot.lane.b32.xlu0 %v669_v57, %s1858_s28  ;;  %1791 = vmatmul.mubr.msk.bf16.gmra.mrb[4].mxu0 %vm1411_vm11, %v1364_v20  ;;  %v1314_v61 = vsel %vm1290_vm8, %v1281_v47, %v2377_v7  ;;  %v337_v35 = vpack.c.bf16 %v318_v39, %v317_v23 }
 0x119   : > { %v767_v27 = vpop.permute.xlu1 %766  ;;  %v1347_v18 = vsel %vm1323_vm9, %v1314_v61, %v1053_v53 }
 0x11a   : > { %v753_v60 = vpop.permute.xlu0 %752  ;;  %v1148_v0 = vsel %vm204_vm0, %v337_v35, %v767_v27 }
 0x11b   : > { %1058 = vrot.lane.b32.xlu1 %v2365_v62, %s1858_s28  ;;  %v709_v62 = vld [vmem:[#allocation2 + $0x1a2] sm:$0xff]  ;;  %v1127_v46 = vsel %vm204_vm0, %v2115_v1, %v753_v60 }
 0x11c   : > { %1090 = vrot.lane.b32.xlu0 %v2368_v43, %s1859_s29  ;;  %v725_v40 = vpack.c.bf16 %v709_v62, %v708_v45 }
 0x11d   : > { %v1101_v26 = vpop.permute.xlu1 %1100 }
 0x11e   : > { %v1380_v8 = vsel %vm1356_vm10, %v1347_v18, %v1101_v26  ;;  %v799_v31 = vpop.permute.xlu0 %798 }
 0x11f   : > { %1060 = vrot.lane.b32.xlu1 %v677_v5, %s1858_s28  ;;  %1807 = vmatmul.mubr.msk.bf16.gmra.mrb[4].mxu1 %vm1411_vm11, %v1380_v8 }
 0x120   : > { %1092 = vrot.lane.b32.xlu0 %v717_v50, %s1859_s29 }
 0x121   : > { %v769_v14 = vpop.permute.xlu1 %768 }
 0x122   : > { %v801_v7 = vpop.permute.xlu0 %800 }
 0x123   : > { %1106 = vrot.lane.b32.xlu1 %v2383_v15, %s1859_s29  ;;  %v302_v15 = vld [vmem:[#allocation2 + $0x68] sm:$0xff]  ;;  %v1170_v3 = vsel %vm1158_vm4, %v1127_v46, %v801_v7 }
 0x124   : > { %v329_v63 = vpack.c.bf16 %v302_v15, %v301_v16 }
 0x125   : > { %v815_v43 = vpop.permute.xlu1 %814 }
 0x126   : > { %v847_v52 = vpop.permute.xlu0 %846  ;;  %v1124_v54 = vsel %vm204_vm0, %v329_v63, %v2413_v51  ;;  %v1184_v2 = vsel %vm1158_vm4, %v1148_v0, %v815_v43 }
 0x127   : > { %1108 = vrot.lane.b32.xlu1 %v725_v40, %s1859_s29  ;;  %v1168_v48 = vsel %vm1158_vm4, %v1124_v54, %v799_v31  ;;  %v1151_v31 = vsel %vm204_vm0, %v2121_v6, %v769_v14 }
 0x128   : > { %v1201_v37 = vsel %vm1191_vm5, %v1168_v48, %v847_v52 }
 0x129   : > { %v817_v29 = vpop.permute.xlu1 %816 }
 0x12a   : > { %v849_v19 = vpop.permute.xlu0 %848  ;;  %v1186_v7 = vsel %vm1158_vm4, %v1151_v31, %v817_v29 }
 0x12b   : > { %v1203_v27 = vsel %vm1191_vm5, %v1170_v3, %v849_v19 }
 0x12d   : > { %v863_v22 = vpop.permute.xlu1 %862 }
 0x12e   : > { %v895_v55 = vpop.permute.xlu0 %894  ;;  %v1217_v58 = vsel %vm1191_vm5, %v1184_v2, %v863_v22 }
 0x12f   : > { %v1234_v13 = vsel %vm1224_vm6, %v1201_v37, %v895_v55 }
 0x131   : > { %v865_v11 = vpop.permute.xlu1 %864 }
 0x132   : > { %v897_v24 = vpop.permute.xlu0 %896  ;;  %v1219_v43 = vsel %vm1191_vm5, %v1186_v7, %v865_v11 }
 0x133   : > { %v1236_v60 = vsel %vm1224_vm6, %v1203_v27, %v897_v24 }
 0x135   : > { %v911_v25 = vpop.permute.xlu1 %910 }
 0x136   : > { %v943_v9 = vpop.permute.xlu0 %942  ;;  %v1250_v4 = vsel %vm1224_vm6, %v1217_v58, %v911_v25 }
 0x137   : > { %v1267_v28 = vsel %vm1257_vm7, %v1234_v13, %v943_v9 }
 0x139   : > { %v913_v30 = vpop.permute.xlu1 %912 }
 0x13a   : > { %v945_v17 = vpop.permute.xlu0 %944  ;;  %v1252_v19 = vsel %vm1224_vm6, %v1219_v43, %v913_v30 }
 0x13b   : > { %v1269_v61 = vsel %vm1257_vm7, %v1236_v60, %v945_v17 }
 0x13d   : > { %v959_v41 = vpop.permute.xlu1 %958 }
 0x13e   : > { %v991_v59 = vpop.permute.xlu0 %990  ;;  %v1283_v1 = vsel %vm1257_vm7, %v1250_v4, %v959_v41 }
 0x13f   : > { %v1300_v42 = vsel %vm1290_vm8, %v1267_v28, %v991_v59 }
 0x141   : > { %v961_v53 = vpop.permute.xlu1 %960 }
 0x142   : > { %v993_v12 = vpop.permute.xlu0 %992  ;;  %v1285_v22 = vsel %vm1257_vm7, %v1252_v19, %v961_v53 }
 0x143   : > { %v1302_v50 = vsel %vm1290_vm8, %v1269_v61, %v993_v12 }
 0x145   : > { %v1007_v38 = vpop.permute.xlu1 %1006 }
 0x146   : > { %v1039_v49 = vpop.permute.xlu0 %1038  ;;  %v1316_v5 = vsel %vm1290_vm8, %v1283_v1, %v1007_v38 }
 0x147   : > { %v1333_v51 = vsel %vm1323_vm9, %v1300_v42, %v1039_v49 }
 0x149   : > { %v1009_v32 = vpop.permute.xlu1 %1008 }
 0x14a   : > { %v1041_v57 = vpop.permute.xlu0 %1040  ;;  %v1318_v6 = vsel %vm1290_vm8, %v1285_v22, %v1009_v32 }
 0x14b   : > { %v1335_v45 = vsel %vm1323_vm9, %v1302_v50, %v1041_v57 }
 0x14d   : > { %v1055_v21 = vpop.permute.xlu1 %1054 }
 0x14e   : > { %v1087_v20 = vpop.permute.xlu0 %1086  ;;  %v1349_v18 = vsel %vm1323_vm9, %v1316_v5, %v1055_v21 }
 0x14f   : > { %v1366_v34 = vsel %vm1356_vm10, %v1333_v51, %v1087_v20 }
 0x150   : > { %1794 = vmatprep.mubr.msk.bf16.mxu0 %vm1411_vm11, %v1366_v34 }
 0x151   : > { %v1057_v10 = vpop.permute.xlu1 %1056 }
 0x152   : > { %v755_v47 = vpop.permute.xlu0 %754  ;;  %v1351_v14 = vsel %vm1323_vm9, %v1318_v6, %v1057_v10 }
 0x153   : > { %v1130_v57 = vsel %vm204_vm0, %v2175_v36, %v755_v47 }
 0x155   : > { %v1103_v26 = vpop.permute.xlu1 %1102 }
 0x156   : > { %v1382_v8 = vsel %vm1356_vm10, %v1349_v18, %v1103_v26  ;;  %v1089_v62 = vpop.permute.xlu0 %1088 }
 0x157   : > { %1810 = vmatprep.mubr.msk.bf16.mxu1 %vm1411_vm11, %v1382_v8  ;;  %v1368_v40 = vsel %vm1356_vm10, %v1335_v45, %v1089_v62 }
 0x158   : > { %1795 = vmatmul.mubr.msk.bf16.gmra.mrb[8].mxu0 %vm1411_vm11, %v1368_v40 }
 0x159   : > { %v771_v52 = vpop.permute.xlu1 %770 }
 0x15a   : > { %v757_v55 = vpop.permute.xlu0 %756  ;;  %v1154_v36 = vsel %vm204_vm0, %v2187_v44, %v771_v52 }
 0x15b   : > { %v1133_v21 = vsel %vm204_vm0, %v2234_v33, %v757_v55 }
 0x15d   : > { %v1105_v24 = vpop.permute.xlu1 %1104 }
 0x15e   : > { %v1384_v25 = vsel %vm1356_vm10, %v1351_v14, %v1105_v24  ;;  %v803_v29 = vpop.permute.xlu0 %802  ;;  %v2538_v14 = vld [vmem:[%s2648_s2] ss:$0 sm:$0xff] }
 0x15f   : > { %1811 = vmatmul.mubr.msk.bf16.gmra.mrb[8].mxu1 %vm1411_vm11, %v1384_v25  ;;  %v1172_v28 = vsel %vm1158_vm4, %v1130_v57, %v803_v29 }
 0x161   : > { %v773_v9 = vpop.permute.xlu1 %772 }
 0x162   : > { %v805_v11 = vpop.permute.xlu0 %804  ;;  %v1157_v61 = vsel %vm204_vm0, %v2263_v56, %v773_v9 }
 0x163   : > { %v1174_v2 = vsel %vm1158_vm4, %v1133_v21, %v805_v11 }
 0x165   : > { %v819_v17 = vpop.permute.xlu1 %818 }
 0x166   : > { %v851_v41 = vpop.permute.xlu0 %850  ;;  %v1188_v3 = vsel %vm1158_vm4, %v1154_v36, %v819_v17 }
 0x167   : > { %v1205_v42 = vsel %vm1191_vm5, %v1172_v28, %v851_v41 }
 0x169   : > { %v821_v59 = vpop.permute.xlu1 %820 }
 0x16a   : > { %v853_v16 = vpop.permute.xlu0 %852  ;;  %v1190_v8 = vsel %vm1158_vm4, %v1157_v61, %v821_v59 }
 0x16b   : > { %v1207_v58 = vsel %vm1191_vm5, %v1174_v2, %v853_v16 }
 0x16d   : > { %v867_v30 = vpop.permute.xlu1 %866 }
 0x16e   : > { %v899_v15 = vpop.permute.xlu0 %898  ;;  %v1221_v1 = vsel %vm1191_vm5, %v1188_v3, %v867_v30 }
 0x16f   : > { %v1238_v46 = vsel %vm1224_vm6, %v1205_v42, %v899_v15 }
 0x171   : > { %v869_v53 = vpop.permute.xlu1 %868 }
 0x172   : > { %v901_v12 = vpop.permute.xlu0 %900  ;;  %v1223_v62 = vsel %vm1191_vm5, %v1190_v8, %v869_v53 }
 0x173   : > { %v1240_v4 = vsel %vm1224_vm6, %v1207_v58, %v901_v12 }
 0x175   : > { %v915_v63 = vpop.permute.xlu1 %914 }
 0x176   : > { %v947_v38 = vpop.permute.xlu0 %946  ;;  %v1254_v44 = vsel %vm1224_vm6, %v1221_v1, %v915_v63 }
 0x177   : > { %v1271_v51 = vsel %vm1257_vm7, %v1238_v46, %v947_v38 }
 0x179   : > { %v917_v49 = vpop.permute.xlu1 %916 }
 0x17a   : > { %v949_v23 = vpop.permute.xlu0 %948  ;;  %v1256_v56 = vsel %vm1224_vm6, %v1223_v62, %v917_v49 }
 0x17b   : > { %v1273_v47 = vsel %vm1257_vm7, %v1240_v4, %v949_v23 }
 0x17d   : > { %v963_v39 = vpop.permute.xlu1 %962 }
 0x17e   : > { %v995_v54 = vpop.permute.xlu0 %994  ;;  %v1287_v18 = vsel %vm1257_vm7, %v1254_v44, %v963_v39 }
 0x17f   : > { %v1304_v34 = vsel %vm1290_vm8, %v1271_v51, %v995_v54 }
 0x181   : > { %v965_v32 = vpop.permute.xlu1 %964 }
 0x182   : > { %v997_v48 = vpop.permute.xlu0 %996  ;;  %v1289_v52 = vsel %vm1257_vm7, %v1256_v56, %v965_v32 }
 0x183   : > { %v1306_v5 = vsel %vm1290_vm8, %v1273_v47, %v997_v48 }
 0x185   : > { %v1011_v35 = vpop.permute.xlu1 %1010 }
 0x186   : > { %v1043_v37 = vpop.permute.xlu0 %1042  ;;  %v1320_v31 = vsel %vm1290_vm8, %v1287_v18, %v1011_v35 }
 0x187   : > { %v1337_v10 = vsel %vm1323_vm9, %v1304_v34, %v1043_v37 }
 0x189   : > { %v1013_v13 = vpop.permute.xlu1 %1012 }
 0x18a   : > { %v1045_v0 = vpop.permute.xlu0 %1044  ;;  %v1322_v19 = vsel %vm1290_vm8, %v1289_v52, %v1013_v13 }
 0x18b   : > { %v1339_v26 = vsel %vm1323_vm9, %v1306_v5, %v1045_v0 }
 0x18d   : > { %v1059_v20 = vpop.permute.xlu1 %1058 }
 0x18e   : > { %v1091_v33 = vpop.permute.xlu0 %1090  ;;  %v1353_v7 = vsel %vm1323_vm9, %v1320_v31, %v1059_v20 }
 0x18f   : > { %v1370_v27 = vsel %vm1356_vm10, %v1337_v10, %v1091_v33 }
 0x190   : > { %1798 = vmatprep.mubr.msk.bf16.mxu0 %vm1411_vm11, %v1370_v27 }
 0x191   : > { %v1061_v60 = vpop.permute.xlu1 %1060 }
 0x192   : > { %v1093_v50 = vpop.permute.xlu0 %1092  ;;  %v1355_v22 = vsel %vm1323_vm9, %v1322_v19, %v1061_v60 }
 0x193   : > { %v1372_v45 = vsel %vm1356_vm10, %v1339_v26, %v1093_v50 }
 0x194   : > { %1799 = vmatmul.mubr.msk.bf16.gmra.mrb[12].mxu0 %vm1411_vm11, %v1372_v45 }
 0x195   : > { %v1107_v40 = vpop.permute.xlu1 %1106 }
 0x196   : > { %v1386_v43 = vsel %vm1356_vm10, %v1353_v7, %v1107_v40 }
 0x197   : > { %1814 = vmatprep.mubr.msk.bf16.mxu1 %vm1411_vm11, %v1386_v43 }
 0x199   : > { %v1109_v55 = vpop.permute.xlu1 %1108 }
 0x19a   : > { %v1388_v6 = vsel %vm1356_vm10, %v1355_v22, %v1109_v55 }
 0x19b   : > { %1815 = vmatmul.mubr.msk.bf16.gmra.mrb[12].mxu1 %vm1411_vm11, %v1388_v6 }
 0x1ab   : > { %v1788_v24 = vpop.f32.mrb[0].mxu0 }
 0x1ac   : > { %v1494_v25 = vadd.f32 %v1788_v24, %v2538_v14  ;;  %v1485_v29 = vpop.f32.mrb[1].mxu0 }
 0x1ad   : > { %v1486_v9 = vadd.f32 %v2538_v14, %v1485_v29  ;;  %v1789_v11 = vpop.f32.mrb[2].mxu0 }
 0x1ae   : > { %v1614_v17 = vmax.f32 %v1494_v25, 0.0  ;;  %v1497_v41 = vadd.f32 %v1789_v11, %v2538_v14  ;;  %v1488_v59 = vpop.f32.mrb[3].mxu0 }
 0x1af   : > { %v1612_v16 = vmax.f32 %v1486_v9, 0.0  ;;  %v1489_v30 = vadd.f32 %v2538_v14, %v1488_v59 }
 0x1b0   : > { %1647 = vst.msk [vmem:[%s2546_s7 + $0x10] sm:$0xff] %vm1644_vm12, %v1614_v17  ;;  %v1615_v15 = vmax.f32 %v1497_v41, 0.0 }
 0x1b1   : > { %1645 = vst.msk [vmem:[%s2546_s7] sm:$0xff] %vm1644_vm12, %v1612_v16  ;;  %v1613_v53 = vmax.f32 %v1489_v30, 0.0 }
 0x1b2   : > { %v1804_v12 = vpop.f32.mrb[0].mxu1  ;;  %1648 = vst.msk [vmem:[%s2546_s7 + $0x18] sm:$0xff] %vm1644_vm12, %v1615_v15 }
 0x1b3   : > { %v1558_v63 = vadd.f32 %v1804_v12, %v2538_v14  ;;  %v1549_v38 = vpop.f32.mrb[1].mxu1  ;;  %1646 = vst.msk [vmem:[%s2546_s7 + $0x8] sm:$0xff] %vm1644_vm12, %v1613_v53 }
 0x1b4   : > { %v1550_v49 = vadd.f32 %v2538_v14, %v1549_v38  ;;  %v1805_v23 = vpop.f32.mrb[2].mxu1 }
 0x1b5   : > { %v1630_v39 = vmax.f32 %v1558_v63, 0.0  ;;  %v1561_v54 = vadd.f32 %v1805_v23, %v2538_v14  ;;  %v1552_v32 = vpop.f32.mrb[3].mxu1 }
 0x1b6   : > { %v1628_v48 = vmax.f32 %v1550_v49, 0.0  ;;  %v1553_v35 = vadd.f32 %v2538_v14, %v1552_v32 }
 0x1b7   : > { %1663 = vst.msk [vmem:[%s2546_s7 + $0x90] sm:$0xff] %vm1644_vm12, %v1630_v39  ;;  %v1631_v37 = vmax.f32 %v1561_v54, 0.0 }
 0x1b8   : > { %1661 = vst.msk [vmem:[%s2546_s7 + $0x80] sm:$0xff] %vm1644_vm12, %v1628_v48  ;;  %v1629_v57 = vmax.f32 %v1553_v35, 0.0 }
 0x1b9   : > { %1664 = vst.msk [vmem:[%s2546_s7 + $0x98] sm:$0xff] %vm1644_vm12, %v1631_v37 }
 0x1ba   : > { %1662 = vst.msk [vmem:[%s2546_s7 + $0x88] sm:$0xff] %vm1644_vm12, %v1629_v57 }
 0x1eb   : > { %v1792_v13 = vpop.f32.mrb[4].mxu0 }
 0x1ec   : > { %v1510_v28 = vadd.f32 %v1792_v13, %v2538_v14  ;;  %v1501_v21 = vpop.f32.mrb[5].mxu0 }
 0x1ed   : > { %v1502_v42 = vadd.f32 %v2538_v14, %v1501_v21  ;;  %v1793_v0 = vpop.f32.mrb[6].mxu0 }
 0x1ee   : > { %v1618_v46 = vmax.f32 %v1510_v28, 0.0  ;;  %v1513_v51 = vadd.f32 %v1793_v0, %v2538_v14  ;;  %v1504_v20 = vpop.f32.mrb[7].mxu0 }
 0x1ef   : > { %v1616_v2 = vmax.f32 %v1502_v42, 0.0  ;;  %v1505_v34 = vadd.f32 %v2538_v14, %v1504_v20 }
 0x1f0   : > { %1651 = vst.msk [vmem:[%s2546_s7 + $0x30] sm:$0xff] %vm1644_vm12, %v1618_v46  ;;  %v1619_v36 = vmax.f32 %v1513_v51, 0.0 }
 0x1f1   : > { %1649 = vst.msk [vmem:[%s2546_s7 + $0x20] sm:$0xff] %vm1644_vm12, %v1616_v2  ;;  %v1617_v58 = vmax.f32 %v1505_v34, 0.0 }
 0x1f2   : > { %v1808_v10 = vpop.f32.mrb[4].mxu1  ;;  %1652 = vst.msk [vmem:[%s2546_s7 + $0x38] sm:$0xff] %vm1644_vm12, %v1619_v36 }
 0x1f3   : > { %v1574_v33 = vadd.f32 %v1808_v10, %v2538_v14  ;;  %v1565_v3 = vpop.f32.mrb[5].mxu1  ;;  %1650 = vst.msk [vmem:[%s2546_s7 + $0x28] sm:$0xff] %vm1644_vm12, %v1617_v58 }
 0x1f4   : > { %v1566_v4 = vadd.f32 %v2538_v14, %v1565_v3  ;;  %v1809_v27 = vpop.f32.mrb[6].mxu1 }
 0x1f5   : > { %v1634_v1 = vmax.f32 %v1574_v33, 0.0  ;;  %v1577_v47 = vadd.f32 %v1809_v27, %v2538_v14  ;;  %v1568_v60 = vpop.f32.mrb[7].mxu1 }
 0x1f6   : > { %v1632_v44 = vmax.f32 %v1566_v4, 0.0  ;;  %v1569_v5 = vadd.f32 %v2538_v14, %v1568_v60 }
 0x1f7   : > { %1667 = vst.msk [vmem:[%s2546_s7 + $0xb0] sm:$0xff] %vm1644_vm12, %v1634_v1  ;;  %v1635_v61 = vmax.f32 %v1577_v47, 0.0 }
 0x1f8   : > { %1665 = vst.msk [vmem:[%s2546_s7 + $0xa0] sm:$0xff] %vm1644_vm12, %v1632_v44  ;;  %v1633_v18 = vmax.f32 %v1569_v5, 0.0 }
 0x1f9   : > { %1668 = vst.msk [vmem:[%s2546_s7 + $0xb8] sm:$0xff] %vm1644_vm12, %v1635_v61 }
 0x1fa   : > { %1666 = vst.msk [vmem:[%s2546_s7 + $0xa8] sm:$0xff] %vm1644_vm12, %v1633_v18 }
 0x22b   : > { %v1796_v26 = vpop.f32.mrb[8].mxu0 }
 0x22c   : > { %v1526_v50 = vadd.f32 %v1796_v26, %v2538_v14  ;;  %v1517_v8 = vpop.f32.mrb[9].mxu0 }
 0x22d   : > { %v1518_v31 = vadd.f32 %v2538_v14, %v1517_v8  ;;  %v1797_v45 = vpop.f32.mrb[10].mxu0 }
 0x22e   : > { %v1622_v62 = vmax.f32 %v1526_v50, 0.0  ;;  %v1529_v7 = vadd.f32 %v1797_v45, %v2538_v14  ;;  %v1520_v40 = vpop.f32.mrb[11].mxu0 }
 0x22f   : > { %v1620_v56 = vmax.f32 %v1518_v31, 0.0  ;;  %v1521_v43 = vadd.f32 %v2538_v14, %v1520_v40 }
 0x230   : > { %1655 = vst.msk [vmem:[%s2546_s7 + $0x50] sm:$0xff] %vm1644_vm12, %v1622_v62  ;;  %v1623_v52 = vmax.f32 %v1529_v7, 0.0 }
 0x231   : > { %1653 = vst.msk [vmem:[%s2546_s7 + $0x40] sm:$0xff] %vm1644_vm12, %v1620_v56  ;;  %v1621_v19 = vmax.f32 %v1521_v43, 0.0 }
 0x232   : > { %v1812_v22 = vpop.f32.mrb[8].mxu1  ;;  %1656 = vst.msk [vmem:[%s2546_s7 + $0x58] sm:$0xff] %vm1644_vm12, %v1623_v52 }
 0x233   : > { %v1590_v55 = vadd.f32 %v1812_v22, %v2538_v14  ;;  %v1581_v6 = vpop.f32.mrb[9].mxu1  ;;  %1654 = vst.msk [vmem:[%s2546_s7 + $0x48] sm:$0xff] %vm1644_vm12, %v1621_v19 }
 0x234   : > { %v1582_v24 = vadd.f32 %v2538_v14, %v1581_v6  ;;  %v1813_v25 = vpop.f32.mrb[10].mxu1 }
 0x235   : > { %v1638_v29 = vmax.f32 %v1590_v55, 0.0  ;;  %v1593_v9 = vadd.f32 %v1813_v25, %v2538_v14  ;;  %v1584_v11 = vpop.f32.mrb[11].mxu1 }
 0x236   : > { %v1636_v17 = vmax.f32 %v1582_v24, 0.0  ;;  %v1585_v41 = vadd.f32 %v2538_v14, %v1584_v11 }
 0x237   : > { %1671 = vst.msk [vmem:[%s2546_s7 + $0xd0] sm:$0xff] %vm1644_vm12, %v1638_v29  ;;  %v1639_v59 = vmax.f32 %v1593_v9, 0.0 }
 0x238   : > { %1669 = vst.msk [vmem:[%s2546_s7 + $0xc0] sm:$0xff] %vm1644_vm12, %v1636_v17  ;;  %v1637_v16 = vmax.f32 %v1585_v41, 0.0 }
 0x239   : > { %1672 = vst.msk [vmem:[%s2546_s7 + $0xd8] sm:$0xff] %vm1644_vm12, %v1639_v59 }
 0x23a   : > { %1670 = vst.msk [vmem:[%s2546_s7 + $0xc8] sm:$0xff] %vm1644_vm12, %v1637_v16 }
 0x267   : > { %v1800_v30 = vpop.f32.mrb[12].mxu0 }
 0x268   : > { %v1542_v15 = vadd.f32 %v1800_v30, %v2538_v14  ;;  %v1533_v53 = vpop.f32.mrb[13].mxu0 }
 0x269   : > { %v1534_v12 = vadd.f32 %v2538_v14, %v1533_v53  ;;  %v1801_v63 = vpop.f32.mrb[14].mxu0 }
 0x26a   : > { %v1626_v38 = vmax.f32 %v1542_v15, 0.0  ;;  %v1545_v49 = vadd.f32 %v1801_v63, %v2538_v14  ;;  %v1536_v23 = vpop.f32.mrb[15].mxu0 }
 0x26b   : > { %v1624_v39 = vmax.f32 %v1534_v12, 0.0  ;;  %v1537_v54 = vadd.f32 %v2538_v14, %v1536_v23 }
 0x26c   : > { %1659 = vst.msk [vmem:[%s2546_s7 + $0x70] sm:$0xff] %vm1644_vm12, %v1626_v38  ;;  %v1627_v32 = vmax.f32 %v1545_v49, 0.0 }
 0x26d   : > { %1657 = vst.msk [vmem:[%s2546_s7 + $0x60] sm:$0xff] %vm1644_vm12, %v1624_v39  ;;  %v1625_v48 = vmax.f32 %v1537_v54, 0.0 }
 0x26e   : > { %v1816_v35 = vpop.f32.mrb[12].mxu1  ;;  %1660 = vst.msk [vmem:[%s2546_s7 + $0x78] sm:$0xff] %vm1644_vm12, %v1627_v32 }
 0x26f   : > { %v1606_v37 = vadd.f32 %v1816_v35, %v2538_v14  ;;  %v1597_v57 = vpop.f32.mrb[13].mxu1  ;;  %1658 = vst.msk [vmem:[%s2546_s7 + $0x68] sm:$0xff] %vm1644_vm12, %v1625_v48 }
 0x270   : > { %v1598_v13 = vadd.f32 %v2538_v14, %v1597_v57  ;;  %v1817_v28 = vpop.f32.mrb[14].mxu1 }
 0x271   : > { %v1642_v21 = vmax.f32 %v1606_v37, 0.0  ;;  %v1609_v42 = vadd.f32 %v1817_v28, %v2538_v14  ;;  %v1600_v0 = vpop.f32.mrb[15].mxu1 }
 0x272   : > { %v1640_v46 = vmax.f32 %v1598_v13, 0.0  ;;  %v1601_v51 = vadd.f32 %v2538_v14, %v1600_v0 }
 0x273   : > { %1675 = vst.msk [vmem:[%s2546_s7 + $0xf0] sm:$0xff] %vm1644_vm12, %v1642_v21  ;;  %v1643_v20 = vmax.f32 %v1609_v42, 0.0 }
 0x274   : > { %1673 = vst.msk [vmem:[%s2546_s7 + $0xe0] sm:$0xff] %vm1644_vm12, %v1640_v46  ;;  %v1641_v2 = vmax.f32 %v1601_v51, 0.0 }
 0x275   : > { %1676 = vst.msk [vmem:[%s2546_s7 + $0xf8] sm:$0xff] %vm1644_vm12, %v1643_v20 }
 0x276   : > { %1674 = vst.msk [vmem:[%s2546_s7 + $0xe8] sm:$0xff] %vm1644_vm12, %v1641_v2 }
 0x277 PF: > { %s13_s12 = sadd.s32 1, %s1848_s12  }
 0x278   : > { %p10_p4 = scmp.ge.s32.totalorder %s13_s12, 4  }
 0x27a   :  { %12 = sbr.rel (!%p10_p4) target bundleno = 1 (0x1), region = 64 }

// kernel: generator_forward.5
= control target key start
LH: loop header
LB: loop body
LE: loop exit
PB: predicated region body
PF: predicated region fallthrough
CT: control target
= control target key end

     0   :  { %s4109_s24 = smov 0   ;;  %s5707_s0 = inlined_call_operand.vmem [shape: f32[2,16,16,8], index: 0, kind: input, shape index: {}]   ;;  %s5708_s1 = inlined_call_operand.vmem [shape: f32[2,16,16,8], index: 1, kind: input, shape index: {}]   ;;  %s5709_s2 = inlined_call_operand.vmem [shape: bf16[72,8], index: 2, kind: input, shape index: {}]   ;;  %s5710_s3 = inlined_call_operand.vmem [shape: bf16[72,8], index: 3, kind: input, shape index: {}]   ;;  %s5711_s4 = inlined_call_operand.vmem [shape: f32[1,8], index: 4, kind: input, shape index: {}]   ;;  %s5712_s5 = inlined_call_operand.vmem [shape: bf16[8,3], index: 5, kind: input, shape index: {}]   ;;  %s5713_s6 = inlined_call_operand.vmem [shape: f32[1,3], index: 6, kind: input, shape index: {}]   ;;  %s5714_s7 = inlined_call_operand.vmem [shape: f32[2,16,16,3], index: 7, kind: output, shape index: {}]  }
   0x1 LB: > { %s3630_s25 = sadd.s32 4294967295, %s4058_s24   ;;  %p3634_p0 = scmp.ge.s32.totalorder %s4058_s24, 1  ;;  %s4058_s24 = sphi %s4109_s24, %s17_s24  }
   0x2   : > { %p247_p1 = scmp.lt.s32.totalorder %s4058_s24, 3 }
   0x4   : > { %p248_p2 = pnand %p3634_p0, %p247_p1 }
   0x5   : > { %vm332_vm0 = vcmask (!%p248_p2), 64512   ;;  %vm335_vm1 = vcmask (!%p248_p2), 58368   ;;  %v4060_v0 = vmov (!%p248_p2), 0.0   ;;  %p284_p3 = scmp.lt.s32.totalorder (!%p248_p2), %s3630_s25, 1  ;;  %s4061_s30 = smov (!%p248_p2), 16   ;;  %v3978_v48 = vld [vmem:[%s5709_s2] sm:$0xff] (!%p248_p2)  }
   0x6   : > { %251 = sbr.rel (%p248_p2) target bundleno = 1143 (0x477), region = 48  ;;  %333 = vst.msk [vmem:[#allocation2] sm:$0xff] (!%p248_p2), %vm332_vm0, %v4060_v0  ;;  %334 = vst.msk [vmem:[#allocation2 + $0x8] sm:$0xff] (!%p248_p2), %vm332_vm0, %v4060_v0  ;;  %s4062_s8 = smov (!%p248_p2), 8   ;;  %v3979_v52 = vld [vmem:[%s5709_s2 + $0x8] sm:$0xff] (!%p248_p2)   ;;  %3765 = vmatprep.subr.bf16.mxu0 (!%p248_p2), %v3978_v48  ;;  %3883 = vmatprep.subr.bf16.mxu1 (!%p248_p2), %v3978_v48  ;;  %v3980_v55 = vld [vmem:[%s5709_s2 + $0x10] sm:$0xff] (!%p248_p2)  }
   0x7   : > { %336 = vst.msk [vmem:[#allocation2 + $0x10] sm:$0x3] (!%p248_p2), %vm335_vm1, %v4060_v0  ;;  %339 = vst.msk [vmem:[#allocation2 + $0x28] sm:$0x3] (!%p248_p2), %vm335_vm1, %v4060_v0  ;;  %s4063_s9 = smov (!%p248_p2), 24   ;;  %s4064_s10 = smov (!%p248_p2), 32   ;;  %3766 = vmatpush3.bf16.msra.mxu0 (!%p248_p2), %v3978_v48  ;;  %3888 = vmatpush3.bf16.msra.mxu1 (!%p248_p2), %v3978_v48 }
   0x8   : > { %337 = vst.msk [vmem:[#allocation2 + $0x18] sm:$0xff] (!%p248_p2), %vm332_vm0, %v4060_v0  ;;  %338 = vst.msk [vmem:[#allocation2 + $0x20] sm:$0xff] (!%p248_p2), %vm332_vm0, %v4060_v0  ;;  %s4065_s11 = smov (!%p248_p2), 40   ;;  %s4066_s17 = smov (!%p248_p2), 48   ;;  %3767 = vmatprep.subr.bf16.mxu0 (!%p248_p2), %v3979_v52  ;;  %3884 = vmatprep.subr.bf16.mxu1 (!%p248_p2), %v3979_v52  ;;  %v3981_v60 = vld [vmem:[%s5709_s2 + $0x18] sm:$0xff] (!%p248_p2)   ;;  %vm1712_vm2 = vcmask (!%p248_p2), 1043456  }
   0x9   : > { %340 = vst.msk [vmem:[#allocation2 + $0x30] sm:$0xff] (!%p248_p2), %vm332_vm0, %v4060_v0  ;;  %341 = vst.msk [vmem:[#allocation2 + $0x38] sm:$0xff] (!%p248_p2), %vm332_vm0, %v4060_v0  ;;  %s4067_s22 = smov (!%p248_p2), 56   ;;  %s4068_s27 = smov (!%p248_p2), 64   ;;  %v3982_v62 = vld [vmem:[%s5709_s2 + $0x20] ss:$0 sps:$4 sm:$0xff] (!%p248_p2)  }
   0xa   : > { %342 = vst.msk [vmem:[#allocation2 + $0x40] sm:$0x3] (!%p248_p2), %vm335_vm1, %v4060_v0  ;;  %345 = vst.msk [vmem:[#allocation2 + $0x58] sm:$0x3] (!%p248_p2), %vm335_vm1, %v4060_v0  ;;  %vm1405_vm3 = vcmask (!%p248_p2), 130048   ;;  %vm1438_vm4 = vcmask (!%p248_p2), 195584  }
   0xb   : > { %343 = vst.msk [vmem:[#allocation2 + $0x48] sm:$0xff] (!%p248_p2), %vm332_vm0, %v4060_v0  ;;  %344 = vst.msk [vmem:[#allocation2 + $0x50] sm:$0xff] (!%p248_p2), %vm332_vm0, %v4060_v0  ;;  %3768 = vmatpush3.bf16.msra.mxu0 (!%p248_p2), %v3979_v52  ;;  %3889 = vmatpush3.bf16.msra.mxu1 (!%p248_p2), %v3979_v52  ;;  %vm1471_vm5 = vcmask (!%p248_p2), 261120   ;;  %vm1504_vm6 = vcmask (!%p248_p2), 326656   ;;  %vm1537_vm7 = vcmask (!%p248_p2), 392192   ;;  %vm1570_vm8 = vcmask (!%p248_p2), 457728  }
   0xc   : > { %346 = vst.msk [vmem:[#allocation2 + $0x60] sm:$0xff] (!%p248_p2), %vm332_vm0, %v4060_v0  ;;  %347 = vst.msk [vmem:[#allocation2 + $0x68] sm:$0xff] (!%p248_p2), %vm332_vm0, %v4060_v0  ;;  %3769 = vmatprep.subr.bf16.mxu0 (!%p248_p2), %v3980_v55  ;;  %3885 = vmatprep.subr.bf16.mxu1 (!%p248_p2), %v3980_v55  ;;  %vm1603_vm9 = vcmask (!%p248_p2), 523264   ;;  %vm1679_vm10 = vcmask (!%p248_p2), 588800   ;;  %vm3530_vm11 = vcmask (!%p248_p2), 23552  }
   0xd   : > { %348 = vst.msk [vmem:[#allocation2 + $0x70] sm:$0x3] %vm335_vm1, %v4060_v0  ;;  %351 = vst.msk [vmem:[#allocation2 + $0x88] sm:$0x3] %vm335_vm1, %v4060_v0  ;;  %s5716_s25 = smov (!%p284_p3, %s3630_s25), 1  ;;  %v636_v4 = vld [vmem:[#allocation2 + $0x2] sm:$0xff] }
   0xe   : > { %349 = vst.msk [vmem:[#allocation2 + $0x78] sm:$0xff] %vm332_vm0, %v4060_v0  ;;  %350 = vst.msk [vmem:[#allocation2 + $0x80] sm:$0xff] %vm332_vm0, %v4060_v0  ;;  %s4337_s26 = sshll.u32 %s5716_s25, 8  ;;  %v637_v5 = vld [vmem:[#allocation2 + $0xa] sm:$0xff]  ;;  %v588_v6 = vld [vmem:[#allocation2 + $0x1] sm:$0xff] }
   0xf   : > { %352 = vst.msk [vmem:[#allocation2 + $0x90] sm:$0xff] %vm332_vm0, %v4060_v0  ;;  %353 = vst.msk [vmem:[#allocation2 + $0x98] sm:$0xff] %vm332_vm0, %v4060_v0  ;;  %s4343_s29 = scalar_lea.vmem %s5707_s0, %s4337_s26  ;;  %v668_v7 = vpack.c.bf16 %v637_v5, %v636_v4  ;;  %v589_v8 = vld [vmem:[#allocation2 + $0x9] sm:$0xff]  ;;  %s4405_s14 = scalar_lea.vmem %s5708_s1, %s4337_s26  ;;  %3770 = vmatpush3.bf16.msra.mxu0 %v3980_v55  ;;  %3890 = vmatpush3.bf16.msra.mxu1 %v3980_v55 }
  0x10   : > { %354 = vst.msk [vmem:[#allocation2 + $0xa0] sm:$0x3] %vm335_vm1, %v4060_v0  ;;  %357 = vst.msk [vmem:[#allocation2 + $0xb8] sm:$0x3] %vm335_vm1, %v4060_v0  ;;  %v300_v1 = vld [vmem:[%s4343_s29] sm:$0xff]  ;;  %v301_v2 = vld [vmem:[%s4343_s29 + $0x8] sm:$0xff]  ;;  %v620_v11 = vpack.c.bf16 %v589_v8, %v588_v6  ;;  %3771 = vmatprep.subr.bf16.mxu0 %v3981_v60  ;;  %3886 = vmatprep.subr.bf16.mxu1 %v3981_v60 }
  0x11   : > { %355 = vst.msk [vmem:[#allocation2 + $0xa8] sm:$0xff] %vm332_vm0, %v4060_v0  ;;  %356 = vst.msk [vmem:[#allocation2 + $0xb0] sm:$0xff] %vm332_vm0, %v4060_v0  ;;  %v302_v3 = vld [vmem:[%s4343_s29 + $0x10] sm:$0xff]  ;;  %v303_v9 = vld [vmem:[%s4343_s29 + $0x18] sm:$0xff]  ;;  %1037 = vrot.lane.b32.xlu1 %v668_v7, %s4061_s30 }
  0x12   : > { %358 = vst.msk [vmem:[#allocation2 + $0xc0] sm:$0xff] %vm332_vm0, %v4060_v0  ;;  %359 = vst.msk [vmem:[#allocation2 + $0xc8] sm:$0xff] %vm332_vm0, %v4060_v0  ;;  %v304_v10 = vld [vmem:[%s4343_s29 + $0x20] sm:$0xff]  ;;  %v305_v12 = vld [vmem:[%s4343_s29 + $0x28] sm:$0xff]  ;;  %989 = vrot.lane.b32.xlu0 %v620_v11, %s4062_s8 }
  0x13   : > { %360 = vst.msk [vmem:[#allocation2 + $0xd0] sm:$0x3] %vm335_vm1, %v4060_v0  ;;  %363 = vst.msk [vmem:[#allocation2 + $0xe8] sm:$0x3] %vm335_vm1, %v4060_v0  ;;  %v306_v13 = vld [vmem:[%s4343_s29 + $0x30] sm:$0xff]  ;;  %v307_v14 = vld [vmem:[%s4343_s29 + $0x38] sm:$0xff]  ;;  %3772 = vmatpush3.bf16.msra.mxu0 %v3981_v60  ;;  %3891 = vmatpush3.bf16.msra.mxu1 %v3981_v60 }
  0x14   : > { %361 = vst.msk [vmem:[#allocation2 + $0xd8] sm:$0xff] %vm332_vm0, %v4060_v0  ;;  %362 = vst.msk [vmem:[#allocation2 + $0xe0] sm:$0xff] %vm332_vm0, %v4060_v0  ;;  %v308_v15 = vld [vmem:[%s4343_s29 + $0x40] sm:$0xff]  ;;  %v309_v16 = vld [vmem:[%s4343_s29 + $0x48] sm:$0xff]  ;;  %3957 = vmatprep.subr.msk.bf16.mxu0 %vm1712_vm2, %v3982_v62  ;;  %3958 = vmatprep.subr.msk.bf16.mxu1 %vm1712_vm2, %v3982_v62 }
  0x15   : > { %364 = vst.msk [vmem:[#allocation2 + $0xf0] sm:$0xff] %vm332_vm0, %v4060_v0  ;;  %365 = vst.msk [vmem:[#allocation2 + $0xf8] sm:$0xff] %vm332_vm0, %v4060_v0  ;;  %v310_v17 = vld [vmem:[%s4343_s29 + $0x50] sm:$0xff]  ;;  %v311_v18 = vld [vmem:[%s4343_s29 + $0x58] sm:$0xff] }
  0x16   : > { %366 = vst.msk [vmem:[#allocation2 + $0x100] sm:$0x3] %vm335_vm1, %v4060_v0  ;;  %369 = vst.msk [vmem:[#allocation2 + $0x118] sm:$0x3] %vm335_vm1, %v4060_v0  ;;  %v312_v19 = vld [vmem:[%s4343_s29 + $0x60] sm:$0xff]  ;;  %v313_v20 = vld [vmem:[%s4343_s29 + $0x68] sm:$0xff] }
  0x17   : > { %367 = vst.msk [vmem:[#allocation2 + $0x108] sm:$0xff] %vm332_vm0, %v4060_v0  ;;  %368 = vst.msk [vmem:[#allocation2 + $0x110] sm:$0xff] %vm332_vm0, %v4060_v0  ;;  %v314_v21 = vld [vmem:[%s4343_s29 + $0x70] sm:$0xff]  ;;  %v315_v22 = vld [vmem:[%s4343_s29 + $0x78] sm:$0xff] }
  0x18   : > { %370 = vst.msk [vmem:[#allocation2 + $0x120] sm:$0xff] %vm332_vm0, %v4060_v0  ;;  %371 = vst.msk [vmem:[#allocation2 + $0x128] sm:$0xff] %vm332_vm0, %v4060_v0  ;;  %v316_v23 = vld [vmem:[%s4343_s29 + $0x80] sm:$0xff]  ;;  %v317_v24 = vld [vmem:[%s4343_s29 + $0x88] sm:$0xff] }
  0x19   : > { %372 = vst.msk [vmem:[#allocation2 + $0x130] sm:$0x3] %vm335_vm1, %v4060_v0  ;;  %375 = vst.msk [vmem:[#allocation2 + $0x148] sm:$0x3] %vm335_vm1, %v4060_v0  ;;  %v421_v49 = vld [vmem:[%s4405_s14] sm:$0xff]  ;;  %v422_v50 = vld [vmem:[%s4405_s14 + $0x8] sm:$0xff] }
  0x1a   : > { %373 = vst.msk [vmem:[#allocation2 + $0x138] sm:$0xff] %vm332_vm0, %v4060_v0  ;;  %374 = vst.msk [vmem:[#allocation2 + $0x140] sm:$0xff] %vm332_vm0, %v4060_v0  ;;  %v423_v53 = vld [vmem:[%s4405_s14 + $0x10] sm:$0xff]  ;;  %v424_v54 = vld [vmem:[%s4405_s14 + $0x18] sm:$0xff] }
  0x1b   : > { %376 = vst.msk [vmem:[#allocation2 + $0x150] sm:$0xff] %vm332_vm0, %v4060_v0  ;;  %377 = vst.msk [vmem:[#allocation2 + $0x158] sm:$0xff] %vm332_vm0, %v4060_v0  ;;  %v425_v56 = vld [vmem:[%s4405_s14 + $0x20] sm:$0xff]  ;;  %v426_v57 = vld [vmem:[%s4405_s14 + $0x28] sm:$0xff] }
  0x1c   : > { %378 = vst.msk [vmem:[#allocation2 + $0x160] sm:$0x3] %vm335_vm1, %v4060_v0  ;;  %381 = vst.msk [vmem:[#allocation2 + $0x178] sm:$0x3] %vm335_vm1, %v4060_v0  ;;  %v430_v11 = vld [vmem:[%s4405_s14 + $0x48] sm:$0xff]  ;;  %v436_v48 = vld [vmem:[%s4405_s14 + $0x78] sm:$0xff] }
  0x1d   : > { %379 = vst.msk [vmem:[#allocation2 + $0x168] sm:$0xff] %vm332_vm0, %v4060_v0  ;;  %380 = vst.msk [vmem:[#allocation2 + $0x170] sm:$0xff] %vm332_vm0, %v4060_v0  ;;  %v437_v60 = vld [vmem:[%s4405_s14 + $0x80] sm:$0xff] }
  0x1e   : > { %382 = vst.msk [vmem:[#allocation2 + $0x180] sm:$0xff] %vm332_vm0, %v4060_v0  ;;  %383 = vst.msk [vmem:[#allocation2 + $0x188] sm:$0xff] %vm332_vm0, %v4060_v0 }
  0x1f   : > { %384 = vst.msk [vmem:[#allocation2 + $0x190] sm:$0x3] %vm335_vm1, %v4060_v0  ;;  %387 = vst.msk [vmem:[#allocation2 + $0x1a8] sm:$0x3] %vm335_vm1, %v4060_v0 }
  0x20   : > { %385 = vst.msk [vmem:[#allocation2 + $0x198] sm:$0xff] %vm332_vm0, %v4060_v0  ;;  %386 = vst.msk [vmem:[#allocation2 + $0x1a0] sm:$0xff] %vm332_vm0, %v4060_v0 }
  0x21   : > { %453 = vst.msk [vmem:[#allocation3] sm:$0xff] %vm332_vm0, %v4060_v0  ;;  %454 = vst.msk [vmem:[#allocation3 + $0x8] sm:$0xff] %vm332_vm0, %v4060_v0 }
  0x22   : > { %455 = vst.msk [vmem:[#allocation3 + $0x10] sm:$0x3] %vm335_vm1, %v4060_v0  ;;  %458 = vst.msk [vmem:[#allocation3 + $0x28] sm:$0x3] %vm335_vm1, %v4060_v0 }
  0x23   : > { %456 = vst.msk [vmem:[#allocation3 + $0x18] sm:$0xff] %vm332_vm0, %v4060_v0  ;;  %457 = vst.msk [vmem:[#allocation3 + $0x20] sm:$0xff] %vm332_vm0, %v4060_v0 }
  0x24   : > { %459 = vst.msk [vmem:[#allocation3 + $0x30] sm:$0xff] %vm332_vm0, %v4060_v0  ;;  %460 = vst.msk [vmem:[#allocation3 + $0x38] sm:$0xff] %vm332_vm0, %v4060_v0 }
  0x25   : > { %461 = vst.msk [vmem:[#allocation3 + $0x40] sm:$0x3] %vm335_vm1, %v4060_v0  ;;  %464 = vst.msk [vmem:[#allocation3 + $0x58] sm:$0x3] %vm335_vm1, %v4060_v0 }
  0x26   : > { %462 = vst.msk [vmem:[#allocation3 + $0x48] sm:$0xff] %vm332_vm0, %v4060_v0  ;;  %463 = vst.msk [vmem:[#allocation3 + $0x50] sm:$0xff] %vm332_vm0, %v4060_v0 }
  0x27   : > { %465 = vst.msk [vmem:[#allocation3 + $0x60] sm:$0xff] %vm332_vm0, %v4060_v0  ;;  %466 = vst.msk [vmem:[#allocation3 + $0x68] sm:$0xff] %vm332_vm0, %v4060_v0 }
  0x28   : > { %467 = vst.msk [vmem:[#allocation3 + $0x70] sm:$0x3] %vm335_vm1, %v4060_v0  ;;  %470 = vst.msk [vmem:[#allocation3 + $0x88] sm:$0x3] %vm335_vm1, %v4060_v0 }
  0x29   : > { %468 = vst.msk [vmem:[#allocation3 + $0x78] sm:$0xff] %vm332_vm0, %v4060_v0  ;;  %469 = vst.msk [vmem:[#allocation3 + $0x80] sm:$0xff] %vm332_vm0, %v4060_v0 }
  0x2a   : > { %471 = vst.msk [vmem:[#allocation3 + $0x90] sm:$0xff] %vm332_vm0, %v4060_v0  ;;  %472 = vst.msk [vmem:[#allocation3 + $0x98] sm:$0xff] %vm332_vm0, %v4060_v0 }
  0x2b   : > { %473 = vst.msk [vmem:[#allocation3 + $0xa0] sm:$0x3] %vm335_vm1, %v4060_v0  ;;  %476 = vst.msk [vmem:[#allocation3 + $0xb8] sm:$0x3] %vm335_vm1, %v4060_v0 }
  0x2c   : > { %474 = vst.msk [vmem:[#allocation3 + $0xa8] sm:$0xff] %vm332_vm0, %v4060_v0  ;;  %475 = vst.msk [vmem:[#allocation3 + $0xb0] sm:$0xff] %vm332_vm0, %v4060_v0 }
  0x2d   : > { %477 = vst.msk [vmem:[#allocation3 + $0xc0] sm:$0xff] %vm332_vm0, %v4060_v0  ;;  %478 = vst.msk [vmem:[#allocation3 + $0xc8] sm:$0xff] %vm332_vm0, %v4060_v0 }
  0x2e   : > { %479 = vst.msk [vmem:[#allocation3 + $0xd0] sm:$0x3] %vm335_vm1, %v4060_v0  ;;  %482 = vst.msk [vmem:[#allocation3 + $0xe8] sm:$0x3] %vm335_vm1, %v4060_v0 }
  0x2f   : > { %480 = vst.msk [vmem:[#allocation3 + $0xd8] sm:$0xff] %vm332_vm0, %v4060_v0  ;;  %481 = vst.msk [vmem:[#allocation3 + $0xe0] sm:$0xff] %vm332_vm0, %v4060_v0 }
  0x30   : > { %483 = vst.msk [vmem:[#allocation3 + $0xf0] sm:$0xff] %vm332_vm0, %v4060_v0  ;;  %484 = vst.msk [vmem:[#allocation3 + $0xf8] sm:$0xff] %vm332_vm0, %v4060_v0 }
  0x31   : > { %485 = vst.msk [vmem:[#allocation3 + $0x100] sm:$0x3] %vm335_vm1, %v4060_v0  ;;  %488 = vst.msk [vmem:[#allocation3 + $0x118] sm:$0x3] %vm335_vm1, %v4060_v0 }
  0x32   : > { %486 = vst.msk [vmem:[#allocation3 + $0x108] sm:$0xff] %vm332_vm0, %v4060_v0  ;;  %487 = vst.msk [vmem:[#allocation3 + $0x110] sm:$0xff] %vm332_vm0, %v4060_v0 }
  0x33   : > { %489 = vst.msk [vmem:[#allocation3 + $0x120] sm:$0xff] %vm332_vm0, %v4060_v0  ;;  %490 = vst.msk [vmem:[#allocation3 + $0x128] sm:$0xff] %vm332_vm0, %v4060_v0 }
  0x34   : > { %491 = vst.msk [vmem:[#allocation3 + $0x130] sm:$0x3] %vm335_vm1, %v4060_v0  ;;  %494 = vst.msk [vmem:[#allocation3 + $0x148] sm:$0x3] %vm335_vm1, %v4060_v0 }
  0x35   : > { %492 = vst.msk [vmem:[#allocation3 + $0x138] sm:$0xff] %vm332_vm0, %v4060_v0  ;;  %493 = vst.msk [vmem:[#allocation3 + $0x140] sm:$0xff] %vm332_vm0, %v4060_v0 }
  0x36   : > { %495 = vst.msk [vmem:[#allocation3 + $0x150] sm:$0xff] %vm332_vm0, %v4060_v0  ;;  %496 = vst.msk [vmem:[#allocation3 + $0x158] sm:$0xff] %vm332_vm0, %v4060_v0 }
  0x37   : > { %497 = vst.msk [vmem:[#allocation3 + $0x160] sm:$0x3] %vm335_vm1, %v4060_v0  ;;  %500 = vst.msk [vmem:[#allocation3 + $0x178] sm:$0x3] %vm335_vm1, %v4060_v0 }
  0x38   : > { %498 = vst.msk [vmem:[#allocation3 + $0x168] sm:$0xff] %vm332_vm0, %v4060_v0  ;;  %499 = vst.msk [vmem:[#allocation3 + $0x170] sm:$0xff] %vm332_vm0, %v4060_v0 }
  0x39   : > { %501 = vst.msk [vmem:[#allocation3 + $0x180] sm:$0xff] %vm332_vm0, %v4060_v0  ;;  %502 = vst.msk [vmem:[#allocation3 + $0x188] sm:$0xff] %vm332_vm0, %v4060_v0 }
  0x3a   : > { %503 = vst.msk [vmem:[#allocation3 + $0x190] sm:$0x3] %vm335_vm1, %v4060_v0  ;;  %506 = vst.msk [vmem:[#allocation3 + $0x1a8] sm:$0x3] %vm335_vm1, %v4060_v0 }
  0x3b   : > { %504 = vst.msk [vmem:[#allocation3 + $0x198] sm:$0xff] %vm332_vm0, %v4060_v0  ;;  %505 = vst.msk [vmem:[#allocation3 + $0x1a0] sm:$0xff] %vm332_vm0, %v4060_v0 }
  0x3c   : > { %389 = vst.msk [vmem:[#allocation2 + $0x19] sm:$0xff] %vm332_vm0, %v300_v1  ;;  %390 = vst.msk [vmem:[#allocation2 + $0x21] sm:$0xff] %vm332_vm0, %v301_v2  ;;  %v427_v1 = vld [vmem:[%s4405_s14 + $0x30] sm:$0xff]  ;;  %v428_v2 = vld [vmem:[%s4405_s14 + $0x38] sm:$0xff] }
  0x3d   : > { %391 = vst.msk [vmem:[#allocation2 + $0x31] sm:$0xff] %vm332_vm0, %v302_v3  ;;  %392 = vst.msk [vmem:[#allocation2 + $0x39] sm:$0xff] %vm332_vm0, %v303_v9  ;;  %v1714_v3 = vsel %vm1712_vm2, %v3982_v62, 0 }
  0x3e   : > { %393 = vst.msk [vmem:[#allocation2 + $0x49] sm:$0xff] %vm332_vm0, %v304_v10  ;;  %394 = vst.msk [vmem:[#allocation2 + $0x51] sm:$0xff] %vm332_vm0, %v305_v12  ;;  %3774 = vmatpush3.bf16.msra.mxu0 %v1714_v3  ;;  %3892 = vmatpush3.bf16.msra.mxu1 %v1714_v3  ;;  %v429_v10 = vld [vmem:[%s4405_s14 + $0x40] sm:$0xff] }
  0x3f   : > { %395 = vst.msk [vmem:[#allocation2 + $0x61] sm:$0xff] %vm332_vm0, %v306_v13  ;;  %396 = vst.msk [vmem:[#allocation2 + $0x69] sm:$0xff] %vm332_vm0, %v307_v14 }
  0x40   : > { %397 = vst.msk [vmem:[#allocation2 + $0x79] sm:$0xff] %vm332_vm0, %v308_v15  ;;  %398 = vst.msk [vmem:[#allocation2 + $0x81] sm:$0xff] %vm332_vm0, %v309_v16 }
  0x41   : > { %399 = vst.msk [vmem:[#allocation2 + $0x91] sm:$0xff] %vm332_vm0, %v310_v17  ;;  %400 = vst.msk [vmem:[#allocation2 + $0x99] sm:$0xff] %vm332_vm0, %v311_v18 }
  0x42   : > { %401 = vst.msk [vmem:[#allocation2 + $0xa9] sm:$0xff] %vm332_vm0, %v312_v19  ;;  %402 = vst.msk [vmem:[#allocation2 + $0xb1] sm:$0xff] %vm332_vm0, %v313_v20 }
  0x43   : > { %403 = vst.msk [vmem:[#allocation2 + $0xc1] sm:$0xff] %vm332_vm0, %v314_v21  ;;  %404 = vst.msk [vmem:[#allocation2 + $0xc9] sm:$0xff] %vm332_vm0, %v315_v22  ;;  %v638_v25 = vld [vmem:[#allocation2 + $0x1a] sm:$0xff]  ;;  %v639_v26 = vld [vmem:[#allocation2 + $0x22] sm:$0xff] }
  0x44   : > { %v590_v27 = vld [vmem:[#allocation2 + $0x19] sm:$0xff]  ;;  %405 = vst.msk [vmem:[#allocation2 + $0xd9] sm:$0xff] %vm332_vm0, %v316_v23  ;;  %406 = vst.msk [vmem:[#allocation2 + $0xe1] sm:$0xff] %vm332_vm0, %v317_v24  ;;  %v669_v28 = vpack.c.bf16 %v639_v26, %v638_v25  ;;  %v591_v29 = vld [vmem:[#allocation2 + $0x21] sm:$0xff] }
  0x45   : > { %v686_v30 = vld [vmem:[#allocation2 + $0x30] sm:$0xff]  ;;  %v684_v31 = vld [vmem:[#allocation2 + $0x18] sm:$0xff]  ;;  %v621_v32 = vpack.c.bf16 %v591_v29, %v590_v27  ;;  %v685_v34 = vld [vmem:[#allocation2 + $0x20] sm:$0xff]  ;;  %508 = vst.msk [vmem:[#allocation3 + $0x19] sm:$0xff] %vm332_vm0, %v421_v49 }
  0x46   : > { %v687_v33 = vld [vmem:[#allocation2 + $0x38] sm:$0xff]  ;;  %1039 = vrot.lane.b32.xlu1 %v669_v28, %s4061_s30  ;;  %v4387_v36 = vpack.c.bf16 %v685_v34, %v684_v31  ;;  %v831_v43 = vld [vmem:[#allocation2 + $0x48] sm:$0xff]  ;;  %v832_v44 = vld [vmem:[#allocation2 + $0x50] sm:$0xff]  ;;  %509 = vst.msk [vmem:[#allocation3 + $0x21] sm:$0xff] %vm332_vm0, %v422_v50 }
  0x47   : > { %v4384_v35 = vpack.c.bf16 %v687_v33, %v686_v30  ;;  %991 = vrot.lane.b32.xlu0 %v621_v32, %s4062_s8  ;;  %v734_v37 = vld [vmem:[#allocation2 + $0x31] sm:$0xff]  ;;  %v735_v38 = vld [vmem:[#allocation2 + $0x39] sm:$0xff]  ;;  %v4399_v45 = vpack.c.bf16 %v832_v44, %v831_v43  ;;  %v879_v46 = vld [vmem:[#allocation2 + $0x49] sm:$0xff]  ;;  %510 = vst.msk [vmem:[#allocation3 + $0x31] sm:$0xff] %vm332_vm0, %v423_v53 }
  0x48   : > { %v765_v39 = vpack.c.bf16 %v735_v38, %v734_v37  ;;  %v782_v40 = vld [vmem:[#allocation2 + $0x32] sm:$0xff]  ;;  %v783_v41 = vld [vmem:[#allocation2 + $0x3a] sm:$0xff]  ;;  %511 = vst.msk [vmem:[#allocation3 + $0x39] sm:$0xff] %vm332_vm0, %v424_v54  ;;  %512 = vst.msk [vmem:[#allocation3 + $0x49] sm:$0xff] %vm332_vm0, %v425_v56 }
  0x49   : > { %v4394_v42 = vpack.c.bf16 %v783_v41, %v782_v40  ;;  %v880_v47 = vld [vmem:[#allocation2 + $0x51] sm:$0xff]  ;;  %513 = vst.msk [vmem:[#allocation3 + $0x51] sm:$0xff] %vm332_vm0, %v426_v57  ;;  %v690_v63 = vld [vmem:[#allocation2 + $0x60] sm:$0xff]  ;;  %v691_v0 = vld [vmem:[#allocation2 + $0x68] sm:$0xff] }
  0x4a   : > { %1087 = vrot.lane.b32.xlu1 %v4384_v35, %s4063_s9  ;;  %v4415_v51 = vpack.c.bf16 %v880_v47, %v879_v46  ;;  %v927_v58 = vld [vmem:[#allocation2 + $0x4a] sm:$0xff]  ;;  %v928_v59 = vld [vmem:[#allocation2 + $0x52] sm:$0xff]  ;;  %514 = vst.msk [vmem:[#allocation3 + $0x61] sm:$0xff] %vm332_vm0, %v427_v1  ;;  %515 = vst.msk [vmem:[#allocation3 + $0x69] sm:$0xff] %vm332_vm0, %v428_v2  ;;  %v4457_v4 = vpack.c.bf16 %v691_v0, %v690_v63 }
  0x4b   : > { %1085 = vrot.lane.b32.xlu0 %v4387_v36, %s4063_s9  ;;  %v958_v61 = vpack.c.bf16 %v928_v59, %v927_v58  ;;  %v738_v5 = vld [vmem:[#allocation2 + $0x61] sm:$0xff]  ;;  %v739_v6 = vld [vmem:[#allocation2 + $0x69] sm:$0xff]  ;;  %516 = vst.msk [vmem:[#allocation3 + $0x79] sm:$0xff] %vm332_vm0, %v429_v10  ;;  %517 = vst.msk [vmem:[#allocation3 + $0x81] sm:$0xff] %vm332_vm0, %v430_v11 }
  0x4c   : > { %v767_v7 = vpack.c.bf16 %v739_v6, %v738_v5  ;;  %v786_v8 = vld [vmem:[#allocation2 + $0x62] sm:$0xff]  ;;  %v787_v9 = vld [vmem:[#allocation2 + $0x6a] sm:$0xff]  ;;  %v835_v13 = vld [vmem:[#allocation2 + $0x78] sm:$0xff]  ;;  %523 = vst.msk [vmem:[#allocation3 + $0xc9] sm:$0xff] %vm332_vm0, %v436_v48 }
  0x4d   : > { %v815_v12 = vpack.c.bf16 %v787_v9, %v786_v8  ;;  %v836_v14 = vld [vmem:[#allocation2 + $0x80] sm:$0xff]  ;;  %v431_v22 = vld [vmem:[%s4405_s14 + $0x50] sm:$0xff]  ;;  %v432_v23 = vld [vmem:[%s4405_s14 + $0x58] sm:$0xff]  ;;  %524 = vst.msk [vmem:[#allocation3 + $0xd9] sm:$0xff] %vm332_vm0, %v437_v60 }
  0x4e   : > { %1135 = vrot.lane.b32.xlu1 %v765_v39, %s4064_s10  ;;  %v4474_v15 = vpack.c.bf16 %v836_v14, %v835_v13  ;;  %v883_v16 = vld [vmem:[#allocation2 + $0x79] sm:$0xff]  ;;  %v884_v17 = vld [vmem:[#allocation2 + $0x81] sm:$0xff]  ;;  %518 = vst.msk [vmem:[#allocation3 + $0x91] sm:$0xff] %vm332_vm0, %v431_v22  ;;  %519 = vst.msk [vmem:[#allocation3 + $0x99] sm:$0xff] %vm332_vm0, %v432_v23 }
  0x4f   : > { %1133 = vrot.lane.b32.xlu0 %v621_v32, %s4064_s10  ;;  %v912_v18 = vpack.c.bf16 %v884_v17, %v883_v16  ;;  %v931_v19 = vld [vmem:[#allocation2 + $0x7a] sm:$0xff]  ;;  %v932_v20 = vld [vmem:[#allocation2 + $0x82] sm:$0xff]  ;;  %v694_v24 = vld [vmem:[#allocation2 + $0x90] sm:$0xff] }
  0x50   : > { %v960_v21 = vpack.c.bf16 %v932_v20, %v931_v19  ;;  %v695_v25 = vld [vmem:[#allocation2 + $0x98] sm:$0xff]  ;;  %v433_v32 = vld [vmem:[%s4405_s14 + $0x60] sm:$0xff]  ;;  %v434_v33 = vld [vmem:[%s4405_s14 + $0x68] sm:$0xff] }
  0x51   : > { %v4492_v26 = vpack.c.bf16 %v695_v25, %v694_v24  ;;  %v742_v27 = vld [vmem:[#allocation2 + $0x91] sm:$0xff]  ;;  %v791_v31 = vld [vmem:[#allocation2 + $0x9a] sm:$0xff]  ;;  %520 = vst.msk [vmem:[#allocation3 + $0xa9] sm:$0xff] %vm332_vm0, %v433_v32  ;;  %521 = vst.msk [vmem:[#allocation3 + $0xb1] sm:$0xff] %vm332_vm0, %v434_v33 }
  0x52   : > { %1183 = vrot.lane.b32.xlu1 %v4394_v42, %s4065_s11  ;;  %v790_v30 = vld [vmem:[#allocation2 + $0x92] sm:$0xff]  ;;  %v839_v37 = vld [vmem:[#allocation2 + $0xa8] sm:$0xff]  ;;  %v698_v49 = vld [vmem:[#allocation2 + $0xc0] sm:$0xff] }
  0x53   : > { %1181 = vrot.lane.b32.xlu0 %v669_v28, %s4065_s11  ;;  %v743_v28 = vld [vmem:[#allocation2 + $0x99] sm:$0xff]  ;;  %v817_v34 = vpack.c.bf16 %v791_v31, %v790_v30  ;;  %v840_v38 = vld [vmem:[#allocation2 + $0xb0] sm:$0xff]  ;;  %v699_v50 = vld [vmem:[#allocation2 + $0xc8] sm:$0xff] }
  0x54   : > { %v769_v29 = vpack.c.bf16 %v743_v28, %v742_v27  ;;  %v887_v40 = vld [vmem:[#allocation2 + $0xa9] sm:$0xff]  ;;  %v888_v41 = vld [vmem:[#allocation2 + $0xb1] sm:$0xff]  ;;  %v746_v52 = vld [vmem:[#allocation2 + $0xc1] sm:$0xff] }
  0x55   : > { %v935_v43 = vld [vmem:[#allocation2 + $0xaa] sm:$0xff]  ;;  %v936_v44 = vld [vmem:[#allocation2 + $0xb2] sm:$0xff]  ;;  %v794_v55 = vld [vmem:[#allocation2 + $0xc2] sm:$0xff] }
  0x56   : > { %1231 = vrot.lane.b32.xlu1 %v4399_v45, %s4066_s17  ;;  %v962_v46 = vpack.c.bf16 %v936_v44, %v935_v43  ;;  %v435_v47 = vld [vmem:[%s4405_s14 + $0x70] sm:$0xff]  ;;  %v843_v58 = vld [vmem:[#allocation2 + $0xd8] sm:$0xff]  ;;  %v844_v59 = vld [vmem:[#allocation2 + $0xe0] sm:$0xff] }
  0x57   : > { %1229 = vrot.lane.b32.xlu0 %v4384_v35, %s4066_s17  ;;  %522 = vst.msk [vmem:[#allocation3 + $0xc1] sm:$0xff] %vm332_vm0, %v435_v47  ;;  %v747_v53 = vld [vmem:[#allocation2 + $0xc9] sm:$0xff]  ;;  %v868_v63 = vpack.c.bf16 %v844_v59, %v843_v58  ;;  %v891_v1 = vld [vmem:[#allocation2 + $0xd9] sm:$0xff]  ;;  %v892_v2 = vld [vmem:[#allocation2 + $0xe1] sm:$0xff] }
  0x58   : > { %v771_v54 = vpack.c.bf16 %v747_v53, %v746_v52  ;;  %v795_v56 = vld [vmem:[#allocation2 + $0xca] sm:$0xff]  ;;  %v4539_v3 = vpack.c.bf16 %v892_v2, %v891_v1  ;;  %v939_v5 = vld [vmem:[#allocation2 + $0xda] sm:$0xff]  ;;  %v940_v6 = vld [vmem:[#allocation2 + $0xe2] sm:$0xff] }
  0x59   : > { %v819_v57 = vpack.c.bf16 %v795_v56, %v794_v55  ;;  %v964_v9 = vpack.c.bf16 %v940_v6, %v939_v5  ;;  %v1927_v10 = vld [vmem:[#allocation3 + $0x19] sm:$0xff]  ;;  %v1928_v11 = vld [vmem:[#allocation3 + $0x21] sm:$0xff]  ;;  %v1926_v14 = vld [vmem:[#allocation3 + $0x9] sm:$0xff] }
  0x5a   : > { %1279 = vrot.lane.b32.xlu1 %v4415_v51, %s4067_s22  ;;  %v1925_v13 = vld [vmem:[#allocation3 + $0x1] sm:$0xff]  ;;  %v1958_v17 = vpack.c.bf16 %v1928_v11, %v1927_v10  ;;  %v1974_v23 = vld [vmem:[#allocation3 + $0xa] sm:$0xff]  ;;  %v541_v27 = vld [vmem:[#allocation2 + $0x8] sm:$0xff] }
  0x5b   : > { %1277 = vrot.lane.b32.xlu0 %v765_v39, %s4067_s22  ;;  %v1975_v19 = vld [vmem:[#allocation3 + $0x1a] sm:$0xff]  ;;  %v1976_v20 = vld [vmem:[#allocation3 + $0x22] sm:$0xff]  ;;  %v4556_v25 = vld [vmem:[%s5710_s3] sm:$0xff]  }
  0x5c   : > { %v1973_v22 = vld [vmem:[#allocation3 + $0x2] sm:$0xff]  ;;  %v540_v28 = vld [vmem:[#allocation2] sm:$0xff]  ;;  %v2024_v32 = vld [vmem:[#allocation3 + $0x38] sm:$0xff]  ;;  %3807 = vmatprep.subr.bf16.mxu0 %v4556_v25 }
  0x5d   : > { %v2005_v30 = vpack.c.bf16 %v1974_v23, %v1973_v22  ;;  %v2023_v31 = vld [vmem:[#allocation3 + $0x30] sm:$0xff]  ;;  %v319_v43 = vld [vmem:[%s4343_s29 + $0x98] sm:$0xff]  ;;  %v2072_v47 = vld [vmem:[#allocation3 + $0x39] sm:$0xff] }
  0x5e   : > { %993 = vrot.lane.b32.xlu1 %v765_v39, %s4062_s8  ;;  %v4506_v39 = vpack.c.bf16 %v840_v38, %v839_v37  ;;  %v2022_v37 = vld [vmem:[#allocation3 + $0x20] sm:$0xff]  ;;  %v572_v38 = vpack.c.bf16 %v541_v27, %v540_v28  ;;  %408 = vst.msk [vmem:[#allocation2 + $0xf9] sm:$0xff] %vm332_vm0, %v319_v43  ;;  %v2119_v52 = vld [vmem:[#allocation3 + $0x32] sm:$0xff]  ;;  %v2216_v11 = vld [vmem:[#allocation3 + $0x49] sm:$0xff] }
  0x5f   : > { %1325 = vrot.lane.b32.xlu0 %v4394_v42, %s4068_s27  ;;  %v2120_v53 = vld [vmem:[#allocation3 + $0x3a] sm:$0xff]  ;;  %v440_v23 = vld [vmem:[%s4405_s14 + $0x98] sm:$0xff] }
  0x60   : > { %v4586_v60 = vpack.c.bf16 %v2120_v53, %v2119_v52  ;;  %v439_v22 = vld [vmem:[%s4405_s14 + $0x90] sm:$0xff]  ;;  %527 = vst.msk [vmem:[#allocation3 + $0xf9] sm:$0xff] %vm332_vm0, %v440_v23  ;;  %v2264_v28 = vld [vmem:[#allocation3 + $0x4a] sm:$0xff] }
  0x61   : > { %v3985_v27 = vld [vmem:[%s5710_s3 + $0x10] sm:$0xff]   ;;  %526 = vst.msk [vmem:[#allocation3 + $0xf1] sm:$0xff] %vm332_vm0, %v439_v22  ;;  %v2028_v43 = vld [vmem:[#allocation3 + $0x68] sm:$0xff] }
  0x62   : > { %995 = vrot.lane.b32.xlu1 %v4415_v51, %s4062_s8 }
  0x63   : > { %1327 = vrot.lane.b32.xlu0 %v958_v61, %s4068_s27 }
  0x66   : > { %1043 = vrot.lane.b32.xlu1 %v958_v61, %s4061_s30 }
  0x67   : > { %1041 = vrot.lane.b32.xlu0 %v4394_v42, %s4061_s30  ;;  %v914_v42 = vpack.c.bf16 %v888_v41, %v887_v40  ;;  %v318_v41 = vld [vmem:[%s4343_s29 + $0x90] sm:$0xff] }
  0x68   : > { %407 = vst.msk [vmem:[#allocation2 + $0xf1] sm:$0xff] %vm332_vm0, %v318_v41  ;;  %v2027_v41 = vld [vmem:[#allocation3 + $0x60] sm:$0xff] }
  0x6a   : > { %1091 = vrot.lane.b32.xlu1 %v4457_v4, %s4063_s9 }
  0x6b   : > { %1089 = vrot.lane.b32.xlu0 %v4399_v45, %s4063_s9 }
  0x6e   : > { %1139 = vrot.lane.b32.xlu1 %v767_v7, %s4064_s10 }
  0x6f   : > { %1137 = vrot.lane.b32.xlu0 %v4415_v51, %s4064_s10  ;;  %v723_v51 = vpack.c.bf16 %v699_v50, %v698_v49 }
  0x72   : > { %1187 = vrot.lane.b32.xlu1 %v815_v12, %s4065_s11 }
  0x73   : > { %1185 = vrot.lane.b32.xlu0 %v958_v61, %s4065_s11  ;;  %v438_v61 = vld [vmem:[%s4405_s14 + $0x88] sm:$0xff] }
  0x74   : > { %525 = vst.msk [vmem:[#allocation3 + $0xe1] sm:$0xff] %vm332_vm0, %v438_v61 }
  0x76   : > { %1235 = vrot.lane.b32.xlu1 %v4474_v15, %s4066_s17 }
  0x77   : > { %1233 = vrot.lane.b32.xlu0 %v4457_v4, %s4066_s17 }
  0x7a   : > { %1283 = vrot.lane.b32.xlu1 %v912_v18, %s4067_s22 }
  0x7b   : > { %1281 = vrot.lane.b32.xlu0 %v767_v7, %s4067_s22 }
  0x7e   : > { %997 = vrot.lane.b32.xlu1 %v767_v7, %s4062_s8 }
  0x7f   : > { %1329 = vrot.lane.b32.xlu0 %v815_v12, %s4068_s27 }
  0x82   : > { %999 = vrot.lane.b32.xlu1 %v912_v18, %s4062_s8 }
  0x83   : > { %1331 = vrot.lane.b32.xlu0 %v960_v21, %s4068_s27  ;;  %v4534_v62 = vpop.permute.xlu1 %1037 }
  0x84   : > { %v990_v0 = vpop.permute.xlu0 %989 }
  0x85   : > { %v1359_v49 = vsel %vm332_vm0, %v572_v38, %v990_v0 }
  0x86   : > { %1047 = vrot.lane.b32.xlu1 %v960_v21, %s4061_s30 }
  0x87   : > { %1045 = vrot.lane.b32.xlu0 %v815_v12, %s4061_s30 }
  0x8a   : > { %1095 = vrot.lane.b32.xlu1 %v4492_v26, %s4063_s9 }
  0x8b   : > { %1093 = vrot.lane.b32.xlu0 %v4474_v15, %s4063_s9 }
  0x8e   : > { %1143 = vrot.lane.b32.xlu1 %v769_v29, %s4064_s10 }
  0x8f   : > { %1141 = vrot.lane.b32.xlu0 %v912_v18, %s4064_s10  ;;  %v1957_v18 = vpack.c.bf16 %v1926_v14, %v1925_v13 }
  0x92   : > { %1191 = vrot.lane.b32.xlu1 %v817_v34, %s4065_s11 }
  0x93   : > { %1189 = vrot.lane.b32.xlu0 %v960_v21, %s4065_s11 }
  0x96   : > { %1239 = vrot.lane.b32.xlu1 %v4506_v39, %s4066_s17 }
  0x97   : > { %1237 = vrot.lane.b32.xlu0 %v4492_v26, %s4066_s17 }
  0x9a   : > { %1287 = vrot.lane.b32.xlu1 %v914_v42, %s4067_s22 }
  0x9b   : > { %1285 = vrot.lane.b32.xlu0 %v769_v29, %s4067_s22 }
  0x9e   : > { %1001 = vrot.lane.b32.xlu1 %v769_v29, %s4062_s8  ;;  %v2006_v29 = vpack.c.bf16 %v1976_v20, %v1975_v19 }
  0x9f   : > { %1333 = vrot.lane.b32.xlu0 %v817_v34, %s4068_s27 }
  0xa2   : > { %1003 = vrot.lane.b32.xlu1 %v914_v42, %s4062_s8 }
  0xa3   : > { %1335 = vrot.lane.b32.xlu0 %v962_v46, %s4068_s27 }
  0xa6   : > { %1051 = vrot.lane.b32.xlu1 %v962_v46, %s4061_s30 }
  0xa7   : > { %1049 = vrot.lane.b32.xlu0 %v817_v34, %s4061_s30  ;;  %v2021_v34 = vld [vmem:[#allocation3 + $0x18] sm:$0xff] }
  0xa8   : > { %v4568_v44 = vpack.c.bf16 %v2022_v37, %v2021_v34 }
  0xaa   : > { %1099 = vrot.lane.b32.xlu1 %v723_v51, %s4063_s9 }
  0xab   : > { %1097 = vrot.lane.b32.xlu0 %v4506_v39, %s4063_s9 }
  0xae   : > { %1147 = vrot.lane.b32.xlu1 %v771_v54, %s4064_s10 }
  0xaf   : > { %1145 = vrot.lane.b32.xlu0 %v914_v42, %s4064_s10  ;;  %v4563_v42 = vpack.c.bf16 %v2024_v32, %v2023_v31  ;;  %v3986_v32 = vld [vmem:[%s5710_s3 + $0x18] sm:$0xff]  }
  0xb2   : > { %1195 = vrot.lane.b32.xlu1 %v819_v57, %s4065_s11 }
  0xb3   : > { %1193 = vrot.lane.b32.xlu0 %v962_v46, %s4065_s11  ;;  %v2071_v46 = vld [vmem:[#allocation3 + $0x31] sm:$0xff] }
  0xb6   : > { %1243 = vrot.lane.b32.xlu1 %v868_v63, %s4066_s17  ;;  %v2169_v63 = vld [vmem:[#allocation3 + $0x50] sm:$0xff] }
  0xb7   : > { %1241 = vrot.lane.b32.xlu0 %v723_v51, %s4066_s17  ;;  %v4574_v51 = vpack.c.bf16 %v2072_v47, %v2071_v46 }
  0xb8   : > { %v4542_v7 = vpop.permute.xlu1 %1039 }
  0xb9   : > { %v992_v8 = vpop.permute.xlu0 %991 }
  0xba   : > { %1291 = vrot.lane.b32.xlu1 %v4539_v3, %s4067_s22  ;;  %v1362_v56 = vsel %vm332_vm0, %v4387_v36, %v992_v8 }
  0xbb   : > { %1289 = vrot.lane.b32.xlu0 %v771_v54, %s4067_s22  ;;  %v1407_v54 = vsel %vm1405_vm3, %v1359_v49, %v4534_v62  ;;  %v2168_v62 = vld [vmem:[#allocation3 + $0x48] sm:$0xff]  ;;  %v1409_v36 = vsel %vm1405_vm3, %v1362_v56, %v4542_v7  ;;  %v4657_v49 = vpack.c.bf16 %v2028_v43, %v2027_v41  ;;  %v322_v41 = vld [vmem:[%s4343_s29 + $0xb0] sm:$0xff] }
  0xbc   : > { %v4547_v12 = vpop.permute.xlu1 %1087  ;;  %v4603_v7 = vpack.c.bf16 %v2169_v63, %v2168_v62  ;;  %v2123_v56 = vld [vmem:[#allocation3 + $0x62] sm:$0xff]  ;;  %411 = vst.msk [vmem:[#allocation2 + $0x121] sm:$0xff] %vm332_vm0, %v322_v41 }
  0xbd   : > { %v1086_v16 = vpop.permute.xlu0 %1085  ;;  %v1442_v2 = vsel %vm1438_vm4, %v1409_v36, %v4547_v12  ;;  %v2217_v12 = vld [vmem:[#allocation3 + $0x51] sm:$0xff]  ;;  %v323_v43 = vld [vmem:[%s4343_s29 + $0xb8] sm:$0xff] }
  0xbe   : > { %1339 = vrot.lane.b32.xlu1 %v964_v9, %s4068_s27  ;;  %v4618_v20 = vpack.c.bf16 %v2217_v12, %v2216_v11  ;;  %412 = vst.msk [vmem:[#allocation2 + $0x129] sm:$0xff] %vm332_vm0, %v323_v43 }
  0xbf   : > { %1337 = vrot.lane.b32.xlu0 %v819_v57, %s4068_s27  ;;  %v1440_v57 = vsel %vm1438_vm4, %v1407_v54, %v1086_v16 }
  0xc0   : > { %v4551_v21 = vpop.permute.xlu1 %1135 }
  0xc1   : > { %v1134_v24 = vpop.permute.xlu0 %1133  ;;  %v1475_v8 = vsel %vm1471_vm5, %v1442_v2, %v4551_v21 }
  0xc2   : > { %2328 = vrot.lane.b32.xlu1 %v1958_v17, %s4062_s8  ;;  %v1473_v59 = vsel %vm1471_vm5, %v1440_v57, %v1134_v24  ;;  %v2124_v57 = vld [vmem:[#allocation3 + $0x6a] sm:$0xff] }
  0xc3   : > { %2326 = vrot.lane.b32.xlu0 %v1957_v18, %s4062_s8  ;;  %v3984_v18 = vld [vmem:[%s5710_s3 + $0x8] sm:$0xff]   ;;  %v2152_v63 = vpack.c.bf16 %v2124_v57, %v2123_v56 }
  0xc4   : > { %v1184_v33 = vpop.permute.xlu1 %1183  ;;  %v2128_v56 = vld [vmem:[#allocation3 + $0x9a] sm:$0xff] }
  0xc5   : > { %v1182_v40 = vpop.permute.xlu0 %1181  ;;  %v1508_v10 = vsel %vm1504_vm6, %v1475_v8, %v1184_v33  ;;  %v321_v33 = vld [vmem:[%s4343_s29 + $0xa8] sm:$0xff]  ;;  %v441_v8 = vld [vmem:[%s4405_s14 + $0xa0] sm:$0xff] }
  0xc6   : > { %2376 = vrot.lane.b32.xlu1 %v2006_v29, %s4061_s30  ;;  %v1506_v61 = vsel %vm1504_vm6, %v1473_v59, %v1182_v40  ;;  %410 = vst.msk [vmem:[#allocation2 + $0x111] sm:$0xff] %vm332_vm0, %v321_v33  ;;  %v3987_v40 = vld [vmem:[%s5710_s3 + $0x20] ss:$0 sps:$4 sm:$0xff]   ;;  %528 = vst.msk [vmem:[#allocation3 + $0x109] sm:$0xff] %vm332_vm0, %v441_v8 }
  0xc7   : > { %2374 = vrot.lane.b32.xlu0 %v2005_v30, %s4061_s30  ;;  %v320_v30 = vld [vmem:[%s4343_s29 + $0xa0] sm:$0xff] }
  0xc8   : > { %v1232_v48 = vpop.permute.xlu1 %1231  ;;  %409 = vst.msk [vmem:[#allocation2 + $0x109] sm:$0xff] %vm332_vm0, %v320_v30  ;;  %v2269_v30 = vld [vmem:[#allocation3 + $0x82] sm:$0xff] }
  0xc9   : > { %v1230_v50 = vpop.permute.xlu0 %1229  ;;  %v1541_v13 = vsel %vm1537_vm7, %v1508_v10, %v1232_v48  ;;  %v3035_v48 = vsel %vm1712_vm2, %v3987_v40, 0 }
  0xca   : > { %2424 = vrot.lane.b32.xlu1 %v4563_v42, %s4063_s9  ;;  %v1539_v0 = vsel %vm1537_vm7, %v1506_v61, %v1230_v50  ;;  %v2075_v50 = vld [vmem:[#allocation3 + $0x61] sm:$0xff] }
  0xcb   : > { %2422 = vrot.lane.b32.xlu0 %v4568_v44, %s4063_s9 }
  0xcc   : > { %v1280_v55 = vpop.permute.xlu1 %1279 }
  0xcd   : > { %v1278_v58 = vpop.permute.xlu0 %1277  ;;  %v1574_v16 = vsel %vm1570_vm8, %v1541_v13, %v1280_v55 }
  0xce   : > { %2472 = vrot.lane.b32.xlu1 %v4574_v51, %s4064_s10  ;;  %v1572_v5 = vsel %vm1570_vm8, %v1539_v0, %v1278_v58  ;;  %v2172_v0 = vld [vmem:[#allocation3 + $0x78] sm:$0xff] }
  0xcf   : > { %2470 = vrot.lane.b32.xlu0 %v1958_v17, %s4064_s10 }
  0xd0   : > { %v4593_v1 = vpop.permute.xlu1 %993 }
  0xd1   : > { %v1326_v6 = vpop.permute.xlu0 %1325  ;;  %v1365_v55 = vsel %vm332_vm0, %v4384_v35, %v4593_v1  ;;  %v2173_v1 = vld [vmem:[#allocation3 + $0x80] sm:$0xff] }
  0xd2   : > { %2520 = vrot.lane.b32.xlu1 %v4586_v60, %s4065_s11  ;;  %v1605_v9 = vsel %vm1603_vm9, %v1572_v5, %v1326_v6 }
  0xd3   : > { %2518 = vrot.lane.b32.xlu0 %v2006_v29, %s4065_s11  ;;  %3775 = vmatprep.mubr.msk.bf16.mxu0 %vm1679_vm10, %v1605_v9  ;;  %v2265_v29 = vld [vmem:[#allocation3 + $0x52] sm:$0xff] }
  0xd4   : > { %v4609_v14 = vpop.permute.xlu1 %995  ;;  %v2295_v34 = vpack.c.bf16 %v2265_v29, %v2264_v28  ;;  %v2268_v29 = vld [vmem:[#allocation3 + $0x7a] sm:$0xff] }
  0xd5   : > { %v1328_v17 = vpop.permute.xlu0 %1327  ;;  %v1368_v35 = vsel %vm332_vm0, %v4399_v45, %v4609_v14  ;;  %v442_v45 = vld [vmem:[%s4405_s14 + $0xa8] sm:$0xff]  ;;  %v4689_v14 = vpack.c.bf16 %v2173_v1, %v2172_v0 }
  0xd6   : > { %v1607_v19 = vsel %vm1603_vm9, %v1574_v16, %v1328_v17  ;;  %2568 = vrot.lane.b32.xlu1 %v4603_v7, %s4066_s17  ;;  %529 = vst.msk [vmem:[#allocation3 + $0x111] sm:$0xff] %vm332_vm0, %v442_v45  ;;  %v2220_v17 = vld [vmem:[#allocation3 + $0x79] sm:$0xff]  ;;  %v2224_v45 = vld [vmem:[#allocation3 + $0xa9] sm:$0xff] }
  0xd7   : > { %2566 = vrot.lane.b32.xlu0 %v4563_v42, %s4066_s17  ;;  %3776 = vmatmul.mubr.msk.bf16.vlgmr.msra.gmra.mrb[0].mxu0 %vm1679_vm10, %v1607_v19 }
  0xd8   : > { %v4623_v21 = vpop.permute.xlu1 %1043  ;;  %3808 = vmatpush3.bf16.msra.mxu0 %v4556_v25 }
  0xd9   : > { %v1042_v24 = vpop.permute.xlu0 %1041  ;;  %3809 = vmatprep.subr.bf16.mxu0 %v3984_v18  ;;  %v1413_v2 = vsel %vm1405_vm3, %v1368_v35, %v4623_v21  ;;  %v2176_v35 = vld [vmem:[#allocation3 + $0xa8] sm:$0xff] }
  0xda   : > { %2616 = vrot.lane.b32.xlu1 %v4618_v20, %s4067_s22  ;;  %v1411_v58 = vsel %vm1405_vm3, %v1365_v55, %v1042_v24  ;;  %v2127_v55 = vld [vmem:[#allocation3 + $0x92] sm:$0xff] }
  0xdb   : > { %2614 = vrot.lane.b32.xlu0 %v4574_v51, %s4067_s22 }
  0xdc   : > { %v1092_v25 = vpop.permute.xlu1 %1091  ;;  %3810 = vmatpush3.bf16.msra.mxu0 %v3984_v18  ;;  %v2221_v18 = vld [vmem:[#allocation3 + $0x81] sm:$0xff] }
  0xdd   : > { %v1090_v31 = vpop.permute.xlu0 %1089  ;;  %3811 = vmatprep.subr.bf16.mxu0 %v3985_v27  ;;  %v1446_v9 = vsel %vm1438_vm4, %v1413_v2, %v1092_v25  ;;  %v2249_v24 = vpack.c.bf16 %v2221_v18, %v2220_v17 }
  0xde   : > { %2330 = vrot.lane.b32.xlu1 %v4574_v51, %s4062_s8  ;;  %v2076_v51 = vld [vmem:[#allocation3 + $0x69] sm:$0xff] }
  0xdf   : > { %2662 = vrot.lane.b32.xlu0 %v4586_v60, %s4068_s27  ;;  %v2104_v54 = vpack.c.bf16 %v2076_v51, %v2075_v50  ;;  %v2080_v50 = vld [vmem:[#allocation3 + $0x99] sm:$0xff] }
  0xe0   : > { %v1140_v37 = vpop.permute.xlu1 %1139  ;;  %3812 = vmatpush3.bf16.msra.mxu0 %v3985_v27 }
  0xe1   : > { %v1138_v38 = vpop.permute.xlu0 %1137  ;;  %3813 = vmatprep.subr.bf16.mxu0 %v3986_v32  ;;  %v1479_v12 = vsel %vm1471_vm5, %v1446_v9, %v1140_v37  ;;  %v2031_v37 = vld [vmem:[#allocation3 + $0x90] sm:$0xff] }
  0xe2   : > { %2332 = vrot.lane.b32.xlu1 %v4618_v20, %s4062_s8 }
  0xe3   : > { %2664 = vrot.lane.b32.xlu0 %v2295_v34, %s4068_s27 }
  0xe4   : > { %v1188_v46 = vpop.permute.xlu1 %1187  ;;  %3814 = vmatpush3.bf16.msra.mxu0 %v3986_v32  ;;  %v2297_v32 = vpack.c.bf16 %v2269_v30, %v2268_v29  ;;  %v324_v29 = vld [vmem:[%s4343_s29 + $0xc0] sm:$0xff] }
  0xe5   : > { %v1186_v47 = vpop.permute.xlu0 %1185  ;;  %3959 = vmatprep.subr.msk.bf16.mxu0 %vm1712_vm2, %v3987_v40  ;;  %v1512_v16 = vsel %vm1504_vm6, %v1479_v12, %v1188_v46  ;;  %v2225_v12 = vld [vmem:[#allocation3 + $0xb1] sm:$0xff]  ;;  %413 = vst.msk [vmem:[#allocation2 + $0x139] sm:$0xff] %vm332_vm0, %v324_v29  ;;  %v2229_v29 = vld [vmem:[#allocation3 + $0xe1] sm:$0xff] }
  0xe6   : > { %2380 = vrot.lane.b32.xlu1 %v2295_v34, %s4061_s30 }
  0xe7   : > { %2378 = vrot.lane.b32.xlu0 %v4586_v60, %s4061_s30  ;;  %v1444_v60 = vsel %vm1438_vm4, %v1411_v58, %v1090_v31 }
  0xe8   : > { %v1236_v52 = vpop.permute.xlu1 %1235  ;;  %3816 = vmatpush3.bf16.msra.mxu0 %v3035_v48  ;;  %v1477_v62 = vsel %vm1471_vm5, %v1444_v60, %v1138_v38  ;;  %v2032_v38 = vld [vmem:[#allocation3 + $0x98] sm:$0xff] }
  0xe9   : > { %v1234_v53 = vpop.permute.xlu0 %1233  ;;  %v1510_v36 = vsel %vm1504_vm6, %v1477_v62, %v1186_v47  ;;  %v1545_v19 = vsel %vm1537_vm7, %v1512_v16, %v1236_v52  ;;  %v4714_v47 = vpack.c.bf16 %v2032_v38, %v2031_v37  ;;  %v2079_v48 = vld [vmem:[#allocation3 + $0x91] sm:$0xff]  ;;  %v2154_v62 = vpack.c.bf16 %v2128_v56, %v2127_v55  ;;  %v2035_v37 = vld [vmem:[#allocation3 + $0xc0] sm:$0xff]  ;;  %v2036_v38 = vld [vmem:[#allocation3 + $0xc8] sm:$0xff] }
  0xea   : > { %2428 = vrot.lane.b32.xlu1 %v4657_v49, %s4063_s9  ;;  %v1543_v5 = vsel %vm1537_vm7, %v1510_v36, %v1234_v53  ;;  %v2106_v53 = vpack.c.bf16 %v2080_v50, %v2079_v48  ;;  %v2177_v36 = vld [vmem:[#allocation3 + $0xb0] sm:$0xff]  ;;  %v2060_v43 = vpack.c.bf16 %v2036_v38, %v2035_v37  ;;  %v2131_v56 = vld [vmem:[#allocation3 + $0xc2] sm:$0xff] }
  0xeb   : > { %2426 = vrot.lane.b32.xlu0 %v4603_v7, %s4063_s9  ;;  %v2084_v48 = vld [vmem:[#allocation3 + $0xc9] sm:$0xff]  ;;  %v655_v38 = vld [vmem:[#allocation2 + $0xe2] sm:$0xff] }
  0xec   : > { %v1284_v59 = vpop.permute.xlu1 %1283  ;;  %v654_v37 = vld [vmem:[#allocation2 + $0xda] sm:$0xff] }
  0xed   : > { %v1282_v61 = vpop.permute.xlu0 %1281  ;;  %v1578_v21 = vsel %vm1570_vm8, %v1545_v19, %v1284_v59 }
  0xee   : > { %2476 = vrot.lane.b32.xlu1 %v2104_v54, %s4064_s10  ;;  %v1576_v10 = vsel %vm1570_vm8, %v1543_v5, %v1282_v61 }
  0xef   : > { %2474 = vrot.lane.b32.xlu0 %v4618_v20, %s4064_s10 }
  0xf0   : > { %v998_v6 = vpop.permute.xlu1 %997 }
  0xf1   : > { %v1330_v11 = vpop.permute.xlu0 %1329 }
  0xf2   : > { %v1609_v13 = vsel %vm1603_vm9, %v1576_v10, %v1330_v11  ;;  %2524 = vrot.lane.b32.xlu1 %v2152_v63, %s4065_s11  ;;  %v4738_v10 = vpack.c.bf16 %v2177_v36, %v2176_v35 }
  0xf3   : > { %2522 = vrot.lane.b32.xlu0 %v2295_v34, %s4065_s11  ;;  %3779 = vmatprep.mubr.msk.bf16.mxu0 %vm1679_vm10, %v1609_v13 }
  0xf4   : > { %v1000_v20 = vpop.permute.xlu1 %999 }
  0xf5   : > { %v1332_v22 = vpop.permute.xlu0 %1331 }
  0xf6   : > { %v1611_v23 = vsel %vm1603_vm9, %v1578_v21, %v1332_v22  ;;  %2572 = vrot.lane.b32.xlu1 %v4689_v14, %s4066_s17  ;;  %v443_v22 = vld [vmem:[%s4405_s14 + $0xb0] sm:$0xff] }
  0xf7   : > { %2570 = vrot.lane.b32.xlu0 %v4657_v49, %s4066_s17  ;;  %3780 = vmatmul.mubr.msk.bf16.gmra.mrb[4].mxu0 %vm1679_vm10, %v1611_v23  ;;  %v444_v23 = vld [vmem:[%s4405_s14 + $0xb8] sm:$0xff]  ;;  %530 = vst.msk [vmem:[#allocation3 + $0x121] sm:$0xff] %vm332_vm0, %v443_v22  ;;  %v653_v22 = vld [vmem:[#allocation2 + $0xca] sm:$0xff] }
  0xf8   : > { %v1048_v27 = vpop.permute.xlu1 %1047  ;;  %531 = vst.msk [vmem:[#allocation3 + $0x129] sm:$0xff] %vm332_vm0, %v444_v23 }
  0xf9   : > { %v1046_v25 = vpop.permute.xlu0 %1045 }
  0xfa   : > { %2620 = vrot.lane.b32.xlu1 %v2249_v24, %s4067_s22 }
  0xfb   : > { %2618 = vrot.lane.b32.xlu0 %v2104_v54, %s4067_s22 }
  0xfc   : > { %v1096_v28 = vpop.permute.xlu1 %1095 }
  0xfd   : > { %v1094_v31 = vpop.permute.xlu0 %1093 }
  0xfe   : > { %2334 = vrot.lane.b32.xlu1 %v2104_v54, %s4062_s8  ;;  %v1371_v54 = vsel %vm332_vm0, %v4457_v4, %v998_v6 }
  0xff   : > { %2666 = vrot.lane.b32.xlu0 %v2152_v63, %s4068_s27  ;;  %v1415_v57 = vsel %vm1405_vm3, %v1371_v54, %v1046_v25  ;;  %v2272_v25 = vld [vmem:[#allocation3 + $0xaa] sm:$0xff] }
 0x100   : > { %v1144_v33 = vpop.permute.xlu1 %1143  ;;  %v1448_v59 = vsel %vm1438_vm4, %v1415_v57, %v1094_v31  ;;  %v325_v31 = vld [vmem:[%s4343_s29 + $0xc8] sm:$0xff]  ;;  %v2132_v57 = vld [vmem:[#allocation3 + $0xca] sm:$0xff] }
 0x101   : > { %v1142_v34 = vpop.permute.xlu0 %1141  ;;  %414 = vst.msk [vmem:[#allocation2 + $0x141] sm:$0xff] %vm332_vm0, %v325_v31 }
 0x102   : > { %2336 = vrot.lane.b32.xlu1 %v2249_v24, %s4062_s8  ;;  %v1481_v61 = vsel %vm1471_vm5, %v1448_v59, %v1142_v34 }
 0x103   : > { %2668 = vrot.lane.b32.xlu0 %v2297_v32, %s4068_s27 }
 0x104   : > { %v1192_v40 = vpop.permute.xlu1 %1191 }
 0x105   : > { %v1190_v46 = vpop.permute.xlu0 %1189 }
 0x106   : > { %2384 = vrot.lane.b32.xlu1 %v2297_v32, %s4061_s30  ;;  %v1514_v4 = vsel %vm1504_vm6, %v1481_v61, %v1190_v46  ;;  %v2083_v46 = vld [vmem:[#allocation3 + $0xc1] sm:$0xff] }
 0x107   : > { %2382 = vrot.lane.b32.xlu0 %v2152_v63, %s4061_s30  ;;  %v1374_v63 = vsel %vm332_vm0, %v4474_v15, %v1000_v20  ;;  %v2251_v20 = vpack.c.bf16 %v2225_v12, %v2224_v45  ;;  %v446_v45 = vld [vmem:[%s4405_s14 + $0xc8] sm:$0xff] }
 0x108   : > { %v1240_v51 = vpop.permute.xlu1 %1239  ;;  %v1417_v0 = vsel %vm1405_vm3, %v1374_v63, %v1048_v27  ;;  %533 = vst.msk [vmem:[#allocation3 + $0x141] sm:$0xff] %vm332_vm0, %v446_v45  ;;  %v751_v45 = vld [vmem:[#allocation2 + $0xf9] sm:$0xff] }
 0x109   : > { %v1238_v52 = vpop.permute.xlu0 %1237  ;;  %v1450_v5 = vsel %vm1438_vm4, %v1417_v0, %v1096_v28  ;;  %v2273_v28 = vld [vmem:[#allocation3 + $0xb2] sm:$0xff] }
 0x10a   : > { %2432 = vrot.lane.b32.xlu1 %v4714_v47, %s4063_s9  ;;  %v1547_v1 = vsel %vm1537_vm7, %v1514_v4, %v1238_v52  ;;  %v1483_v9 = vsel %vm1471_vm5, %v1450_v5, %v1144_v33  ;;  %v4785_v4 = vpack.c.bf16 %v2132_v57, %v2131_v56  ;;  %v604_v0 = vld [vmem:[#allocation2 + $0xc1] sm:$0xff] }
 0x10b   : > { %2430 = vrot.lane.b32.xlu0 %v4689_v14, %s4063_s9  ;;  %v1516_v11 = vsel %vm1504_vm6, %v1483_v9, %v1192_v40 }
 0x10c   : > { %v1288_v58 = vpop.permute.xlu1 %1287  ;;  %v1549_v13 = vsel %vm1537_vm7, %v1516_v11, %v1240_v51 }
 0x10d   : > { %v1286_v60 = vpop.permute.xlu0 %1285  ;;  %v1582_v17 = vsel %vm1570_vm8, %v1549_v13, %v1288_v58 }
 0x10e   : > { %2480 = vrot.lane.b32.xlu1 %v2106_v53, %s4064_s10  ;;  %v1580_v6 = vsel %vm1570_vm8, %v1547_v1, %v1286_v60  ;;  %v605_v1 = vld [vmem:[#allocation2 + $0xc9] sm:$0xff] }
 0x10f   : > { %2478 = vrot.lane.b32.xlu0 %v2249_v24, %s4064_s10  ;;  %v628_v13 = vpack.c.bf16 %v605_v1, %v604_v0 }
 0x110   : > { %v1002_v2 = vpop.permute.xlu1 %1001 }
 0x111   : > { %v1334_v8 = vpop.permute.xlu0 %1333  ;;  %v1377_v54 = vsel %vm332_vm0, %v4492_v26, %v1002_v2 }
 0x112   : > { %v1613_v15 = vsel %vm1603_vm9, %v1580_v6, %v1334_v8  ;;  %2528 = vrot.lane.b32.xlu1 %v2154_v62, %s4065_s11  ;;  %v445_v8 = vld [vmem:[%s4405_s14 + $0xc0] sm:$0xff] }
 0x113   : > { %2526 = vrot.lane.b32.xlu0 %v2297_v32, %s4065_s11  ;;  %3783 = vmatprep.mubr.msk.bf16.mxu0 %vm1679_vm10, %v1613_v15  ;;  %v2299_v32 = vpack.c.bf16 %v2273_v28, %v2272_v25  ;;  %532 = vst.msk [vmem:[#allocation3 + $0x139] sm:$0xff] %vm332_vm0, %v445_v8  ;;  %v2228_v28 = vld [vmem:[#allocation3 + $0xd9] sm:$0xff] }
 0x114   : > { %v1004_v16 = vpop.permute.xlu1 %1003  ;;  %v4817_v31 = vpack.c.bf16 %v2229_v29, %v2228_v28  ;;  %v799_v28 = vld [vmem:[#allocation2 + $0xfa] sm:$0xff]  ;;  %v447_v29 = vld [vmem:[%s4405_s14 + $0xd0] sm:$0xff] }
 0x115   : > { %v1336_v18 = vpop.permute.xlu0 %1335  ;;  %v1380_v52 = vsel %vm332_vm0, %v4506_v39, %v1004_v16  ;;  %534 = vst.msk [vmem:[#allocation3 + $0x151] sm:$0xff] %vm332_vm0, %v447_v29 }
 0x116   : > { %v1615_v19 = vsel %vm1603_vm9, %v1582_v17, %v1336_v18  ;;  %2576 = vrot.lane.b32.xlu1 %v4738_v10, %s4066_s17  ;;  %v2180_v17 = vld [vmem:[#allocation3 + $0xd8] sm:$0xff]  ;;  %v2181_v18 = vld [vmem:[#allocation3 + $0xe0] sm:$0xff] }
 0x117   : > { %2574 = vrot.lane.b32.xlu0 %v4714_v47, %s4066_s17  ;;  %3784 = vmatmul.mubr.msk.bf16.gmra.mrb[8].mxu0 %vm1679_vm10, %v1615_v19 }
 0x118   : > { %v1052_v21 = vpop.permute.xlu1 %1051 }
 0x119   : > { %v1050_v24 = vpop.permute.xlu0 %1049  ;;  %v1421_v55 = vsel %vm1405_vm3, %v1380_v52, %v1052_v21  ;;  %v652_v21 = vld [vmem:[#allocation2 + $0xc2] sm:$0xff]  ;;  %v326_v52 = vld [vmem:[%s4343_s29 + $0xd0] sm:$0xff] }
 0x11a   : > { %2624 = vrot.lane.b32.xlu1 %v2251_v20, %s4067_s22  ;;  %v1419_v58 = vsel %vm1405_vm3, %v1377_v54, %v1050_v24  ;;  %v327_v54 = vld [vmem:[%s4343_s29 + $0xd8] sm:$0xff]  ;;  %415 = vst.msk [vmem:[#allocation2 + $0x151] sm:$0xff] %vm332_vm0, %v326_v52 }
 0x11b   : > { %2622 = vrot.lane.b32.xlu0 %v2106_v53, %s4067_s22  ;;  %416 = vst.msk [vmem:[#allocation2 + $0x159] sm:$0xff] %vm332_vm0, %v327_v54 }
 0x11c   : > { %v1100_v27 = vpop.permute.xlu1 %1099 }
 0x11d   : > { %v1098_v30 = vpop.permute.xlu0 %1097  ;;  %v1454_v59 = vsel %vm1438_vm4, %v1421_v55, %v1100_v27  ;;  %v676_v27 = vpack.c.bf16 %v653_v22, %v652_v21 }
 0x11e   : > { %2338 = vrot.lane.b32.xlu1 %v2106_v53, %s4062_s8  ;;  %v4770_v53 = vpack.c.bf16 %v2084_v48, %v2083_v46  ;;  %v1452_v39 = vsel %vm1438_vm4, %v1419_v58, %v1098_v30  ;;  %v2276_v46 = vld [vmem:[#allocation3 + $0xda] sm:$0xff]  ;;  %v2277_v48 = vld [vmem:[#allocation3 + $0xe2] sm:$0xff] }
 0x11f   : > { %2670 = vrot.lane.b32.xlu0 %v2154_v62, %s4068_s27  ;;  %v4831_v56 = vpack.c.bf16 %v2277_v48, %v2276_v46  ;;  %v748_v58 = vld [vmem:[#allocation2 + $0xd9] sm:$0xff] }
 0x120   : > { %v1148_v33 = vpop.permute.xlu1 %1147 }
 0x121   : > { %v1146_v34 = vpop.permute.xlu0 %1145  ;;  %v1487_v61 = vsel %vm1471_vm5, %v1454_v59, %v1148_v33  ;;  %v701_v33 = vld [vmem:[#allocation2 + $0xe0] sm:$0xff] }
 0x122   : > { %2340 = vrot.lane.b32.xlu1 %v2251_v20, %s4062_s8  ;;  %v1485_v26 = vsel %vm1471_vm5, %v1452_v39, %v1146_v34  ;;  %v749_v59 = vld [vmem:[#allocation2 + $0xe1] sm:$0xff]  ;;  %v702_v39 = vld [vmem:[#allocation2 + $0xf0] sm:$0xff] }
 0x123   : > { %2672 = vrot.lane.b32.xlu0 %v2299_v32, %s4068_s27 }
 0x124   : > { %v1196_v40 = vpop.permute.xlu1 %1195 }
 0x125   : > { %v1194_v41 = vpop.permute.xlu0 %1193  ;;  %v1520_v63 = vsel %vm1504_vm6, %v1487_v61, %v1196_v40  ;;  %v703_v61 = vld [vmem:[#allocation2 + $0xf8] sm:$0xff] }
 0x126   : > { %2388 = vrot.lane.b32.xlu1 %v2299_v32, %s4061_s30  ;;  %v1518_v35 = vsel %vm1504_vm6, %v1485_v26, %v1194_v41  ;;  %v772_v26 = vpack.c.bf16 %v749_v59, %v748_v58  ;;  %v2088_v58 = vld [vmem:[#allocation3 + $0xf9] sm:$0xff] }
 0x127   : > { %2386 = vrot.lane.b32.xlu0 %v2154_v62, %s4061_s30 }
 0x128   : > { %v1244_v50 = vpop.permute.xlu1 %1243 }
 0x129   : > { %v1242_v51 = vpop.permute.xlu0 %1241  ;;  %v1553_v36 = vsel %vm1537_vm7, %v1520_v63, %v1244_v50  ;;  %v1878_v50 = vld [vmem:[#allocation3 + $0x8] sm:$0xff] }
 0x12a   : > { %2436 = vrot.lane.b32.xlu1 %v2060_v43, %s4063_s9  ;;  %v1551_v2 = vsel %vm1537_vm7, %v1518_v35, %v1242_v51  ;;  %v725_v35 = vpack.c.bf16 %v703_v61, %v702_v39  ;;  %v895_v61 = vld [vmem:[#allocation2 + $0x109] sm:$0xff] }
 0x12b   : > { %2434 = vrot.lane.b32.xlu0 %v4738_v10, %s4063_s9 }
 0x12c   : > { %v1292_v60 = vpop.permute.xlu1 %1291 }
 0x12d   : > { %v1290_v62 = vpop.permute.xlu0 %1289  ;;  %v1586_v5 = vsel %vm1570_vm8, %v1553_v36, %v1292_v60 }
 0x12e   : > { %2484 = vrot.lane.b32.xlu1 %v4770_v53, %s4064_s10  ;;  %v1584_v9 = vsel %vm1570_vm8, %v1551_v2, %v1290_v62 }
 0x12f   : > { %2482 = vrot.lane.b32.xlu0 %v2251_v20, %s4064_s10  ;;  %v4808_v20 = vpack.c.bf16 %v2181_v18, %v2180_v17 }
 0x130   : > { %v1340_v6 = vpop.permute.xlu1 %1339 }
 0x131   : > { %v1619_v15 = vsel %vm1603_vm9, %v1586_v5, %v1340_v6  ;;  %v1338_v11 = vpop.permute.xlu0 %1337 }
 0x132   : > { %v1617_v12 = vsel %vm1603_vm9, %v1584_v9, %v1338_v11  ;;  %2532 = vrot.lane.b32.xlu1 %v4785_v4, %s4065_s11  ;;  %v750_v11 = vld [vmem:[#allocation2 + $0xf1] sm:$0xff] }
 0x133   : > { %2530 = vrot.lane.b32.xlu0 %v2299_v32, %s4065_s11  ;;  %3787 = vmatprep.mubr.msk.bf16.mxu0 %vm1679_vm10, %v1617_v12  ;;  %v700_v32 = vld [vmem:[#allocation2 + $0xd8] sm:$0xff] }
 0x134   : > { %3788 = vmatmul.mubr.msk.bf16.gmra.mrb[12].mxu0 %vm1679_vm10, %v1619_v15  ;;  %v4804_v16 = vpop.permute.xlu1 %2328  ;;  %v4821_v41 = vpack.c.bf16 %v701_v33, %v700_v32 }
 0x135   : > { %v2327_v19 = vpop.permute.xlu0 %2326  ;;  %v2699_v6 = vsel %vm332_vm0, %v4568_v44, %v4804_v16 }
 0x136   : > { %1005 = vrot.lane.b32.xlu1 %v628_v13, %s4062_s8 }
 0x137   : > { %2578 = vrot.lane.b32.xlu0 %v2060_v43, %s4066_s17  ;;  %v1877_v43 = vld [vmem:[#allocation3] sm:$0xff] }
 0x138   : > { %v2377_v23 = vpop.permute.xlu1 %2376  ;;  %v1909_v57 = vpack.c.bf16 %v1878_v50, %v1877_v43  ;;  %v847_v50 = vld [vmem:[#allocation2 + $0x108] sm:$0xff] }
 0x139   : > { %v2375_v24 = vpop.permute.xlu0 %2374 }
 0x13a   : > { %2626 = vrot.lane.b32.xlu1 %v4770_v53, %s4067_s22  ;;  %v2696_v63 = vsel %vm332_vm0, %v1909_v57, %v2327_v19  ;;  %v4862_v19 = vpack.c.bf16 %v751_v45, %v750_v11  ;;  %v2087_v57 = vld [vmem:[#allocation3 + $0xf1] sm:$0xff] }
 0x13b   : > { %2580 = vrot.lane.b32.xlu0 %v4808_v20, %s4066_s17  ;;  %v2743_v36 = vsel %vm1405_vm3, %v2696_v63, %v2375_v24 }
 0x13c   : > { %v2425_v25 = vpop.permute.xlu1 %2424 }
 0x13d   : > { %v2423_v30 = vpop.permute.xlu0 %2422 }
 0x13e   : > { %1053 = vrot.lane.b32.xlu1 %v676_v27, %s4061_s30  ;;  %v2775_v1 = vsel %vm1438_vm4, %v2743_v36, %v2423_v30  ;;  %v448_v30 = vld [vmem:[%s4405_s14 + $0xd8] sm:$0xff] }
 0x13f   : > { %1007 = vrot.lane.b32.xlu0 %v4539_v3, %s4062_s8  ;;  %v677_v3 = vpack.c.bf16 %v655_v38, %v654_v37  ;;  %535 = vst.msk [vmem:[#allocation3 + $0x159] sm:$0xff] %vm332_vm0, %v448_v30  ;;  %v2039_v37 = vld [vmem:[#allocation3 + $0xf0] sm:$0xff]  ;;  %v2040_v38 = vld [vmem:[#allocation3 + $0xf8] sm:$0xff] }
 0x140   : > { %v2473_v34 = vpop.permute.xlu1 %2472  ;;  %v2062_v46 = vpack.c.bf16 %v2040_v38, %v2039_v37  ;;  %v2232_v38 = vld [vmem:[#allocation3 + $0x109] sm:$0xff] }
 0x141   : > { %v2471_v40 = vpop.permute.xlu0 %2470 }
 0x142   : > { %2674 = vrot.lane.b32.xlu1 %v4785_v4, %s4068_s27  ;;  %v2807_v5 = vsel %vm1471_vm5, %v2775_v1, %v2471_v40  ;;  %v328_v40 = vld [vmem:[%s4343_s29 + $0xe0] sm:$0xff]  ;;  %v2136_v1 = vld [vmem:[#allocation3 + $0xfa] sm:$0xff] }
 0x143   : > { %2628 = vrot.lane.b32.xlu0 %v4817_v31, %s4067_s22  ;;  %417 = vst.msk [vmem:[#allocation2 + $0x169] sm:$0xff] %vm332_vm0, %v328_v40  ;;  %v2233_v40 = vld [vmem:[#allocation3 + $0x111] sm:$0xff] }
 0x144   : > { %v2521_v51 = vpop.permute.xlu1 %2520 }
 0x145   : > { %v2519_v55 = vpop.permute.xlu0 %2518 }
 0x146   : > { %1101 = vrot.lane.b32.xlu1 %v4821_v41, %s4063_s9  ;;  %v2839_v8 = vsel %vm1504_vm6, %v2807_v5, %v2519_v55 }
 0x147   : > { %1055 = vrot.lane.b32.xlu0 %v677_v3, %s4061_s30 }
 0x148   : > { %v2569_v60 = vpop.permute.xlu1 %2568 }
 0x149   : > { %v2567_v62 = vpop.permute.xlu0 %2566 }
 0x14a   : > { %2676 = vrot.lane.b32.xlu1 %v4831_v56, %s4068_s27  ;;  %v2871_v9 = vsel %vm1537_vm7, %v2839_v8, %v2567_v62  ;;  %v896_v62 = vld [vmem:[#allocation2 + $0x111] sm:$0xff] }
 0x14b   : > { %2342 = vrot.lane.b32.xlu0 %v4770_v53, %s4062_s8  ;;  %v2745_v53 = vsel %vm1405_vm3, %v2699_v6, %v2377_v23  ;;  %v4906_v63 = vpack.c.bf16 %v896_v62, %v895_v61 }
 0x14c   : > { %v2617_v0 = vpop.permute.xlu1 %2616  ;;  %v2777_v12 = vsel %vm1438_vm4, %v2745_v53, %v2425_v25  ;;  %v943_v53 = vld [vmem:[#allocation2 + $0x10a] sm:$0xff] }
 0x14d   : > { %v2615_v2 = vpop.permute.xlu0 %2614  ;;  %v2809_v18 = vsel %vm1471_vm5, %v2777_v12, %v2473_v34  ;;  %v449_v12 = vld [vmem:[%s4405_s14 + $0xe0] sm:$0xff] }
 0x14e   : > { %1149 = vrot.lane.b32.xlu1 %v772_v26, %s4064_s10  ;;  %v2903_v13 = vsel %vm1570_vm8, %v2871_v9, %v2615_v2  ;;  %v2841_v16 = vsel %vm1504_vm6, %v2809_v18, %v2521_v51  ;;  %v848_v51 = vld [vmem:[#allocation2 + $0x110] sm:$0xff]  ;;  %v450_v18 = vld [vmem:[%s4405_s14 + $0xe8] sm:$0xff]  ;;  %536 = vst.msk [vmem:[#allocation3 + $0x169] sm:$0xff] %vm332_vm0, %v449_v12 }
 0x14f   : > { %1103 = vrot.lane.b32.xlu0 %v725_v35, %s4063_s9  ;;  %v2873_v21 = vsel %vm1537_vm7, %v2841_v16, %v2569_v60  ;;  %v4891_v54 = vpack.c.bf16 %v848_v51, %v847_v50  ;;  %v4897_v60 = vpack.c.bf16 %v2088_v58, %v2087_v57  ;;  %v944_v9 = vld [vmem:[#allocation2 + $0x112] sm:$0xff]  ;;  %537 = vst.msk [vmem:[#allocation3 + $0x171] sm:$0xff] %vm332_vm0, %v450_v18  ;;  %v2281_v50 = vld [vmem:[#allocation3 + $0x112] sm:$0xff] }
 0x150   : > { %v4850_v15 = vpop.permute.xlu1 %2330  ;;  %v2905_v23 = vsel %vm1570_vm8, %v2873_v21, %v2617_v0  ;;  %v2135_v0 = vld [vmem:[#allocation3 + $0xf2] sm:$0xff]  ;;  %v4930_v21 = vpack.c.bf16 %v944_v9, %v943_v53 }
 0x151   : > { %v2663_v17 = vpop.permute.xlu0 %2662  ;;  %v2702_v26 = vsel %vm332_vm0, %v4563_v42, %v4850_v15  ;;  %v4918_v8 = vpack.c.bf16 %v2136_v1, %v2135_v0  ;;  %v802_v18 = vld [vmem:[#allocation2 + $0x122] sm:$0xff] }
 0x152   : > { %v2935_v44 = vsel %vm1603_vm9, %v2903_v13, %v2663_v17  ;;  %2390 = vrot.lane.b32.xlu1 %v4785_v4, %s4061_s30  ;;  %v798_v4 = vld [vmem:[#allocation2 + $0xf2] sm:$0xff] }
 0x153   : > { %2344 = vrot.lane.b32.xlu0 %v4817_v31, %s4062_s8  ;;  %3817 = vmatprep.mubr.msk.bf16.mxu0 %vm1679_vm10, %v2935_v44  ;;  %v4879_v33 = vpack.c.bf16 %v799_v28, %v798_v4  ;;  %v2185_v4 = vld [vmem:[#allocation3 + $0x110] sm:$0xff] }
 0x154   : > { %v2333_v22 = vpop.permute.xlu1 %2332 }
 0x155   : > { %v2665_v24 = vpop.permute.xlu0 %2664  ;;  %v2705_v42 = vsel %vm332_vm0, %v4603_v7, %v2333_v22 }
 0x156   : > { %v2937_v27 = vsel %vm1603_vm9, %v2905_v23, %v2665_v24  ;;  %1197 = vrot.lane.b32.xlu1 %v677_v3, %s4065_s11  ;;  %v329_v3 = vld [vmem:[%s4343_s29 + $0xe8] sm:$0xff] }
 0x157   : > { %1151 = vrot.lane.b32.xlu0 %v4862_v19, %s4064_s10  ;;  %3818 = vmatmul.mubr.msk.bf16.vlgmr.msra.gmra.mrb[0].mxu0 %vm1679_vm10, %v2937_v27  ;;  %418 = vst.msk [vmem:[#allocation2 + $0x171] sm:$0xff] %vm332_vm0, %v329_v3  ;;  %v2184_v27 = vld [vmem:[#allocation3 + $0x108] sm:$0xff] }
 0x158   : > { %v2381_v25 = vpop.permute.xlu1 %2380  ;;  %v4945_v30 = vpack.c.bf16 %v2185_v4, %v2184_v27  ;;  %v2043_v4 = vld [vmem:[#allocation3 + $0x120] sm:$0xff] }
 0x159   : > { %v2379_v32 = vpop.permute.xlu0 %2378  ;;  %v2749_v15 = vsel %vm1405_vm3, %v2705_v42, %v2381_v25  ;;  %v754_v42 = vld [vmem:[#allocation2 + $0x121] sm:$0xff] }
 0x15a   : > { %2438 = vrot.lane.b32.xlu1 %v4808_v20, %s4063_s9 }
 0x15b   : > { %2392 = vrot.lane.b32.xlu0 %v4831_v56, %s4061_s30 }
 0x15c   : > { %v2429_v34 = vpop.permute.xlu1 %2428 }
 0x15d   : > { %v2427_v43 = vpop.permute.xlu0 %2426  ;;  %v2781_v13 = vsel %vm1438_vm4, %v2749_v15, %v2429_v34 }
 0x15e   : > { %1245 = vrot.lane.b32.xlu1 %v725_v35, %s4066_s17  ;;  %v2747_v35 = vsel %vm1405_vm3, %v2702_v26, %v2379_v32 }
 0x15f   : > { %1199 = vrot.lane.b32.xlu0 %v4879_v33, %s4065_s11  ;;  %v2779_v2 = vsel %vm1438_vm4, %v2747_v35, %v2427_v43 }
 0x160   : > { %v2477_v48 = vpop.permute.xlu1 %2476 }
 0x161   : > { %v2475_v52 = vpop.permute.xlu0 %2474  ;;  %v2813_v44 = vsel %vm1471_vm5, %v2781_v13, %v2477_v48  ;;  %v2280_v48 = vld [vmem:[#allocation3 + $0x10a] sm:$0xff] }
 0x162   : > { %2486 = vrot.lane.b32.xlu1 %v4817_v31, %s4064_s10 }
 0x163   : > { %2440 = vrot.lane.b32.xlu0 %v2062_v46, %s4063_s9 }
 0x164   : > { %v2525_v55 = vpop.permute.xlu1 %2524 }
 0x165   : > { %v2523_v59 = vpop.permute.xlu0 %2522  ;;  %v2845_v22 = vsel %vm1504_vm6, %v2813_v44, %v2525_v55  ;;  %v331_v55 = vld [vmem:[%s4343_s29 + $0xf8] sm:$0xff] }
 0x166   : > { %1293 = vrot.lane.b32.xlu1 %v4862_v19, %s4067_s22  ;;  %420 = vst.msk [vmem:[#allocation2 + $0x189] sm:$0xff] %vm332_vm0, %v331_v55 }
 0x167   : > { %1247 = vrot.lane.b32.xlu0 %v4891_v54, %s4066_s17 }
 0x168   : > { %v2573_v39 = vpop.permute.xlu1 %2572 }
 0x169   : > { %v2571_v31 = vpop.permute.xlu0 %2570  ;;  %v2877_v23 = vsel %vm1537_vm7, %v2845_v22, %v2573_v39  ;;  %v707_v39 = vld [vmem:[#allocation2 + $0x128] sm:$0xff]  ;;  %v451_v22 = vld [vmem:[%s4405_s14 + $0xf0] sm:$0xff] }
 0x16a   : > { %2534 = vrot.lane.b32.xlu1 %v4831_v56, %s4065_s11  ;;  %v2811_v56 = vsel %vm1471_vm5, %v2779_v2, %v2475_v52  ;;  %v330_v52 = vld [vmem:[%s4343_s29 + $0xf0] sm:$0xff]  ;;  %538 = vst.msk [vmem:[#allocation3 + $0x181] sm:$0xff] %vm332_vm0, %v451_v22 }
 0x16b   : > { %2488 = vrot.lane.b32.xlu0 %v4897_v60, %s4064_s10  ;;  %v2843_v6 = vsel %vm1504_vm6, %v2811_v56, %v2523_v59  ;;  %419 = vst.msk [vmem:[#allocation2 + $0x181] sm:$0xff] %vm332_vm0, %v330_v52  ;;  %v706_v59 = vld [vmem:[#allocation2 + $0x120] sm:$0xff] }
 0x16c   : > { %v2621_v36 = vpop.permute.xlu1 %2620  ;;  %v2875_v11 = vsel %vm1537_vm7, %v2843_v6, %v2571_v31  ;;  %v727_v31 = vpack.c.bf16 %v707_v39, %v706_v59  ;;  %v755_v6 = vld [vmem:[#allocation2 + $0x129] sm:$0xff]  ;;  %v899_v52 = vld [vmem:[#allocation2 + $0x139] sm:$0xff] }
 0x16d   : > { %v2619_v5 = vpop.permute.xlu0 %2618  ;;  %v2909_v25 = vsel %vm1570_vm8, %v2877_v23, %v2621_v36  ;;  %v452_v23 = vld [vmem:[%s4405_s14 + $0xf8] sm:$0xff] }
 0x16e   : > { %1341 = vrot.lane.b32.xlu1 %v4879_v33, %s4068_s27  ;;  %v2907_v17 = vsel %vm1570_vm8, %v2875_v11, %v2619_v5  ;;  %539 = vst.msk [vmem:[#allocation3 + $0x189] sm:$0xff] %vm332_vm0, %v452_v23  ;;  %v2139_v59 = vld [vmem:[#allocation3 + $0x122] sm:$0xff]  ;;  %v2140_v39 = vld [vmem:[#allocation3 + $0x12a] sm:$0xff] }
 0x16f   : > { %1295 = vrot.lane.b32.xlu0 %v4906_v63, %s4067_s22 }
 0x170   : > { %v2335_v45 = vpop.permute.xlu1 %2334 }
 0x171   : > { %v2667_v7 = vpop.permute.xlu0 %2666  ;;  %v2708_v62 = vsel %vm332_vm0, %v4657_v49, %v2335_v45  ;;  %v5000_v45 = vpack.c.bf16 %v755_v6, %v754_v42  ;;  %v2188_v42 = vld [vmem:[#allocation3 + $0x138] sm:$0xff]  ;;  %v2189_v6 = vld [vmem:[#allocation3 + $0x140] sm:$0xff] }
 0x172   : > { %v2939_v16 = vsel %vm1603_vm9, %v2907_v17, %v2667_v7  ;;  %2582 = vrot.lane.b32.xlu1 %v2062_v46, %s4066_s17 }
 0x173   : > { %2536 = vrot.lane.b32.xlu0 %v4918_v8, %s4065_s11  ;;  %3821 = vmatprep.mubr.msk.bf16.mxu0 %vm1679_vm10, %v2939_v16  ;;  %v803_v16 = vld [vmem:[#allocation2 + $0x12a] sm:$0xff] }
 0x174   : > { %v2337_v24 = vpop.permute.xlu1 %2336 }
 0x175   : > { %v2669_v28 = vpop.permute.xlu0 %2668  ;;  %v2711_v2 = vsel %vm332_vm0, %v4689_v14, %v2337_v24 }
 0x176   : > { %v2941_v29 = vsel %vm1603_vm9, %v2909_v25, %v2669_v28  ;;  %1343 = vrot.lane.b32.xlu1 %v4930_v21, %s4068_s27  ;;  %v2044_v25 = vld [vmem:[#allocation3 + $0x128] sm:$0xff] }
 0x177   : > { %1009 = vrot.lane.b32.xlu0 %v4862_v19, %s4062_s8  ;;  %3822 = vmatmul.mubr.msk.bf16.gmra.mrb[4].mxu0 %vm1679_vm10, %v2941_v29  ;;  %v4955_v19 = vpack.c.bf16 %v2233_v40, %v2232_v38  ;;  %v2064_v29 = vpack.c.bf16 %v2044_v25, %v2043_v4  ;;  %v2284_v4 = vld [vmem:[#allocation3 + $0x13a] sm:$0xff]  ;;  %v2285_v25 = vld [vmem:[#allocation3 + $0x142] sm:$0xff] }
 0x178   : > { %v2385_v32 = vpop.permute.xlu1 %2384 }
 0x179   : > { %v2383_v34 = vpop.permute.xlu0 %2382 }
 0x17a   : > { %2630 = vrot.lane.b32.xlu1 %v4897_v60, %s4067_s22  ;;  %v2751_v26 = vsel %vm1405_vm3, %v2708_v62, %v2383_v34  ;;  %v851_v34 = vld [vmem:[#allocation2 + $0x138] sm:$0xff] }
 0x17b   : > { %2584 = vrot.lane.b32.xlu0 %v4945_v30, %s4066_s17 }
 0x17c   : > { %v2433_v37 = vpop.permute.xlu1 %2432 }
 0x17d   : > { %v2431_v43 = vpop.permute.xlu0 %2430 }
 0x17e   : > { %1057 = vrot.lane.b32.xlu1 %v4879_v33, %s4061_s30  ;;  %v4967_v33 = vpack.c.bf16 %v2281_v50, %v2280_v48  ;;  %v2783_v36 = vsel %vm1438_vm4, %v2751_v26, %v2431_v43  ;;  %v947_v26 = vld [vmem:[#allocation2 + $0x13a] sm:$0xff] }
 0x17f   : > { %1011 = vrot.lane.b32.xlu0 %v4906_v63, %s4062_s8 }
 0x180   : > { %v2481_v3 = vpop.permute.xlu1 %2480 }
 0x181   : > { %v2479_v46 = vpop.permute.xlu0 %2478 }
 0x182   : > { %2678 = vrot.lane.b32.xlu1 %v4918_v8, %s4068_s27  ;;  %v2815_v1 = vsel %vm1471_vm5, %v2783_v36, %v2479_v46  ;;  %v2092_v46 = vld [vmem:[#allocation3 + $0x129] sm:$0xff] }
 0x183   : > { %2632 = vrot.lane.b32.xlu0 %v4955_v19, %s4067_s22 }
 0x184   : > { %v2529_v51 = vpop.permute.xlu1 %2528 }
 0x185   : > { %v2527_v57 = vpop.permute.xlu0 %2526 }
 0x186   : > { %1105 = vrot.lane.b32.xlu1 %v4891_v54, %s4063_s9  ;;  %v2847_v49 = vsel %vm1504_vm6, %v2815_v1, %v2527_v57 }
 0x187   : > { %1059 = vrot.lane.b32.xlu0 %v4930_v21, %s4061_s30 }
 0x188   : > { %v2577_v58 = vpop.permute.xlu1 %2576 }
 0x189   : > { %v2575_v61 = vpop.permute.xlu0 %2574 }
 0x18a   : > { %2680 = vrot.lane.b32.xlu1 %v4967_v33, %s4068_s27  ;;  %v2879_v5 = vsel %vm1537_vm7, %v2847_v49, %v2575_v61 }
 0x18b   : > { %2346 = vrot.lane.b32.xlu0 %v4897_v60, %s4062_s8  ;;  %v2753_v60 = vsel %vm1405_vm3, %v2711_v2, %v2385_v32 }
 0x18c   : > { %v2625_v35 = vpop.permute.xlu1 %2624  ;;  %v2785_v53 = vsel %vm1438_vm4, %v2753_v60, %v2433_v37  ;;  %v852_v37 = vld [vmem:[#allocation2 + $0x140] sm:$0xff] }
 0x18d   : > { %v2623_v0 = vpop.permute.xlu0 %2622  ;;  %v2817_v15 = vsel %vm1471_vm5, %v2785_v53, %v2481_v3  ;;  %v5030_v40 = vpack.c.bf16 %v852_v37, %v851_v34  ;;  %v2091_v3 = vld [vmem:[#allocation3 + $0x121] sm:$0xff] }
 0x18e   : > { %1153 = vrot.lane.b32.xlu1 %v4906_v63, %s4064_s10  ;;  %v2911_v9 = vsel %vm1570_vm8, %v2879_v5, %v2623_v0  ;;  %v2849_v11 = vsel %vm1504_vm6, %v2817_v15, %v2529_v51  ;;  %v5036_v50 = vpack.c.bf16 %v2092_v46, %v2091_v3  ;;  %v710_v34 = vld [vmem:[#allocation2 + $0x150] sm:$0xff]  ;;  %v711_v37 = vld [vmem:[#allocation2 + $0x158] sm:$0xff] }
 0x18f   : > { %1107 = vrot.lane.b32.xlu0 %v727_v31, %s4063_s9  ;;  %v2881_v12 = vsel %vm1537_vm7, %v2849_v11, %v2577_v58 }
 0x190   : > { %v4988_v56 = vpop.permute.xlu1 %2338  ;;  %v2913_v17 = vsel %vm1570_vm8, %v2881_v12, %v2625_v35  ;;  %v948_v35 = vld [vmem:[#allocation2 + $0x142] sm:$0xff] }
 0x191   : > { %v2671_v63 = vpop.permute.xlu0 %2670  ;;  %v2714_v62 = vsel %vm332_vm0, %v4714_v47, %v4988_v56  ;;  %v5064_v49 = vpack.c.bf16 %v948_v35, %v947_v26 }
 0x192   : > { %v2943_v14 = vsel %vm1603_vm9, %v2911_v9, %v2671_v63  ;;  %2394 = vrot.lane.b32.xlu1 %v4918_v8, %s4061_s30 }
 0x193   : > { %2348 = vrot.lane.b32.xlu0 %v4955_v19, %s4062_s8  ;;  %3825 = vmatprep.mubr.msk.bf16.mxu0 %vm1679_vm10, %v2943_v14  ;;  %v5081_v14 = vpack.c.bf16 %v2189_v6, %v2188_v42 }
 0x194   : > { %v5003_v13 = vpop.permute.xlu1 %2340 }
 0x195   : > { %v2673_v7 = vpop.permute.xlu0 %2672  ;;  %v2717_v63 = vsel %vm332_vm0, %v4738_v10, %v5003_v13 }
 0x196   : > { %v2945_v8 = vsel %vm1603_vm9, %v2913_v17, %v2673_v7  ;;  %1201 = vrot.lane.b32.xlu1 %v4930_v21, %s4065_s11  ;;  %v5022_v21 = vpack.c.bf16 %v803_v16, %v802_v18  ;;  %v2236_v18 = vld [vmem:[#allocation3 + $0x139] sm:$0xff] }
 0x197   : > { %1155 = vrot.lane.b32.xlu0 %v5000_v45, %s4064_s10  ;;  %3826 = vmatmul.mubr.msk.bf16.gmra.mrb[8].mxu0 %vm1679_vm10, %v2945_v8 }
 0x198   : > { %v5012_v44 = vpop.permute.xlu1 %2388 }
 0x199   : > { %v2387_v24 = vpop.permute.xlu0 %2386  ;;  %v2757_v15 = vsel %vm1405_vm3, %v2717_v63, %v5012_v44  ;;  %v2237_v44 = vld [vmem:[#allocation3 + $0x141] sm:$0xff]  ;;  %v855_v63 = vld [vmem:[#allocation2 + $0x168] sm:$0xff] }
 0x19a   : > { %2442 = vrot.lane.b32.xlu1 %v4945_v30, %s4063_s9  ;;  %v5104_v23 = vpack.c.bf16 %v2237_v44, %v2236_v18  ;;  %v2095_v18 = vld [vmem:[#allocation3 + $0x151] sm:$0xff]  ;;  %v2096_v44 = vld [vmem:[#allocation3 + $0x159] sm:$0xff] }
 0x19b   : > { %2396 = vrot.lane.b32.xlu0 %v4967_v33, %s4061_s30 }
 0x19c   : > { %v2437_v27 = vpop.permute.xlu1 %2436 }
 0x19d   : > { %v2435_v28 = vpop.permute.xlu0 %2434  ;;  %v2789_v11 = vsel %vm1438_vm4, %v2757_v15, %v2437_v27  ;;  %v856_v15 = vld [vmem:[#allocation2 + $0x170] sm:$0xff] }
 0x19e   : > { %1249 = vrot.lane.b32.xlu1 %v727_v31, %s4066_s17  ;;  %v2755_v31 = vsel %vm1405_vm3, %v2714_v62, %v2387_v24 }
 0x19f   : > { %1203 = vrot.lane.b32.xlu0 %v5022_v21, %s4065_s11  ;;  %v2787_v36 = vsel %vm1438_vm4, %v2755_v31, %v2435_v28  ;;  %v806_v31 = vld [vmem:[#allocation2 + $0x152] sm:$0xff] }
 0x1a0   : > { %v2485_v32 = vpop.permute.xlu1 %2484 }
 0x1a1   : > { %v2483_v38 = vpop.permute.xlu0 %2482  ;;  %v2821_v17 = vsel %vm1471_vm5, %v2789_v11, %v2485_v32 }
 0x1a2   : > { %2490 = vrot.lane.b32.xlu1 %v4955_v19, %s4064_s10  ;;  %v900_v19 = vld [vmem:[#allocation2 + $0x141] sm:$0xff]  ;;  %v2819_v1 = vsel %vm1471_vm5, %v2787_v36, %v2483_v38 }
 0x1a3   : > { %2444 = vrot.lane.b32.xlu0 %v2064_v29, %s4063_s9  ;;  %v5044_v57 = vpack.c.bf16 %v900_v19, %v899_v52  ;;  %v758_v52 = vld [vmem:[#allocation2 + $0x151] sm:$0xff]  ;;  %v759_v19 = vld [vmem:[#allocation2 + $0x159] sm:$0xff] }
 0x1a4   : > { %v2533_v43 = vpop.permute.xlu1 %2532 }
 0x1a5   : > { %v2531_v48 = vpop.permute.xlu0 %2530  ;;  %v2853_v13 = vsel %vm1504_vm6, %v2821_v17, %v2533_v43  ;;  %v5126_v43 = vpack.c.bf16 %v711_v37, %v710_v34  ;;  %v904_v34 = vld [vmem:[#allocation2 + $0x171] sm:$0xff] }
 0x1a6   : > { %1297 = vrot.lane.b32.xlu1 %v5000_v45, %s4067_s22  ;;  %v2851_v47 = vsel %vm1504_vm6, %v2819_v1, %v2531_v48 }
 0x1a7   : > { %1251 = vrot.lane.b32.xlu0 %v5030_v40, %s4066_s17 }
 0x1a8   : > { %v5038_v51 = vpop.permute.xlu1 %1005 }
 0x1a9   : > { %v2579_v55 = vpop.permute.xlu0 %2578 }
 0x1aa   : > { %2538 = vrot.lane.b32.xlu1 %v4967_v33, %s4065_s11  ;;  %v5054_v33 = vpack.c.bf16 %v2140_v39, %v2139_v59  ;;  %v2883_v60 = vsel %vm1537_vm7, %v2851_v47, %v2579_v55  ;;  %v5140_v59 = vpack.c.bf16 %v759_v19, %v758_v52 }
 0x1ab   : > { %2492 = vrot.lane.b32.xlu0 %v5036_v50, %s4064_s10 }
 0x1ac   : > { %v2627_v58 = vpop.permute.xlu1 %2626 }
 0x1ad   : > { %v2581_v61 = vpop.permute.xlu0 %2580  ;;  %v2915_v5 = vsel %vm1570_vm8, %v2883_v60, %v2627_v58  ;;  %v557_v58 = vld [vmem:[#allocation2 + $0xc8] sm:$0xff]  ;;  %v2047_v60 = vld [vmem:[#allocation3 + $0x150] sm:$0xff] }
 0x1ae   : > { %1345 = vrot.lane.b32.xlu1 %v5022_v21, %s4068_s27  ;;  %v2885_v7 = vsel %vm1537_vm7, %v2853_v13, %v2581_v61 }
 0x1af   : > { %1299 = vrot.lane.b32.xlu0 %v5044_v57, %s4067_s22 }
 0x1b0   : > { %v5057_v0 = vpop.permute.xlu1 %1053 }
 0x1b1   : > { %v5060_v2 = vpop.permute.xlu0 %1007 }
 0x1b2   : > { %2586 = vrot.lane.b32.xlu1 %v2064_v29, %s4066_s17  ;;  %v5118_v29 = vpack.c.bf16 %v2285_v25, %v2284_v4  ;;  %v1386_v17 = vsel %vm332_vm0, %v4821_v41, %v5060_v2  ;;  %v5196_v4 = vpack.c.bf16 %v2096_v44, %v2095_v18  ;;  %v2288_v44 = vld [vmem:[#allocation3 + $0x16a] sm:$0xff] }
 0x1b3   : > { %2540 = vrot.lane.b32.xlu0 %v5054_v33, %s4065_s11 }
 0x1b4   : > { %v2675_v56 = vpop.permute.xlu1 %2674 }
 0x1b5   : > { %v2947_v53 = vsel %vm1603_vm9, %v2915_v5, %v2675_v56  ;;  %v2629_v9 = vpop.permute.xlu0 %2628  ;;  %v2048_v5 = vld [vmem:[#allocation3 + $0x158] sm:$0xff] }
 0x1b6   : > { %1347 = vrot.lane.b32.xlu1 %v5064_v49, %s4068_s27  ;;  %3829 = vmatprep.mubr.msk.bf16.mxu0 %vm1679_vm10, %v2947_v53  ;;  %v5171_v6 = vpack.c.bf16 %v2048_v5, %v2047_v60 }
 0x1b7   : > { %1013 = vrot.lane.b32.xlu0 %v5000_v45, %s4062_s8  ;;  %v2917_v45 = vsel %vm1570_vm8, %v2885_v7, %v2629_v9  ;;  %v5185_v7 = vpack.c.bf16 %v856_v15, %v855_v63 }
 0x1b8   : > { %v5084_v12 = vpop.permute.xlu1 %1101 }
 0x1b9   : > { %v5087_v10 = vpop.permute.xlu0 %1055 }
 0x1ba   : > { %2634 = vrot.lane.b32.xlu1 %v5036_v50, %s4067_s22  ;;  %v1425_v13 = vsel %vm1405_vm3, %v1386_v17, %v5087_v10  ;;  %v1893_v10 = vld [vmem:[#allocation3 + $0xc0] sm:$0xff]  ;;  %v2241_v17 = vld [vmem:[#allocation3 + $0x171] sm:$0xff] }
 0x1bb   : > { %2588 = vrot.lane.b32.xlu0 %v5081_v14, %s4066_s17 }
 0x1bc   : > { %v2677_v8 = vpop.permute.xlu1 %2676 }
 0x1bd   : > { %v2949_v16 = vsel %vm1603_vm9, %v2917_v45, %v2677_v8  ;;  %v5097_v22 = vpop.permute.xlu0 %2342 }
 0x1be   : > { %1061 = vrot.lane.b32.xlu1 %v5022_v21, %s4061_s30  ;;  %3830 = vmatmul.mubr.msk.bf16.gmra.mrb[12].mxu0 %vm1679_vm10, %v2949_v16 }
 0x1bf   : > { %1015 = vrot.lane.b32.xlu0 %v5044_v57, %s4062_s8 }
 0x1c0   : > { %v1150_v24 = vpop.permute.xlu1 %1149 }
 0x1c1   : > { %v5106_v27 = vpop.permute.xlu0 %1103 }
 0x1c2   : > { %2682 = vrot.lane.b32.xlu1 %v5054_v33, %s4068_s27  ;;  %v1458_v45 = vsel %vm1438_vm4, %v1425_v13, %v5106_v27 }
 0x1c3   : > { %2636 = vrot.lane.b32.xlu0 %v5104_v23, %s4067_s22 }
 0x1c4   : > { %v5112_v28 = vpop.permute.xlu1 %2390 }
 0x1c5   : > { %v5114_v21 = vpop.permute.xlu0 %2344 }
 0x1c6   : > { %1109 = vrot.lane.b32.xlu1 %v5030_v40, %s4063_s9 }
 0x1c7   : > { %1063 = vrot.lane.b32.xlu0 %v5064_v49, %s4061_s30 }
 0x1c8   : > { %v1198_v32 = vpop.permute.xlu1 %1197 }
 0x1c9   : > { %v1152_v38 = vpop.permute.xlu0 %1151 }
 0x1ca   : > { %2684 = vrot.lane.b32.xlu1 %v5118_v29, %s4068_s27  ;;  %v1491_v41 = vsel %vm1471_vm5, %v1458_v45, %v1152_v38 }
 0x1cb   : > { %2350 = vrot.lane.b32.xlu0 %v5036_v50, %s4062_s8  ;;  %v556_v50 = vld [vmem:[#allocation2 + $0xc0] sm:$0xff] }
 0x1cc   : > { %v5128_v3 = vpop.permute.xlu1 %2438  ;;  %v580_v61 = vpack.c.bf16 %v557_v58, %v556_v50  ;;  %v2144_v50 = vld [vmem:[#allocation3 + $0x15a] sm:$0xff] }
 0x1cd   : > { %v5130_v46 = vpop.permute.xlu0 %2392 }
 0x1ce   : > { %1157 = vrot.lane.b32.xlu1 %v5044_v57, %s4064_s10  ;;  %v1383_v35 = vsel %vm332_vm0, %v580_v61, %v5038_v51 }
 0x1cf   : > { %1111 = vrot.lane.b32.xlu0 %v5126_v43, %s4063_s9  ;;  %v1423_v36 = vsel %vm1405_vm3, %v1383_v35, %v5057_v0 }
 0x1d0   : > { %v1246_v48 = vpop.permute.xlu1 %1245  ;;  %v1456_v47 = vsel %vm1438_vm4, %v1423_v36, %v5084_v12 }
 0x1d1   : > { %v1200_v55 = vpop.permute.xlu0 %1199  ;;  %v1489_v56 = vsel %vm1471_vm5, %v1456_v47, %v1150_v24 }
 0x1d2   : > { %2398 = vrot.lane.b32.xlu1 %v5054_v33, %s4061_s30  ;;  %v807_v33 = vld [vmem:[#allocation2 + $0x15a] sm:$0xff]  ;;  %v1522_v42 = vsel %vm1504_vm6, %v1489_v56, %v1198_v32  ;;  %v1524_v16 = vsel %vm1504_vm6, %v1491_v41, %v1200_v55  ;;  %v903_v32 = vld [vmem:[#allocation2 + $0x169] sm:$0xff] }
 0x1d3   : > { %2352 = vrot.lane.b32.xlu0 %v5104_v23, %s4062_s8  ;;  %v5158_v1 = vpack.c.bf16 %v807_v33, %v806_v31  ;;  %v1555_v0 = vsel %vm1537_vm7, %v1522_v42, %v1246_v48  ;;  %v5207_v52 = vpack.c.bf16 %v904_v34, %v903_v32  ;;  %v2143_v55 = vld [vmem:[#allocation3 + $0x152] sm:$0xff]  ;;  %v951_v31 = vld [vmem:[#allocation2 + $0x16a] sm:$0xff]  ;;  %v952_v33 = vld [vmem:[#allocation2 + $0x172] sm:$0xff] }
 0x1d4   : > { %v5142_v39 = vpop.permute.xlu1 %2486  ;;  %v2192_v56 = vld [vmem:[#allocation3 + $0x168] sm:$0xff]  ;;  %v2193_v42 = vld [vmem:[#allocation3 + $0x170] sm:$0xff] }
 0x1d5   : > { %v5144_v57 = vpop.permute.xlu0 %2440  ;;  %v2289_v41 = vld [vmem:[#allocation3 + $0x172] sm:$0xff] }
 0x1d6   : > { %1205 = vrot.lane.b32.xlu1 %v5064_v49, %s4065_s11 }
 0x1d7   : > { %1159 = vrot.lane.b32.xlu0 %v5140_v59, %s4064_s10 }
 0x1d8   : > { %v1294_v62 = vpop.permute.xlu1 %1293 }
 0x1d9   : > { %v1248_v26 = vpop.permute.xlu0 %1247  ;;  %v1588_v53 = vsel %vm1570_vm8, %v1555_v0, %v1294_v62  ;;  %v5217_v62 = vpack.c.bf16 %v2144_v50, %v2143_v55  ;;  %v560_v50 = vld [vmem:[#allocation2 + $0xf0] sm:$0xff] }
 0x1da   : > { %2446 = vrot.lane.b32.xlu1 %v5081_v14, %s4063_s9  ;;  %v1557_v24 = vsel %vm1537_vm7, %v1524_v16, %v1248_v26  ;;  %v5286_v16 = vpack.c.bf16 %v2289_v41, %v2288_v44  ;;  %v1898_v44 = vld [vmem:[#allocation3 + $0xf8] sm:$0xff] }
 0x1db   : > { %2400 = vrot.lane.b32.xlu0 %v5118_v29, %s4061_s30 }
 0x1dc   : > { %v2535_v49 = vpop.permute.xlu1 %2534 }
 0x1dd   : > { %v5163_v51 = vpop.permute.xlu0 %2488 }
 0x1de   : > { %1253 = vrot.lane.b32.xlu1 %v5126_v43, %s4066_s17 }
 0x1df   : > { %1207 = vrot.lane.b32.xlu0 %v5158_v1, %s4065_s11 }
 0x1e0   : > { %v1342_v9 = vpop.permute.xlu1 %1341 }
 0x1e1   : > { %v1296_v11 = vpop.permute.xlu0 %1295  ;;  %v1621_v12 = vsel %vm1603_vm9, %v1588_v53, %v1342_v9  ;;  %v5247_v9 = vpack.c.bf16 %v2193_v42, %v2192_v56  ;;  %v2052_v56 = vld [vmem:[#allocation3 + $0x188] sm:$0xff] }
 0x1e2   : > { %2494 = vrot.lane.b32.xlu1 %v5104_v23, %s4064_s10  ;;  %3791 = vmatprep.mubr.msk.bf16.mxu1 %vm1679_vm10, %v1621_v12  ;;  %v1894_v23 = vld [vmem:[#allocation3 + $0xc8] sm:$0xff]  ;;  %v1590_v27 = vsel %vm1570_vm8, %v1557_v24, %v1296_v11  ;;  %v715_v24 = vld [vmem:[#allocation2 + $0x188] sm:$0xff] }
 0x1e3   : > { %2448 = vrot.lane.b32.xlu0 %v5171_v6, %s4063_s9  ;;  %v1917_v48 = vpack.c.bf16 %v1894_v23, %v1893_v10  ;;  %v2240_v12 = vld [vmem:[#allocation3 + $0x169] sm:$0xff] }
 0x1e4   : > { %v2583_v8 = vpop.permute.xlu1 %2582  ;;  %v5272_v45 = vpack.c.bf16 %v2241_v17, %v2240_v12  ;;  %v714_v23 = vld [vmem:[#allocation2 + $0x180] sm:$0xff] }
 0x1e5   : > { %v2537_v2 = vpop.permute.xlu0 %2536  ;;  %v2720_v61 = vsel %vm332_vm0, %v1917_v48, %v5097_v22  ;;  %v762_v48 = vld [vmem:[#allocation2 + $0x181] sm:$0xff] }
 0x1e6   : > { %1301 = vrot.lane.b32.xlu1 %v5140_v59, %s4067_s22 }
 0x1e7   : > { %1255 = vrot.lane.b32.xlu0 %v5185_v7, %s4066_s17 }
 0x1e8   : > { %v1344_v25 = vpop.permute.xlu1 %1343 }
 0x1e9   : > { %v1623_v37 = vsel %vm1603_vm9, %v1590_v27, %v1344_v25  ;;  %v5200_v38 = vpop.permute.xlu0 %1009  ;;  %v731_v25 = vpack.c.bf16 %v715_v24, %v714_v23  ;;  %v5362_v24 = vld [vmem:[%s5711_s4] ss:$0 sm:$0xff] }
 0x1ea   : > { %2542 = vrot.lane.b32.xlu1 %v5118_v29, %s4065_s11  ;;  %3792 = vmatmul.mubr.msk.bf16.vlgmr.msra.gmra.mrb[0].mxu1 %vm1679_vm10, %v1623_v37  ;;  %v2759_v29 = vsel %vm1405_vm3, %v2720_v61, %v5112_v28  ;;  %v5230_v28 = vpack.c.bf16 %v952_v33, %v951_v31  ;;  %v810_v33 = vld [vmem:[#allocation2 + $0x182] sm:$0xff] }
 0x1eb   : > { %2496 = vrot.lane.b32.xlu0 %v5196_v4, %s4064_s10  ;;  %v2791_v26 = vsel %vm1438_vm4, %v2759_v29, %v5128_v3 }
 0x1ec   : > { %v2631_v19 = vpop.permute.xlu1 %2630  ;;  %v2823_v22 = vsel %vm1471_vm5, %v2791_v26, %v5142_v39  ;;  %v811_v26 = vld [vmem:[#allocation2 + $0x18a] sm:$0xff] }
 0x1ed   : > { %v2585_v58 = vpop.permute.xlu0 %2584  ;;  %v2855_v47 = vsel %vm1504_vm6, %v2823_v22, %v2535_v49  ;;  %v2723_v49 = vsel %vm332_vm0, %v4808_v20, %v5114_v21 }
 0x1ee   : > { %1349 = vrot.lane.b32.xlu1 %v5158_v1, %s4068_s27  ;;  %v2887_v60 = vsel %vm1537_vm7, %v2855_v47, %v2583_v8  ;;  %v2761_v53 = vsel %vm1405_vm3, %v2723_v49, %v5130_v46 }
 0x1ef   : > { %1303 = vrot.lane.b32.xlu0 %v5207_v52, %s4067_s22  ;;  %v2919_v3 = vsel %vm1570_vm8, %v2887_v60, %v2631_v19  ;;  %v2793_v63 = vsel %vm1438_vm4, %v2761_v53, %v5144_v57  ;;  %v763_v19 = vld [vmem:[#allocation2 + $0x189] sm:$0xff]  ;;  %v827_v60 = vpack.c.bf16 %v811_v26, %v810_v33 }
 0x1f0   : > { %v5221_v35 = vpop.permute.xlu1 %1057  ;;  %v2825_v20 = vsel %vm1471_vm5, %v2793_v63, %v5163_v51  ;;  %v859_v63 = vld [vmem:[#allocation2 + $0x198] sm:$0xff] }
 0x1f1   : > { %v5225_v36 = vpop.permute.xlu0 %1011  ;;  %v2857_v11 = vsel %vm1504_vm6, %v2825_v20, %v2537_v2 }
 0x1f2   : > { %2590 = vrot.lane.b32.xlu1 %v5171_v6, %s4066_s17  ;;  %v2889_v46 = vsel %vm1537_vm7, %v2857_v11, %v2585_v58  ;;  %v561_v58 = vld [vmem:[#allocation2 + $0xf8] sm:$0xff] }
 0x1f3   : > { %2544 = vrot.lane.b32.xlu0 %v5217_v62, %s4065_s11 }
 0x1f4   : > { %v2679_v5 = vpop.permute.xlu1 %2678 }
 0x1f5   : > { %v2951_v39 = vsel %vm1603_vm9, %v2919_v3, %v2679_v5  ;;  %v2633_v0 = vpop.permute.xlu0 %2632  ;;  %v2051_v5 = vld [vmem:[#allocation3 + $0x180] sm:$0xff] }
 0x1f6   : > { %1351 = vrot.lane.b32.xlu1 %v5230_v28, %s4068_s27  ;;  %3833 = vmatprep.mubr.msk.bf16.mxu0 %vm1679_vm10, %v2951_v39 }
 0x1f7   : > { %1017 = vrot.lane.b32.xlu0 %v5140_v59, %s4062_s8  ;;  %v2921_v59 = vsel %vm1570_vm8, %v2889_v46, %v2633_v0  ;;  %v5331_v0 = vpack.c.bf16 %v2052_v56, %v2051_v5  ;;  %v1392_v46 = vsel %vm332_vm0, %v4891_v54, %v5225_v36 }
 0x1f8   : > { %v5251_v15 = vpop.permute.xlu1 %1105 }
 0x1f9   : > { %v5255_v21 = vpop.permute.xlu0 %1059 }
 0x1fa   : > { %2638 = vrot.lane.b32.xlu1 %v5196_v4, %s4067_s22 }
 0x1fb   : > { %2592 = vrot.lane.b32.xlu0 %v5247_v9, %s4066_s17 }
 0x1fc   : > { %v2681_v57 = vpop.permute.xlu1 %2680 }
 0x1fd   : > { %v2953_v13 = vsel %vm1603_vm9, %v2921_v59, %v2681_v57  ;;  %v5265_v51 = vpop.permute.xlu0 %2346  ;;  %v1429_v59 = vsel %vm1405_vm3, %v1392_v46, %v5255_v21  ;;  %v1897_v21 = vld [vmem:[#allocation3 + $0xf0] sm:$0xff] }
 0x1fe   : > { %1065 = vrot.lane.b32.xlu1 %v5158_v1, %s4061_s30  ;;  %3834 = vmatmul.mubr.msk.bf16.gmra.mrb[16].mxu0 %vm1679_vm10, %v2953_v13  ;;  %v2099_v13 = vld [vmem:[#allocation3 + $0x181] sm:$0xff]  ;;  %v955_v46 = vld [vmem:[#allocation2 + $0x19a] sm:$0xff] }
 0x1ff   : > { %1019 = vrot.lane.b32.xlu0 %v5207_v52, %s4062_s8 }
 0x200   : > { %v1154_v8 = vpop.permute.xlu1 %1153 }
 0x201   : > { %v5274_v18 = vpop.permute.xlu0 %1107 }
 0x202   : > { %2686 = vrot.lane.b32.xlu1 %v5217_v62, %s4068_s27  ;;  %v1462_v12 = vsel %vm1438_vm4, %v1429_v59, %v5274_v18  ;;  %v956_v59 = vld [vmem:[#allocation2 + $0x1a2] sm:$0xff] }
 0x203   : > { %2640 = vrot.lane.b32.xlu0 %v5272_v45, %s4067_s22 }
 0x204   : > { %v5280_v2 = vpop.permute.xlu1 %2394 }
 0x205   : > { %v5282_v1 = vpop.permute.xlu0 %2348 }
 0x206   : > { %1113 = vrot.lane.b32.xlu1 %v5185_v7, %s4063_s9 }
 0x207   : > { %1067 = vrot.lane.b32.xlu0 %v5230_v28, %s4061_s30 }
 0x208   : > { %v1202_v10 = vpop.permute.xlu1 %1201 }
 0x209   : > { %v1156_v27 = vpop.permute.xlu0 %1155 }
 0x20a   : > { %2688 = vrot.lane.b32.xlu1 %v5286_v16, %s4068_s27  ;;  %v1495_v54 = vsel %vm1471_vm5, %v1462_v12, %v1156_v27  ;;  %v907_v27 = vld [vmem:[#allocation2 + $0x199] sm:$0xff] }
 0x20b   : > { %2354 = vrot.lane.b32.xlu0 %v5196_v4, %s4062_s8  ;;  %v779_v4 = vpack.c.bf16 %v763_v19, %v762_v48  ;;  %v1919_v19 = vpack.c.bf16 %v1898_v44, %v1897_v21  ;;  %v2245_v21 = vld [vmem:[#allocation3 + $0x1a1] sm:$0xff] }
 0x20c   : > { %v5294_v32 = vpop.permute.xlu1 %2442 }
 0x20d   : > { %v5296_v34 = vpop.permute.xlu0 %2396 }
 0x20e   : > { %1161 = vrot.lane.b32.xlu1 %v5207_v52, %s4064_s10  ;;  %v582_v52 = vpack.c.bf16 %v561_v58, %v560_v50 }
 0x20f   : > { %1115 = vrot.lane.b32.xlu0 %v731_v25, %s4063_s9 }
 0x210   : > { %v1250_v37 = vpop.permute.xlu1 %1249  ;;  %v1389_v22 = vsel %vm332_vm0, %v582_v52, %v5200_v38  ;;  %v2147_v52 = vld [vmem:[#allocation3 + $0x182] sm:$0xff] }
 0x211   : > { %v1204_v55 = vpop.permute.xlu0 %1203  ;;  %v1427_v47 = vsel %vm1405_vm3, %v1389_v22, %v5221_v35 }
 0x212   : > { %2402 = vrot.lane.b32.xlu1 %v5217_v62, %s4061_s30 }
 0x213   : > { %2356 = vrot.lane.b32.xlu0 %v5272_v45, %s4062_s8 }
 0x214   : > { %v5305_v61 = vpop.permute.xlu1 %2490 }
 0x215   : > { %v5307_v29 = vpop.permute.xlu0 %2444 }
 0x216   : > { %1209 = vrot.lane.b32.xlu1 %v5230_v28, %s4065_s11  ;;  %v1460_v28 = vsel %vm1438_vm4, %v1427_v47, %v5251_v15  ;;  %v860_v15 = vld [vmem:[#allocation2 + $0x1a0] sm:$0xff] }
 0x217   : > { %1163 = vrot.lane.b32.xlu0 %v779_v4, %s4064_s10  ;;  %v1493_v42 = vsel %vm1471_vm5, %v1460_v28, %v1154_v8  ;;  %v876_v57 = vpack.c.bf16 %v860_v15, %v859_v63  ;;  %v2100_v8 = vld [vmem:[#allocation3 + $0x189] sm:$0xff]  ;;  %v2197_v63 = vld [vmem:[#allocation3 + $0x1a0] sm:$0xff] }
 0x218   : > { %v1298_v31 = vpop.permute.xlu1 %1297  ;;  %v1526_v39 = vsel %vm1504_vm6, %v1493_v42, %v1202_v10  ;;  %v5356_v10 = vpack.c.bf16 %v2100_v8, %v2099_v13  ;;  %v3278_v42 = vld [vmem:[%s5712_s5] sm:$0xf] }
 0x219   : > { %v1252_v62 = vpop.permute.xlu0 %1251  ;;  %v1559_v35 = vsel %vm1537_vm7, %v1526_v39, %v1250_v37  ;;  %3960 = vmatprep.subr.msk.bf16.mxu1 %vm1712_vm2, %v3278_v42 }
 0x21a   : > { %2450 = vrot.lane.b32.xlu1 %v5247_v9, %s4063_s9  ;;  %v1592_v49 = vsel %vm1570_vm8, %v1559_v35, %v1298_v31  ;;  %v2148_v31 = vld [vmem:[#allocation3 + $0x18a] sm:$0xff] }
 0x21b   : > { %2404 = vrot.lane.b32.xlu0 %v5286_v16, %s4061_s30  ;;  %v2164_v56 = vpack.c.bf16 %v2148_v31, %v2147_v52 }
 0x21c   : > { %v5322_v3 = vpop.permute.xlu1 %2538 }
 0x21d   : > { %v5325_v38 = vpop.permute.xlu0 %2492 }
 0x21e   : > { %1257 = vrot.lane.b32.xlu1 %v731_v25, %s4066_s17  ;;  %v908_v25 = vld [vmem:[#allocation2 + $0x1a1] sm:$0xff] }
 0x21f   : > { %1211 = vrot.lane.b32.xlu0 %v827_v60, %s4065_s11 }
 0x220   : > { %v1346_v53 = vpop.permute.xlu1 %1345 }
 0x221   : > { %v1625_v20 = vsel %vm1603_vm9, %v1592_v49, %v1346_v53  ;;  %v1300_v11 = vpop.permute.xlu0 %1299  ;;  %v2196_v53 = vld [vmem:[#allocation3 + $0x198] sm:$0xff] }
 0x222   : > { %2498 = vrot.lane.b32.xlu1 %v5272_v45, %s4064_s10  ;;  %3795 = vmatprep.mubr.msk.bf16.mxu1 %vm1679_vm10, %v1625_v20  ;;  %v1528_v45 = vsel %vm1504_vm6, %v1495_v54, %v1204_v55 }
 0x223   : > { %2452 = vrot.lane.b32.xlu0 %v5331_v0, %s4063_s9  ;;  %v1561_v41 = vsel %vm1537_vm7, %v1528_v45, %v1252_v62  ;;  %v972_v45 = vpack.c.bf16 %v956_v59, %v955_v46  ;;  %v564_v59 = vld [vmem:[#allocation2 + $0x120] sm:$0xff] }
 0x224   : > { %v5347_v17 = vpop.permute.xlu1 %2586  ;;  %v1594_v18 = vsel %vm1570_vm8, %v1561_v41, %v1300_v11 }
 0x225   : > { %v5350_v36 = vpop.permute.xlu0 %2540 }
 0x226   : > { %1305 = vrot.lane.b32.xlu1 %v779_v4, %s4067_s22  ;;  %v924_v4 = vpack.c.bf16 %v908_v25, %v907_v27  ;;  %v2292_v27 = vld [vmem:[#allocation3 + $0x19a] sm:$0xff]  ;;  %v2293_v25 = vld [vmem:[#allocation3 + $0x1a2] sm:$0xff] }
 0x227   : > { %1259 = vrot.lane.b32.xlu0 %v876_v57, %s4066_s17 }
 0x228   : > { %v1348_v23 = vpop.permute.xlu1 %1347 }
 0x229   : > { %v1627_v37 = vsel %vm1603_vm9, %v1594_v18, %v1348_v23  ;;  %v5365_v48 = vpop.permute.xlu0 %1013  ;;  %v2729_v23 = vsel %vm332_vm0, %v4945_v30, %v5282_v1 }
 0x22a   : > { %v3819_v55 = vpop.f32.mrb[0].mxu0  ;;  %2546 = vrot.lane.b32.xlu1 %v5286_v16, %s4065_s11  ;;  %3796 = vmatmul.mubr.msk.bf16.gmra.mrb[4].mxu1 %vm1679_vm10, %v1627_v37  ;;  %v2726_v16 = vsel %vm332_vm0, %v1919_v19, %v5265_v51  ;;  %v3335_v51 = vsel %vm1712_vm2, %v3278_v42, 0 }
 0x22b   : > { %v3893_v50 = vadd.f32 %v3819_v55, %v5362_v24  ;;  %2500 = vrot.lane.b32.xlu0 %v5356_v10, %s4064_s10  ;;  %v3071_v58 = vpop.f32.mrb[1].mxu0  ;;  %v2763_v39 = vsel %vm1405_vm3, %v2726_v16, %v5280_v2  ;;  %3850 = vmatpush3.bf16.msra.mxu1 %v3335_v51 }
 0x22c   : > { %v3894_v33 = vadd.f32 %v5362_v24, %v3071_v58  ;;  %v3820_v26 = vpop.f32.mrb[2].mxu0  ;;  %v2635_v62 = vpop.permute.xlu1 %2634 }
 0x22d   : > { %v3895_v22 = vadd.f32 %v3820_v26, %v5362_v24  ;;  %v2589_v47 = vpop.permute.xlu0 %2588  ;;  %v3074_v28 = vpop.f32.mrb[3].mxu0  ;;  %v3232_v35 = vmax.f32 %v3893_v50, 0.0  ;;  %v2309_v50 = vpack.c.bf16 %v2293_v25, %v2292_v27 }
 0x22e   : > { %v3896_v5 = vadd.f32 %v5362_v24, %v3074_v28  ;;  %1353 = vrot.lane.b32.xlu1 %v827_v60, %s4068_s27  ;;  %v2795_v60 = vsel %vm1438_vm4, %v2763_v39, %v5294_v32  ;;  %v3230_v15 = vmax.f32 %v3894_v33, 0.0  ;;  %v2213_v32 = vpack.c.bf16 %v2197_v63, %v2196_v53 }
 0x22f   : > { %v3233_v49 = vmax.f32 %v3895_v22, 0.0  ;;  %1307 = vrot.lane.b32.xlu0 %v924_v4, %s4067_s22  ;;  %v2827_v2 = vsel %vm1471_vm5, %v2795_v60, %v5305_v61  ;;  %v2244_v61 = vld [vmem:[#allocation3 + $0x199] sm:$0xff] }
 0x230   : > { %v3231_v20 = vmax.f32 %v3896_v5, 0.0  ;;  %v5389_v11 = vpop.permute.xlu1 %1061  ;;  %v2859_v13 = vsel %vm1504_vm6, %v2827_v2, %v5322_v3  ;;  %v565_v2 = vld [vmem:[#allocation2 + $0x128] sm:$0xff] }
 0x231   : > { %v5393_v57 = vpack.c.bf16 %v3233_v49, %v3232_v35  ;;  %v5395_v12 = vpop.permute.xlu0 %1015  ;;  %v2891_v54 = vsel %vm1537_vm7, %v2859_v13, %v5347_v17  ;;  %v2765_v17 = vsel %vm1405_vm3, %v2729_v23, %v5296_v34 }
 0x232   : > { %v5399_v8 = vpack.c.bf16 %v3231_v20, %v3230_v15  ;;  %2594 = vrot.lane.b32.xlu1 %v5331_v0, %s4066_s17  ;;  %v2923_v44 = vsel %vm1570_vm8, %v2891_v54, %v2635_v62  ;;  %v2261_v0 = vpack.c.bf16 %v2245_v21, %v2244_v61  ;;  %v2797_v37 = vsel %vm1438_vm4, %v2765_v17, %v5307_v29 }
 0x233   : > { %2548 = vrot.lane.b32.xlu0 %v2164_v56, %s4065_s11  ;;  %v2829_v55 = vsel %vm1471_vm5, %v2797_v37, %v5325_v38  ;;  %v584_v54 = vpack.c.bf16 %v565_v2, %v564_v59 }
 0x234   : > { %v2683_v41 = vpop.permute.xlu1 %2682  ;;  %v2861_v1 = vsel %vm1504_vm6, %v2829_v55, %v5350_v36 }
 0x235   : > { %v2955_v18 = vsel %vm1603_vm9, %v2923_v44, %v2683_v41  ;;  %v2637_v3 = vpop.permute.xlu0 %2636  ;;  %v2893_v34 = vsel %vm1537_vm7, %v2861_v1, %v2589_v47  ;;  %v1395_v21 = vsel %vm332_vm0, %v584_v54, %v5365_v48  ;;  %v1398_v48 = vsel %vm332_vm0, %v5030_v40, %v5395_v12 }
 0x236   : > { %2596 = vrot.lane.b32.xlu1 %v2213_v32, %s4066_s17  ;;  %3837 = vmatprep.mubr.msk.bf16.mxu0 %vm1679_vm10, %v2955_v18  ;;  %v2925_v58 = vsel %vm1570_vm8, %v2893_v34, %v2637_v3  ;;  %v1431_v44 = vsel %vm1405_vm3, %v1395_v21, %v5389_v11 }
 0x237   : > { %1355 = vrot.lane.b32.xlu0 %v972_v45, %s4068_s27 }
 0x238   : > { %v1110_v19 = vpop.permute.xlu1 %1109 }
 0x239   : > { %v1064_v30 = vpop.permute.xlu0 %1063  ;;  %v1464_v41 = vsel %vm1438_vm4, %v1431_v44, %v1110_v19 }
 0x23a   : > { %2644 = vrot.lane.b32.xlu1 %v2261_v0, %s4067_s22  ;;  %v1433_v11 = vsel %vm1405_vm3, %v1398_v48, %v1064_v30 }
 0x23b   : > { %2642 = vrot.lane.b32.xlu0 %v5356_v10, %s4067_s22  ;;  %s5610_s22 = scalar_lea.vmem %s5714_s7, %s4337_s26 }
 0x23c   : > { %v2685_v4 = vpop.permute.xlu1 %2684 }
 0x23d   : > { %v2957_v29 = vsel %vm1603_vm9, %v2925_v58, %v2685_v4  ;;  %v5428_v52 = vpop.permute.xlu0 %2350  ;;  %v1901_v4 = vld [vmem:[#allocation3 + $0x120] sm:$0xff] }
 0x23e   : > { %2692 = vrot.lane.b32.xlu1 %v2309_v50, %s4068_s27  ;;  %3838 = vmatmul.mubr.msk.bf16.gmra.mrb[20].mxu0 %vm1679_vm10, %v2957_v29  ;;  %v1902_v29 = vld [vmem:[#allocation3 + $0x128] sm:$0xff] }
 0x23f   : > { %2690 = vrot.lane.b32.xlu0 %v2164_v56, %s4068_s27  ;;  %v1921_v30 = vpack.c.bf16 %v1902_v29, %v1901_v4 }
 0x240   : > { %v1158_v38 = vpop.permute.xlu1 %1157 }
 0x241   : > { %v1112_v36 = vpop.permute.xlu0 %1111  ;;  %v1497_v3 = vsel %vm1471_vm5, %v1464_v41, %v1158_v38 }
 0x242   : > { %v1466_v19 = vsel %vm1438_vm4, %v1433_v11, %v1112_v36 }
 0x244   : > { %v5433_v31 = vpop.permute.xlu1 %2398 }
 0x245   : > { %v5435_v33 = vpop.permute.xlu0 %2352 }
 0x248   : > { %v1206_v10 = vpop.permute.xlu1 %1205 }
 0x249   : > { %v1160_v26 = vpop.permute.xlu0 %1159  ;;  %v1530_v0 = vsel %vm1504_vm6, %v1497_v3, %v1206_v10 }
 0x24a   : > { %v3823_v62 = vpop.f32.mrb[4].mxu0  ;;  %v1499_v50 = vsel %vm1471_vm5, %v1466_v19, %v1160_v26 }
 0x24b   : > { %v3897_v22 = vadd.f32 %v3823_v62, %v5362_v24  ;;  %v3087_v47 = vpop.f32.mrb[5].mxu0 }
 0x24c   : > { %v3898_v28 = vadd.f32 %v5362_v24, %v3087_v47  ;;  %v3824_v16 = vpop.f32.mrb[6].mxu0  ;;  %v5439_v5 = vpop.permute.xlu1 %2446 }
 0x24d   : > { %v3899_v42 = vadd.f32 %v3824_v16, %v5362_v24  ;;  %v5442_v56 = vpop.permute.xlu0 %2400  ;;  %v3090_v39 = vpop.f32.mrb[7].mxu0  ;;  %v3236_v49 = vmax.f32 %v3897_v22, 0.0 }
 0x24e   : > { %v3900_v35 = vadd.f32 %v5362_v24, %v3090_v39  ;;  %v3234_v63 = vmax.f32 %v3898_v28, 0.0 }
 0x24f   : > { %v3237_v53 = vmax.f32 %v3899_v42, 0.0 }
 0x250   : > { %v3235_v51 = vmax.f32 %v3900_v35, 0.0  ;;  %v1254_v60 = vpop.permute.xlu1 %1253 }
 0x251   : > { %v5445_v15 = vpack.c.bf16 %v3237_v53, %v3236_v49  ;;  %v1208_v20 = vpop.permute.xlu0 %1207  ;;  %v1563_v17 = vsel %vm1537_vm7, %v1530_v0, %v1254_v60  ;;  %v2732_v49 = vsel %vm332_vm0, %v1921_v30, %v5428_v52 }
 0x252   : > { %v5447_v46 = vpack.c.bf16 %v3235_v51, %v3234_v63  ;;  %v1532_v58 = vsel %vm1504_vm6, %v1499_v50, %v1208_v20  ;;  %v2767_v63 = vsel %vm1405_vm3, %v2732_v49, %v5433_v31 }
 0x253   : > { %v2799_v20 = vsel %vm1438_vm4, %v2767_v63, %v5439_v5 }
 0x254   : > { %v2495_v13 = vpop.permute.xlu1 %2494 }
 0x255   : > { %v5449_v32 = vpop.permute.xlu0 %2448 }
 0x258   : > { %v1302_v45 = vpop.permute.xlu1 %1301 }
 0x259   : > { %v1256_v61 = vpop.permute.xlu0 %1255  ;;  %v1596_v27 = vsel %vm1570_vm8, %v1563_v17, %v1302_v45  ;;  %v2831_v45 = vsel %vm1471_vm5, %v2799_v20, %v2495_v13  ;;  %v2735_v13 = vsel %vm332_vm0, %v5081_v14, %v5435_v33 }
 0x25a   : > { %v1565_v38 = vsel %vm1537_vm7, %v1532_v58, %v1256_v61  ;;  %v2769_v17 = vsel %vm1405_vm3, %v2735_v13, %v5442_v56 }
 0x25c   : > { %v2543_v18 = vpop.permute.xlu1 %2542 }
 0x25d   : > { %v2497_v23 = vpop.permute.xlu0 %2496  ;;  %v2863_v52 = vsel %vm1504_vm6, %v2831_v45, %v2543_v18  ;;  %v2801_v18 = vsel %vm1438_vm4, %v2769_v17, %v5449_v32 }
 0x260   : > { %v1350_v25 = vpop.permute.xlu1 %1349 }
 0x261   : > { %v1629_v37 = vsel %vm1603_vm9, %v1596_v27, %v1350_v25  ;;  %v1304_v55 = vpop.permute.xlu0 %1303  ;;  %v2833_v25 = vsel %vm1471_vm5, %v2801_v18, %v2497_v23 }
 0x262   : > { %3799 = vmatprep.mubr.msk.bf16.mxu1 %vm1679_vm10, %v1629_v37  ;;  %v1598_v10 = vsel %vm1570_vm8, %v1565_v38, %v1304_v55 }
 0x264   : > { %v2591_v1 = vpop.permute.xlu1 %2590 }
 0x265   : > { %v2545_v34 = vpop.permute.xlu0 %2544  ;;  %v2895_v31 = vsel %vm1537_vm7, %v2863_v52, %v2591_v1 }
 0x266   : > { %v2865_v55 = vsel %vm1504_vm6, %v2833_v25, %v2545_v34 }
 0x268   : > { %v1352_v62 = vpop.permute.xlu1 %1351 }
 0x269   : > { %v1631_v40 = vsel %vm1603_vm9, %v1598_v10, %v1352_v62  ;;  %v5472_v12 = vpop.permute.xlu0 %1017 }
 0x26a   : > { %v3827_v22 = vpop.f32.mrb[8].mxu0  ;;  %3800 = vmatmul.mubr.msk.bf16.gmra.mrb[8].mxu1 %vm1679_vm10, %v1631_v40  ;;  %v1401_v20 = vsel %vm332_vm0, %v5126_v43, %v5472_v12 }
 0x26b   : > { %v3901_v36 = vadd.f32 %v3827_v22, %v5362_v24  ;;  %v3103_v26 = vpop.f32.mrb[9].mxu0 }
 0x26c   : > { %v3902_v47 = vadd.f32 %v5362_v24, %v3103_v26  ;;  %v3828_v28 = vpop.f32.mrb[10].mxu0  ;;  %v2639_v16 = vpop.permute.xlu1 %2638 }
 0x26d   : > { %v3903_v42 = vadd.f32 %v3828_v28, %v5362_v24  ;;  %v2593_v39 = vpop.permute.xlu0 %2592  ;;  %v3106_v35 = vpop.f32.mrb[11].mxu0  ;;  %v3240_v51 = vmax.f32 %v3901_v36, 0.0  ;;  %v2927_v41 = vsel %vm1570_vm8, %v2895_v31, %v2639_v16 }
 0x26e   : > { %v3904_v53 = vadd.f32 %v5362_v24, %v3106_v35  ;;  %v3238_v59 = vmax.f32 %v3902_v47, 0.0  ;;  %v2897_v48 = vsel %vm1537_vm7, %v2865_v55, %v2593_v39 }
 0x26f   : > { %v3241_v60 = vmax.f32 %v3903_v42, 0.0 }
 0x270   : > { %v3239_v2 = vmax.f32 %v3904_v53, 0.0  ;;  %v1066_v54 = vpop.permute.xlu1 %1065 }
 0x271   : > { %v5486_v61 = vpack.c.bf16 %v3241_v60, %v3240_v51  ;;  %v5488_v21 = vpop.permute.xlu0 %1019 }
 0x272   : > { %v5491_v44 = vpack.c.bf16 %v3239_v2, %v3238_v59  ;;  %v1435_v59 = vsel %vm1405_vm3, %v1401_v20, %v1066_v54  ;;  %v1404_v43 = vsel %vm332_vm0, %v5185_v7, %v5488_v21 }
 0x274   : > { %v2687_v3 = vpop.permute.xlu1 %2686 }
 0x275   : > { %v2959_v5 = vsel %vm1603_vm9, %v2927_v41, %v2687_v3  ;;  %v2641_v0 = vpop.permute.xlu0 %2640 }
 0x276   : > { %3841 = vmatprep.mubr.msk.bf16.mxu0 %vm1679_vm10, %v2959_v5  ;;  %v2929_v11 = vsel %vm1570_vm8, %v2897_v48, %v2641_v0 }
 0x278   : > { %v1114_v27 = vpop.permute.xlu1 %1113 }
 0x279   : > { %v1068_v37 = vpop.permute.xlu0 %1067  ;;  %v1468_v2 = vsel %vm1438_vm4, %v1435_v59, %v1114_v27 }
 0x27a   : > { %v1437_v12 = vsel %vm1405_vm3, %v1404_v43, %v1068_v37 }
 0x27c   : > { %v2689_v19 = vpop.permute.xlu1 %2688 }
 0x27d   : > { %v2961_v14 = vsel %vm1603_vm9, %v2929_v11, %v2689_v19  ;;  %v2355_v33 = vpop.permute.xlu0 %2354 }
 0x27e   : > { %3842 = vmatmul.mubr.msk.bf16.gmra.mrb[24].mxu0 %vm1679_vm10, %v2961_v14  ;;  %v2738_v21 = vsel %vm332_vm0, %v5171_v6, %v2355_v33 }
 0x280   : > { %v1162_v56 = vpop.permute.xlu1 %1161 }
 0x281   : > { %v1116_v1 = vpop.permute.xlu0 %1115  ;;  %v1501_v52 = vsel %vm1471_vm5, %v1468_v2, %v1162_v56 }
 0x282   : > { %v1470_v18 = vsel %vm1438_vm4, %v1437_v12, %v1116_v1 }
 0x284   : > { %v2403_v50 = vpop.permute.xlu1 %2402 }
 0x285   : > { %v2357_v32 = vpop.permute.xlu0 %2356  ;;  %v2771_v1 = vsel %vm1405_vm3, %v2738_v21, %v2403_v50 }
 0x286   : > { %v2741_v56 = vsel %vm332_vm0, %v5247_v9, %v2357_v32 }
 0x288   : > { %v1210_v58 = vpop.permute.xlu1 %1209 }
 0x289   : > { %v1164_v4 = vpop.permute.xlu0 %1163  ;;  %v1534_v41 = vsel %vm1504_vm6, %v1501_v52, %v1210_v58 }
 0x28a   : > { %v1503_v25 = vsel %vm1471_vm5, %v1470_v18, %v1164_v4 }
 0x28c   : > { %v2451_v23 = vpop.permute.xlu1 %2450 }
 0x28d   : > { %v2405_v29 = vpop.permute.xlu0 %2404 }
 0x28e   : > { %v2773_v37 = vsel %vm1405_vm3, %v2741_v56, %v2405_v29 }
 0x290   : > { %v1258_v38 = vpop.permute.xlu1 %1257 }
 0x291   : > { %v1212_v34 = vpop.permute.xlu0 %1211  ;;  %v3831_v10 = vpop.f32.mrb[12].mxu0  ;;  %v1567_v3 = vsel %vm1537_vm7, %v1534_v41, %v1258_v38  ;;  %v2803_v38 = vsel %vm1438_vm4, %v2771_v1, %v2451_v23 }
 0x292   : > { %v3905_v62 = vadd.f32 %v3831_v10, %v5362_v24  ;;  %v3119_v40 = vpop.f32.mrb[13].mxu0  ;;  %v1536_v55 = vsel %vm1504_vm6, %v1503_v25, %v1212_v34 }
 0x293   : > { %v3906_v30 = vadd.f32 %v5362_v24, %v3119_v40  ;;  %v3832_v22 = vpop.f32.mrb[14].mxu0 }
 0x294   : > { %v3907_v36 = vadd.f32 %v3832_v22, %v5362_v24  ;;  %v2499_v26 = vpop.permute.xlu1 %2498  ;;  %v3122_v47 = vpop.f32.mrb[15].mxu0  ;;  %v3244_v42 = vmax.f32 %v3905_v62, 0.0 }
 0x295   : > { %v2453_v28 = vpop.permute.xlu0 %2452  ;;  %v3908_v16 = vadd.f32 %v5362_v24, %v3122_v47  ;;  %v3242_v35 = vmax.f32 %v3906_v30, 0.0  ;;  %v2835_v34 = vsel %vm1471_vm5, %v2803_v38, %v2499_v26 }
 0x296   : > { %v3245_v39 = vmax.f32 %v3907_v36, 0.0  ;;  %v2805_v58 = vsel %vm1438_vm4, %v2773_v37, %v2453_v28 }
 0x297   : > { %v3243_v49 = vmax.f32 %v3908_v16, 0.0 }
 0x298   : > { %v5514_v53 = vpack.c.bf16 %v3245_v39, %v3244_v42  ;;  %v1306_v63 = vpop.permute.xlu1 %1305 }
 0x299   : > { %v3268_v51 = vpack.c.bf16 %v3243_v49, %v3242_v35  ;;  %v1260_v60 = vpop.permute.xlu0 %1259  ;;  %v1600_v5 = vsel %vm1570_vm8, %v1567_v3, %v1306_v63 }
 0x29a   : > { %v1569_v48 = vsel %vm1537_vm7, %v1536_v55, %v1260_v60 }
 0x29c   : > { %v2547_v45 = vpop.permute.xlu1 %2546 }
 0x29d   : > { %v2501_v31 = vpop.permute.xlu0 %2500  ;;  %v2867_v33 = vsel %vm1504_vm6, %v2835_v34, %v2547_v45 }
 0x29e   : > { %v2837_v9 = vsel %vm1471_vm5, %v2805_v58, %v2501_v31 }
 0x2a0   : > { %v1354_v0 = vpop.permute.xlu1 %1353 }
 0x2a1   : > { %v1633_v13 = vsel %vm1603_vm9, %v1600_v5, %v1354_v0  ;;  %v1308_v17 = vpop.permute.xlu0 %1307 }
 0x2a2   : > { %3803 = vmatprep.mubr.msk.bf16.mxu1 %vm1679_vm10, %v1633_v13  ;;  %v1602_v19 = vsel %vm1570_vm8, %v1569_v48, %v1308_v17 }
 0x2a4   : > { %v2595_v54 = vpop.permute.xlu1 %2594 }
 0x2a5   : > { %v2549_v27 = vpop.permute.xlu0 %2548  ;;  %v2899_v50 = vsel %vm1537_vm7, %v2867_v33, %v2595_v54 }
 0x2a6   : > { %v2869_v6 = vsel %vm1504_vm6, %v2837_v9, %v2549_v27 }
 0x2a8   : > { %v2597_v11 = vpop.permute.xlu1 %2596 }
 0x2a9   : > { %v1356_v14 = vpop.permute.xlu0 %1355  ;;  %v2901_v29 = vsel %vm1537_vm7, %v2869_v6, %v2597_v11 }
 0x2aa   : > { %v1635_v7 = vsel %vm1603_vm9, %v1602_v19, %v1356_v14 }
 0x2ab   : > { %3804 = vmatmul.mubr.msk.bf16.gmra.mrb[12].mxu1 %vm1679_vm10, %v1635_v7 }
 0x2ac   : > { %3851 = vmatprep.mubr.msk.bf16.mxu1 %vm332_vm0, %v5399_v8  ;;  %v2645_v4 = vpop.permute.xlu1 %2644 }
 0x2ad   : > { %v2643_v32 = vpop.permute.xlu0 %2642  ;;  %v2933_v10 = vsel %vm1570_vm8, %v2901_v29, %v2645_v4 }
 0x2ae   : > { %v2931_v8 = vsel %vm1570_vm8, %v2899_v50, %v2643_v32 }
 0x2b0   : > { %v2693_v62 = vpop.permute.xlu1 %2692 }
 0x2b1   : > { %v2965_v23 = vsel %vm1603_vm9, %v2933_v10, %v2693_v62  ;;  %v2691_v40 = vpop.permute.xlu0 %2690 }
 0x2b2   : > { %v2963_v30 = vsel %vm1603_vm9, %v2931_v8, %v2691_v40 }
 0x2b3   : > { %3845 = vmatprep.mubr.msk.bf16.mxu0 %vm1679_vm10, %v2963_v30  ;;  %3852 = vmatmul.mubr.msk.bf16.vlgmr.msra.gmra.mrb[16].mxu1 %vm332_vm0, %v5393_v57 }
 0x2b4   : > { %3846 = vmatmul.mubr.msk.bf16.gmra.mrb[28].mxu0 %vm1679_vm10, %v2965_v23  ;;  %3855 = vmatprep.mubr.msk.bf16.mxu1 %vm332_vm0, %v5447_v46 }
 0x2bb   : > { %3856 = vmatmul.mubr.msk.bf16.gmra.mrb[20].mxu1 %vm332_vm0, %v5445_v15 }
 0x2bc   : > { %3859 = vmatprep.mubr.msk.bf16.mxu1 %vm332_vm0, %v5491_v44 }
 0x2bd   : > { %v3793_v22 = vpop.f32.mrb[0].mxu1 }
 0x2be   : > { %v1814_v36 = vpop.f32.mrb[1].mxu1  ;;  %v1823_v57 = vadd.f32 %v3793_v22, %v5362_v24 }
 0x2bf   : > { %v3794_v26 = vpop.f32.mrb[2].mxu1  ;;  %v1815_v46 = vadd.f32 %v5362_v24, %v1814_v36 }
 0x2c0   : > { %v1817_v47 = vpop.f32.mrb[3].mxu1  ;;  %v1826_v28 = vadd.f32 %v3794_v26, %v5362_v24 }
 0x2c1   : > { %v1818_v42 = vadd.f32 %v5362_v24, %v1817_v47 }
 0x2c3   : > { %3860 = vmatmul.mubr.msk.bf16.gmra.mrb[24].mxu1 %vm332_vm0, %v5486_v61 }
 0x2c4   : > { %3863 = vmatprep.mubr.msk.bf16.mxu1 %vm332_vm0, %v3268_v51 }
 0x2cb   : > { %3864 = vmatmul.mubr.msk.bf16.gmra.mrb[28].mxu1 %vm332_vm0, %v5514_v53 }
 0x2d1   : > { %v3835_v15 = vpop.f32.mrb[16].mxu0 }
 0x2d2   : > { %v3216_v44 = vadd.f32 %v3835_v15, %v1823_v57  ;;  %v3135_v16 = vpop.f32.mrb[17].mxu0 }
 0x2d3   : > { %v3214_v39 = vadd.f32 %v3135_v16, %v1815_v46  ;;  %v3836_v35 = vpop.f32.mrb[18].mxu0 }
 0x2d4   : > { %v3217_v49 = vadd.f32 %v3836_v35, %v1826_v28  ;;  %v3138_v61 = vpop.f32.mrb[19].mxu0  ;;  %v3248_v51 = vmax.f32 %v3216_v44, 0.0  ;;  %v5594_v28 = vld [vmem:[%s5713_s6] ss:$0 sm:$0xff] }
 0x2d5   : > { %v3215_v63 = vadd.f32 %v3138_v61, %v1818_v42  ;;  %v3246_v20 = vmax.f32 %v3214_v39, 0.0 }
 0x2d6   : > { %v3249_v60 = vmax.f32 %v3217_v49, 0.0 }
 0x2d7   : > { %v3247_v53 = vmax.f32 %v3215_v63, 0.0 }
 0x2d8   : > { %v3271_v59 = vpack.c.bf16 %v3249_v60, %v3248_v51 }
 0x2d9   : > { %v3270_v2 = vpack.c.bf16 %v3247_v53, %v3246_v20 }
 0x2db   : > { %3867 = vmatprep.mubr.msk.bf16.mxu1 %vm332_vm0, %v3270_v2 }
 0x2dc   : > { %3868 = vmatmul.mubr.msk.bf16.gmra.mrb[32].mxu1 %vm332_vm0, %v3271_v59 }
 0x2fd   : > { %v3797_v45 = vpop.f32.mrb[4].mxu1 }
 0x2fe   : > { %v1830_v52 = vpop.f32.mrb[5].mxu1  ;;  %v1839_v3 = vadd.f32 %v3797_v45, %v5362_v24 }
 0x2ff   : > { %v3798_v31 = vpop.f32.mrb[6].mxu1  ;;  %v1831_v5 = vadd.f32 %v5362_v24, %v1830_v52 }
 0x300   : > { %v1833_v41 = vpop.f32.mrb[7].mxu1  ;;  %v1842_v13 = vadd.f32 %v3798_v31, %v5362_v24 }
 0x301   : > { %v1834_v12 = vadd.f32 %v5362_v24, %v1833_v41 }
 0x311   : > { %v3839_v0 = vpop.f32.mrb[20].mxu0 }
 0x312   : > { %v3220_v17 = vadd.f32 %v3839_v0, %v1839_v3  ;;  %v3151_v43 = vpop.f32.mrb[21].mxu0 }
 0x313   : > { %v3218_v54 = vadd.f32 %v3151_v43, %v1831_v5  ;;  %v3840_v18 = vpop.f32.mrb[22].mxu0 }
 0x314   : > { %v3221_v27 = vadd.f32 %v3840_v18, %v1842_v13  ;;  %v3154_v25 = vpop.f32.mrb[23].mxu0  ;;  %v3252_v48 = vmax.f32 %v3220_v17, 0.0 }
 0x315   : > { %v3219_v55 = vadd.f32 %v3154_v25, %v1834_v12  ;;  %v3250_v19 = vmax.f32 %v3218_v54, 0.0 }
 0x316   : > { %v3253_v11 = vmax.f32 %v3221_v27, 0.0 }
 0x317   : > { %v3251_v14 = vmax.f32 %v3219_v55, 0.0 }
 0x318   : > { %v3273_v56 = vpack.c.bf16 %v3253_v11, %v3252_v48 }
 0x319   : > { %v3272_v7 = vpack.c.bf16 %v3251_v14, %v3250_v19 }
 0x31b   : > { %3871 = vmatprep.mubr.msk.bf16.mxu1 %vm332_vm0, %v3272_v7 }
 0x31c   : > { %3872 = vmatmul.mubr.msk.bf16.gmra.mrb[36].mxu1 %vm332_vm0, %v3273_v56 }
 0x33d   : > { %v3801_v21 = vpop.f32.mrb[8].mxu1 }
 0x33e   : > { %v1846_v37 = vpop.f32.mrb[9].mxu1  ;;  %v1855_v4 = vadd.f32 %v3801_v21, %v5362_v24 }
 0x33f   : > { %v3802_v1 = vpop.f32.mrb[10].mxu1  ;;  %v1847_v38 = vadd.f32 %v5362_v24, %v1846_v37 }
 0x340   : > { %v1849_v58 = vpop.f32.mrb[11].mxu1  ;;  %v1858_v32 = vadd.f32 %v3802_v1, %v5362_v24 }
 0x341   : > { %v1850_v33 = vadd.f32 %v5362_v24, %v1849_v58 }
 0x351   : > { %v3843_v9 = vpop.f32.mrb[24].mxu0 }
 0x352   : > { %v3224_v34 = vadd.f32 %v3843_v9, %v1855_v4  ;;  %v3167_v6 = vpop.f32.mrb[25].mxu0 }
 0x353   : > { %v3222_v29 = vadd.f32 %v3167_v6, %v1847_v38  ;;  %v3844_v50 = vpop.f32.mrb[26].mxu0 }
 0x354   : > { %v3225_v10 = vadd.f32 %v3844_v50, %v1858_v32  ;;  %v3170_v62 = vpop.f32.mrb[27].mxu0  ;;  %v3256_v23 = vmax.f32 %v3224_v34, 0.0 }
 0x355   : > { %v3223_v8 = vadd.f32 %v3170_v62, %v1850_v33  ;;  %v3254_v30 = vmax.f32 %v3222_v29, 0.0 }
 0x356   : > { %v3257_v40 = vmax.f32 %v3225_v10, 0.0 }
 0x357   : > { %v3255_v22 = vmax.f32 %v3223_v8, 0.0 }
 0x358   : > { %v3275_v36 = vpack.c.bf16 %v3257_v40, %v3256_v23 }
 0x359   : > { %v3274_v26 = vpack.c.bf16 %v3255_v22, %v3254_v30 }
 0x35b   : > { %3875 = vmatprep.mubr.msk.bf16.mxu1 %vm332_vm0, %v3274_v26 }
 0x35c   : > { %3876 = vmatmul.mubr.msk.bf16.gmra.mrb[40].mxu1 %vm332_vm0, %v3275_v36 }
 0x37e   : > { %v3805_v47 = vpop.f32.mrb[12].mxu1 }
 0x37f   : > { %v1862_v57 = vpop.f32.mrb[13].mxu1  ;;  %v1871_v44 = vadd.f32 %v3805_v47, %v5362_v24 }
 0x380   : > { %v3806_v46 = vpop.f32.mrb[14].mxu1  ;;  %v1863_v42 = vadd.f32 %v5362_v24, %v1862_v57 }
 0x381   : > { %v1865_v15 = vpop.f32.mrb[15].mxu1  ;;  %v1874_v61 = vadd.f32 %v3806_v46, %v5362_v24 }
 0x382   : > { %v1866_v53 = vadd.f32 %v5362_v24, %v1865_v15 }
 0x386   : > { %v3853_v16 = vpop.f32.mrb[16].mxu1 }
 0x387   : > { %v3380_v39 = vadd.f32 %v3853_v16, %v5594_v28  ;;  %v3847_v35 = vpop.f32.mrb[28].mxu0  ;;  %v3371_v49 = vpop.f32.mrb[17].mxu1 }
 0x388   : > { %v3228_v63 = vadd.f32 %v3847_v35, %v1871_v44  ;;  %v3372_v51 = vadd.f32 %v5594_v28, %v3371_v49  ;;  %v3183_v60 = vpop.f32.mrb[29].mxu0  ;;  %v3854_v20 = vpop.f32.mrb[18].mxu1 }
 0x389   : > { %3988 = vtanh.f32 %v3380_v39  ;;  %v3226_v59 = vadd.f32 %v3183_v60, %v1863_v42  ;;  %v3383_v2 = vadd.f32 %v3854_v20, %v5594_v28  ;;  %v3848_v45 = vpop.f32.mrb[30].mxu0  ;;  %v3374_v52 = vpop.f32.mrb[19].mxu1 }
 0x38a   : > { %3990 = vtanh.f32 %v3372_v51  ;;  %v3229_v31 = vadd.f32 %v3848_v45, %v1874_v61  ;;  %v3375_v41 = vadd.f32 %v5594_v28, %v3374_v52  ;;  %v3186_v3 = vpop.f32.mrb[31].mxu0  ;;  %v3260_v0 = vmax.f32 %v3228_v63, 0.0 }
 0x38b   : > { %3992 = vtanh.f32 %v3383_v2  ;;  %v3227_v5 = vadd.f32 %v3186_v3, %v1866_v53  ;;  %v3258_v17 = vmax.f32 %v3226_v59, 0.0 }
 0x38c   : > { %v3261_v13 = vmax.f32 %v3229_v31, 0.0  ;;  %3994 = vtanh.f32 %v3375_v41 }
 0x38d   : > { %v3259_v43 = vmax.f32 %v3227_v5, 0.0 }
 0x38e   : > { %v3277_v24 = vpack.c.bf16 %v3261_v13, %v3260_v0  ;;  %v3857_v12 = vpop.f32.mrb[20].mxu1 }
 0x38f   : > { %v3276_v54 = vpack.c.bf16 %v3259_v43, %v3258_v17  ;;  %v3396_v18 = vadd.f32 %v3857_v12, %v5594_v28  ;;  %v3387_v27 = vpop.f32.mrb[21].mxu1 }
 0x390   : > { %v3388_v25 = vadd.f32 %v5594_v28, %v3387_v27  ;;  %v3858_v55 = vpop.f32.mrb[22].mxu1 }
 0x391   : > { %3996 = vtanh.f32 %v3396_v18  ;;  %v3399_v48 = vadd.f32 %v3858_v55, %v5594_v28  ;;  %v3390_v11 = vpop.f32.mrb[23].mxu1  ;;  %3879 = vmatprep.mubr.msk.bf16.mxu1 %vm332_vm0, %v3276_v54 }
 0x392   : > { %3998 = vtanh.f32 %v3388_v25  ;;  %v3391_v19 = vadd.f32 %v5594_v28, %v3390_v11  ;;  %3880 = vmatmul.mubr.msk.bf16.gmra.mrb[44].mxu1 %vm332_vm0, %v3277_v24 }
 0x393   : > { %v3989_v14 = vpop.eup %3988  ;;  %4000 = vtanh.f32 %v3399_v48 }
 0x394   : > { %v3991_v56 = vpop.eup %3990  ;;  %3533 = vst.msk [vmem:[%s5610_s22 + $0x10] sm:$0xff] %vm3530_vm11, %v3989_v14  ;;  %4002 = vtanh.f32 %v3391_v19 }
 0x395   : > { %v3993_v7 = vpop.eup %3992  ;;  %3531 = vst.msk [vmem:[%s5610_s22] sm:$0xff] %vm3530_vm11, %v3991_v56 }
 0x396   : > { %v3995_v21 = vpop.eup %3994  ;;  %3534 = vst.msk [vmem:[%s5610_s22 + $0x18] sm:$0xff] %vm3530_vm11, %v3993_v7  ;;  %v3861_v37 = vpop.f32.mrb[24].mxu1 }
 0x397   : > { %3532 = vst.msk [vmem:[%s5610_s22 + $0x8] sm:$0xff] %vm3530_vm11, %v3995_v21  ;;  %v3412_v1 = vadd.f32 %v3861_v37, %v5594_v28  ;;  %v3403_v58 = vpop.f32.mrb[25].mxu1 }
 0x398   : > { %v3404_v4 = vadd.f32 %v5594_v28, %v3403_v58  ;;  %v3862_v38 = vpop.f32.mrb[26].mxu1 }
 0x399   : > { %4004 = vtanh.f32 %v3412_v1  ;;  %v3415_v9 = vadd.f32 %v3862_v38, %v5594_v28  ;;  %v3406_v32 = vpop.f32.mrb[27].mxu1 }
 0x39a   : > { %4006 = vtanh.f32 %v3404_v4  ;;  %v3407_v34 = vadd.f32 %v5594_v28, %v3406_v32 }
 0x39b   : > { %v3997_v6 = vpop.eup %3996  ;;  %4008 = vtanh.f32 %v3415_v9 }
 0x39c   : > { %v3999_v33 = vpop.eup %3998  ;;  %3537 = vst.msk [vmem:[%s5610_s22 + $0x30] sm:$0xff] %vm3530_vm11, %v3997_v6  ;;  %4010 = vtanh.f32 %v3407_v34 }
 0x39d   : > { %v4001_v29 = vpop.eup %4000  ;;  %3535 = vst.msk [vmem:[%s5610_s22 + $0x20] sm:$0xff] %vm3530_vm11, %v3999_v33 }
 0x39e   : > { %v4003_v50 = vpop.eup %4002  ;;  %3538 = vst.msk [vmem:[%s5610_s22 + $0x38] sm:$0xff] %vm3530_vm11, %v4001_v29  ;;  %v3865_v10 = vpop.f32.mrb[28].mxu1 }
 0x39f   : > { %3536 = vst.msk [vmem:[%s5610_s22 + $0x28] sm:$0xff] %vm3530_vm11, %v4003_v50  ;;  %v3428_v62 = vadd.f32 %v3865_v10, %v5594_v28  ;;  %v3419_v8 = vpop.f32.mrb[29].mxu1 }
 0x3a0   : > { %v3420_v23 = vadd.f32 %v5594_v28, %v3419_v8  ;;  %v3866_v40 = vpop.f32.mrb[30].mxu1 }
 0x3a1   : > { %4012 = vtanh.f32 %v3428_v62  ;;  %v3431_v30 = vadd.f32 %v3866_v40, %v5594_v28  ;;  %v3422_v22 = vpop.f32.mrb[31].mxu1 }
 0x3a2   : > { %4014 = vtanh.f32 %v3420_v23  ;;  %v3423_v36 = vadd.f32 %v5594_v28, %v3422_v22 }
 0x3a3   : > { %v4005_v26 = vpop.eup %4004  ;;  %4016 = vtanh.f32 %v3431_v30 }
 0x3a4   : > { %v4007_v47 = vpop.eup %4006  ;;  %3541 = vst.msk [vmem:[%s5610_s22 + $0x50] sm:$0xff] %vm3530_vm11, %v4005_v26  ;;  %4018 = vtanh.f32 %v3423_v36 }
 0x3a5   : > { %v4009_v57 = vpop.eup %4008  ;;  %3539 = vst.msk [vmem:[%s5610_s22 + $0x40] sm:$0xff] %vm3530_vm11, %v4007_v47 }
 0x3a6   : > { %v4011_v46 = vpop.eup %4010  ;;  %3542 = vst.msk [vmem:[%s5610_s22 + $0x58] sm:$0xff] %vm3530_vm11, %v4009_v57 }
 0x3a7   : > { %3540 = vst.msk [vmem:[%s5610_s22 + $0x48] sm:$0xff] %vm3530_vm11, %v4011_v46 }
 0x3ab   : > { %v4013_v15 = vpop.eup %4012 }
 0x3ac   : > { %v4015_v44 = vpop.eup %4014  ;;  %3545 = vst.msk [vmem:[%s5610_s22 + $0x70] sm:$0xff] %vm3530_vm11, %v4013_v15 }
 0x3ad   : > { %v4017_v16 = vpop.eup %4016  ;;  %3543 = vst.msk [vmem:[%s5610_s22 + $0x60] sm:$0xff] %vm3530_vm11, %v4015_v44 }
 0x3ae   : > { %v4019_v42 = vpop.eup %4018  ;;  %3546 = vst.msk [vmem:[%s5610_s22 + $0x78] sm:$0xff] %vm3530_vm11, %v4017_v16 }
 0x3af   : > { %3544 = vst.msk [vmem:[%s5610_s22 + $0x68] sm:$0xff] %vm3530_vm11, %v4019_v42  ;;  %v3869_v39 = vpop.f32.mrb[32].mxu1 }
 0x3b0   : > { %v3444_v35 = vadd.f32 %v3869_v39, %v5594_v28  ;;  %v3435_v49 = vpop.f32.mrb[33].mxu1 }
 0x3b1   : > { %v3436_v61 = vadd.f32 %v5594_v28, %v3435_v49  ;;  %v3870_v63 = vpop.f32.mrb[34].mxu1 }
 0x3b2   : > { %4020 = vtanh.f32 %v3444_v35  ;;  %v3447_v51 = vadd.f32 %v3870_v63, %v5594_v28  ;;  %v3438_v60 = vpop.f32.mrb[35].mxu1 }
 0x3b3   : > { %4022 = vtanh.f32 %v3436_v61  ;;  %v3439_v20 = vadd.f32 %v5594_v28, %v3438_v60 }
 0x3b4   : > { %4024 = vtanh.f32 %v3447_v51 }
 0x3b5   : > { %4026 = vtanh.f32 %v3439_v20 }
 0x3bc   : > { %v4021_v53 = vpop.eup %4020 }
 0x3bd   : > { %v4023_v59 = vpop.eup %4022  ;;  %3549 = vst.msk [vmem:[%s5610_s22 + $0x90] sm:$0xff] %vm3530_vm11, %v4021_v53 }
 0x3be   : > { %v4025_v2 = vpop.eup %4024  ;;  %3547 = vst.msk [vmem:[%s5610_s22 + $0x80] sm:$0xff] %vm3530_vm11, %v4023_v59 }
 0x3bf   : > { %v4027_v45 = vpop.eup %4026  ;;  %3550 = vst.msk [vmem:[%s5610_s22 + $0x98] sm:$0xff] %vm3530_vm11, %v4025_v2 }
 0x3c0   : > { %3548 = vst.msk [vmem:[%s5610_s22 + $0x88] sm:$0xff] %vm3530_vm11, %v4027_v45 }
 0x3ef   : > { %v3873_v52 = vpop.f32.mrb[36].mxu1 }
 0x3f0   : > { %v3460_v31 = vadd.f32 %v3873_v52, %v5594_v28  ;;  %v3451_v41 = vpop.f32.mrb[37].mxu1 }
 0x3f1   : > { %v3452_v3 = vadd.f32 %v5594_v28, %v3451_v41  ;;  %v3874_v5 = vpop.f32.mrb[38].mxu1 }
 0x3f2   : > { %4028 = vtanh.f32 %v3460_v31  ;;  %v3463_v0 = vadd.f32 %v3874_v5, %v5594_v28  ;;  %v3454_v13 = vpop.f32.mrb[39].mxu1 }
 0x3f3   : > { %4030 = vtanh.f32 %v3452_v3  ;;  %v3455_v17 = vadd.f32 %v5594_v28, %v3454_v13 }
 0x3f4   : > { %4032 = vtanh.f32 %v3463_v0 }
 0x3f5   : > { %4034 = vtanh.f32 %v3455_v17 }
 0x3fc   : > { %v4029_v43 = vpop.eup %4028 }
 0x3fd   : > { %v4031_v24 = vpop.eup %4030  ;;  %3553 = vst.msk [vmem:[%s5610_s22 + $0xb0] sm:$0xff] %vm3530_vm11, %v4029_v43 }
 0x3fe   : > { %v4033_v12 = vpop.eup %4032  ;;  %3551 = vst.msk [vmem:[%s5610_s22 + $0xa0] sm:$0xff] %vm3530_vm11, %v4031_v24 }
 0x3ff   : > { %v4035_v54 = vpop.eup %4034  ;;  %3554 = vst.msk [vmem:[%s5610_s22 + $0xb8] sm:$0xff] %vm3530_vm11, %v4033_v12 }
 0x400   : > { %3552 = vst.msk [vmem:[%s5610_s22 + $0xa8] sm:$0xff] %vm3530_vm11, %v4035_v54 }
 0x42f   : > { %v3877_v18 = vpop.f32.mrb[40].mxu1 }
 0x430   : > { %v3476_v27 = vadd.f32 %v3877_v18, %v5594_v28  ;;  %v3467_v25 = vpop.f32.mrb[41].mxu1 }
 0x431   : > { %v3468_v55 = vadd.f32 %v5594_v28, %v3467_v25  ;;  %v3878_v48 = vpop.f32.mrb[42].mxu1 }
 0x432   : > { %4036 = vtanh.f32 %v3476_v27  ;;  %v3479_v11 = vadd.f32 %v3878_v48, %v5594_v28  ;;  %v3470_v19 = vpop.f32.mrb[43].mxu1 }
 0x433   : > { %4038 = vtanh.f32 %v3468_v55  ;;  %v3471_v14 = vadd.f32 %v5594_v28, %v3470_v19 }
 0x434   : > { %4040 = vtanh.f32 %v3479_v11 }
 0x435   : > { %4042 = vtanh.f32 %v3471_v14 }
 0x43c   : > { %v4037_v56 = vpop.eup %4036 }
 0x43d   : > { %v4039_v7 = vpop.eup %4038  ;;  %3557 = vst.msk [vmem:[%s5610_s22 + $0xd0] sm:$0xff] %vm3530_vm11, %v4037_v56 }
 0x43e   : > { %v4041_v21 = vpop.eup %4040  ;;  %3555 = vst.msk [vmem:[%s5610_s22 + $0xc0] sm:$0xff] %vm3530_vm11, %v4039_v7 }
 0x43f   : > { %v4043_v37 = vpop.eup %4042  ;;  %3558 = vst.msk [vmem:[%s5610_s22 + $0xd8] sm:$0xff] %vm3530_vm11, %v4041_v21 }
 0x440   : > { %3556 = vst.msk [vmem:[%s5610_s22 + $0xc8] sm:$0xff] %vm3530_vm11, %v4043_v37 }
 0x465   : > { %v3881_v1 = vpop.f32.mrb[44].mxu1 }
 0x466   : > { %v3492_v58 = vadd.f32 %v3881_v1, %v5594_v28  ;;  %v3483_v4 = vpop.f32.mrb[45].mxu1 }
 0x467   : > { %v3484_v38 = vadd.f32 %v5594_v28, %v3483_v4  ;;  %v3882_v9 = vpop.f32.mrb[46].mxu1 }
 0x468   : > { %4044 = vtanh.f32 %v3492_v58  ;;  %v3495_v32 = vadd.f32 %v3882_v9, %v5594_v28  ;;  %v3486_v34 = vpop.f32.mrb[47].mxu1 }
 0x469   : > { %4046 = vtanh.f32 %v3484_v38  ;;  %v3487_v6 = vadd.f32 %v5594_v28, %v3486_v34 }
 0x46a   : > { %4048 = vtanh.f32 %v3495_v32 }
 0x46b   : > { %4050 = vtanh.f32 %v3487_v6 }
 0x472   : > { %v4045_v33 = vpop.eup %4044 }
 0x473   : > { %v4047_v29 = vpop.eup %4046  ;;  %3561 = vst.msk [vmem:[%s5610_s22 + $0xf0] sm:$0xff] %vm3530_vm11, %v4045_v33 }
 0x474   : > { %v4049_v50 = vpop.eup %4048  ;;  %3559 = vst.msk [vmem:[%s5610_s22 + $0xe0] sm:$0xff] %vm3530_vm11, %v4047_v29 }
 0x475   : > { %v4051_v10 = vpop.eup %4050  ;;  %3562 = vst.msk [vmem:[%s5610_s22 + $0xf8] sm:$0xff] %vm3530_vm11, %v4049_v50 }
 0x476   : > { %3560 = vst.msk [vmem:[%s5610_s22 + $0xe8] sm:$0xff] %vm3530_vm11, %v4051_v10 }
 0x477 PF: > { %s17_s24 = sadd.s32 1, %s4058_s24  }
 0x478   : > { %p14_p4 = scmp.ge.s32.totalorder %s17_s24, 4  }
 0x47a   :  { %16 = sbr.rel (!%p14_p4) target bundleno = 1 (0x1), region = 85 }

</bundles_post_ra>
